<compile_context>
chip_gen: v6e
topology: v6e:2x2x1
jax: 0.10.0
libtpu: 0.0.40
codegen_flags: <defaults>
</compile_context>

<pallas_src>
import jax
import jax.numpy as jnp
from jax.experimental import pallas as pl
from jax.experimental.pallas import tpu as pltpu

# ---- small, forward-consistent config -------------------------------------
V = 64            # vocab size
L = 8             # context length (seq)
D = 32            # transformer width (d_model)
H = 4             # attention heads
NLAYERS = 2       # transformer layers
E = 16            # text embedding dim (text_projection output)
B = 2             # number of class-name prompts (batch)
DH = D // H
EPS = 1e-5
NEG = -1e9        # causal-mask fill
SCALE = 1.0 / (DH ** 0.5)
OUT_PAD = 128     # lane-dense padded width of the kernel's stored output
PARAMS_PER_LAYER = 12
N_PARAM_REFS = PARAMS_PER_LAYER * NLAYERS + 3   # + ln_final g, b, proj_pad


# ---- shared math (traced inside the Pallas kernel and by the reference) ----
def _mm(a, b):
    """MXU matmul: bf16 operands, f32 accumulation."""
    return jnp.dot(a.astype(jnp.bfloat16), b.astype(jnp.bfloat16),
                   preferred_element_type=jnp.float32)


def _bmm(eq, a, b):
    """Batched (one batch dim) MXU matmul: bf16 operands, f32 accumulation."""
    return jnp.einsum(eq, a.astype(jnp.bfloat16), b.astype(jnp.bfloat16),
                      preferred_element_type=jnp.float32)


def _layer_norm(x, g, b):
    mu = jnp.mean(x, axis=-1, keepdims=True)
    var = jnp.mean(jnp.square(x - mu), axis=-1, keepdims=True)
    return (x - mu) * jax.lax.rsqrt(var + EPS) * g + b


def _causal_mask():
    row = jax.lax.broadcasted_iota(jnp.int32, (L, L), 0)
    col = jax.lax.broadcasted_iota(jnp.int32, (L, L), 1)
    return jnp.where(col <= row, 0.0, NEG).astype(jnp.float32)


def _attention(xn, wqkv, bqkv, wo, bo, mask):
    """Causal MHSA over the flattened batch xn: (B*L, D)."""
    qkv = _mm(xn, wqkv) + bqkv                         # single QKV matmul, all rows
    attn = None
    for h in range(H):                                 # static loop; batched over B
        q = qkv[:, h * DH:(h + 1) * DH].reshape(B, L, DH)
        k = qkv[:, D + h * DH:D + (h + 1) * DH].reshape(B, L, DH)
        v = qkv[:, 2 * D + h * DH:2 * D + (h + 1) * DH].reshape(B, L, DH)
        s = _bmm("bld,bmd->blm", q, k) * SCALE + mask[None]
        s = s - jnp.max(s, axis=-1, keepdims=True)
        p = jnp.exp(s)
        p = p / jnp.sum(p, axis=-1, keepdims=True)     # softmax in f32
        o_h = _bmm("blm,bmd->bld", p, v).reshape(B * L, DH)
        c = _mm(o_h, wo[h * DH:(h + 1) * DH, :])       # head slice of W_o rows
        attn = c if attn is None else attn + c         # accumulate -> no concat
    return attn + bo


def _mlp(xn, w1, b1, w2, b2):
    h = _mm(xn, w1) + b1
    h = h * jax.nn.sigmoid(1.702 * h)                  # QuickGELU (f32 elementwise)
    return _mm(h, w2) + b2


def _resblock(x, p, mask):
    (ln1g, ln1b, wqkv, bqkv, wo, bo, ln2g, ln2b, w1, b1, w2, b2) = p
    x = x + _attention(_layer_norm(x, ln1g, ln1b), wqkv, bqkv, wo, bo, mask)
    x = x + _mlp(_layer_norm(x, ln2g, ln2b), w1, b1, w2, b2)
    return x


# ---- fused Pallas kernel ----------------------------------------------------
def text_encoder_kernel(eot_ref, x_ref, *rest):
    # rest = (*param_refs, o_ref, xs_ref)
    param_refs = rest[:N_PARAM_REFS]
    o_ref = rest[N_PARAM_REFS]
    xs_ref = rest[N_PARAM_REFS + 1]

    mask = _causal_mask()                              # built once (single invocation)
    x = x_ref[...]                                     # (B*L, D), stays VMEM-resident

    idx = 0
    for _ in range(NLAYERS):                           # unrolled: weights all in VMEM
        lp = [param_refs[idx + j][...] for j in range(PARAMS_PER_LAYER)]
        idx += PARAMS_PER_LAYER
        x = _resblock(x, lp, mask)

    lnfg = param_refs[idx][...]
    lnfb = param_refs[idx + 1][...]
    proj = param_refs[idx + 2][...]                    # (D, OUT_PAD), lane-padded

    xn = _layer_norm(x, lnfg, lnfb)                    # (B*L, D)
    xs_ref[...] = xn                                   # stage for dynamic row gather

    rows = []
    for b in range(B):                                 # EOT gather via scalar prefetch
        e = eot_ref[b]                                 # int32 scalar from SMEM
        rows.append(xs_ref[pl.ds(b * L + e, 1), :])    # (1, D)
    x_eot = jnp.concatenate(rows, axis=0)              # (B, D)

    o_ref[...] = _mm(x_eot, proj)                      # (B, 128) lane-dense store


# ---- parameter / input construction ----------------------------------------
def init_params(key):
    ks = iter(jax.random.split(key, 8 + 12 * NLAYERS))

    def nrm(shape, std=0.02):
        return (std * jax.random.normal(next(ks), shape)).astype(jnp.float32)

    token_embedding = nrm((V, D))
    positional_embedding = nrm((L, D), std=0.01)
    layers = []
    for _ in range(NLAYERS):
        layers.append(dict(
            ln1g=jnp.ones((1, D), jnp.float32), ln1b=jnp.zeros((1, D), jnp.float32),
            wqkv=nrm((D, 3 * D)), bqkv=jnp.zeros((1, 3 * D), jnp.float32),
            wo=nrm((D, D)), bo=jnp.zeros((1, D), jnp.float32),
            ln2g=jnp.ones((1, D), jnp.float32), ln2b=jnp.zeros((1, D), jnp.float32),
            w1=nrm((D, 4 * D)), b1=jnp.zeros((1, 4 * D), jnp.float32),
            w2=nrm((4 * D, D)), b2=jnp.zeros((1, D), jnp.float32),
        ))
    ln_final_g = jnp.ones((1, D), jnp.float32)
    ln_final_b = jnp.zeros((1, D), jnp.float32)
    text_projection = nrm((D, E), std=D ** -0.5)
    return (token_embedding, positional_embedding, layers,
            ln_final_g, ln_final_b, text_projection)


def make_tokens(key, num_classes):
    # TODO(synk): CLIP BPE tokenization of "a photo of a {classname}." is host-side
    # string processing; replaced by deterministic synthetic token ids with the same
    # structure (SOT, words, EOT = max id, zero padding).
    SOT, EOT = V - 2, V - 1
    body = jax.random.randint(key, (num_classes, L - 3), 1, V - 2)
    toks = jnp.zeros((num_classes, L), jnp.int32)
    toks = toks.at[:, 0].set(SOT)
    toks = toks.at[:, 1:L - 2].set(body)
    toks = toks.at[:, L - 2].set(EOT)
    return toks


def _layer_param_list(lp):
    return [lp["ln1g"], lp["ln1b"], lp["wqkv"], lp["bqkv"], lp["wo"], lp["bo"],
            lp["ln2g"], lp["ln2b"], lp["w1"], lp["b1"], lp["w2"], lp["b2"]]


# ---- wrapper: one fused pallas_call -----------------------------------------
def text_encoder_forward(tokens, params):
    tok_emb, pos_emb, layers, lng, lnb, proj = params
    # Glue (XLA): data-dependent embedding gather + positional add.
    x = jnp.take(tok_emb, tokens, axis=0) + pos_emb[None]        # (B, L, D)
    x2 = x.reshape(B * L, D)
    eot_idx = jnp.argmax(tokens, axis=-1).astype(jnp.int32)      # (B,) EOT positions
    proj_pad = jnp.zeros((D, OUT_PAD), jnp.float32).at[:, :E].set(proj)

    flat = []
    for lp in layers:
        flat += _layer_param_list(lp)
    flat += [lng, lnb, proj_pad]

    out_pad = pl.pallas_call(
        text_encoder_kernel,
        out_shape=jax.ShapeDtypeStruct((B, OUT_PAD), jnp.float32),
        grid_spec=pltpu.PrefetchScalarGridSpec(
            num_scalar_prefetch=1,
            grid=(1,),
            in_specs=[pl.BlockSpec((B * L, D), lambda i, e: (0, 0))]
                     + [pl.BlockSpec(p.shape, lambda i, e: (0, 0)) for p in flat],
            out_specs=pl.BlockSpec((B, OUT_PAD), lambda i, e: (0, 0)),
            scratch_shapes=[pltpu.VMEM((B * L, D), jnp.float32)],
        ),
        compiler_params=pltpu.CompilerParams(
            dimension_semantics=("arbitrary",)),
    )(eot_idx, x2, *flat)
    return out_pad[:, :E]                                        # un-pad lanes


# ---- pure-JAX reference (same math helpers, independent plumbing) -----------
def text_encoder_reference(tokens, params):
    tok_emb, pos_emb, layers, lng, lnb, proj = params
    x = jnp.take(tok_emb, tokens, axis=0) + pos_emb[None]
    x2 = x.reshape(B * L, D)
    mask = _causal_mask()
    for lp in layers:
        x2 = _resblock(x2, _layer_param_list(lp), mask)
    xn = _layer_norm(x2, lng, lnb).reshape(B, L, D)
    eot_idx = jnp.argmax(tokens, axis=-1)
    x_eot = xn[jnp.arange(B), eot_idx]                           # (B, D)
    return _mm(x_eot, proj)                                      # (B, E)


if __name__ == "__main__":
    key = jax.random.PRNGKey(0)
    k_par, k_tok = jax.random.split(key)
    params = init_params(k_par)
    tokens = make_tokens(k_tok, num_classes=B)    # B = 2 class-name prompts

    out = jax.jit(text_encoder_forward)(tokens, params)
    out = jax.block_until_ready(out)
    assert out.shape == (B, E) and out.dtype == jnp.float32

    ref = jax.block_until_ready(jax.jit(text_encoder_reference)(tokens, params))
    assert jnp.allclose(out, ref, rtol=2e-3, atol=2e-3), "mismatch vs reference"

    print("KERNEL_OK")
</pallas_src>

<mosaic_0001>
module attributes {stable_mosaic.version = 11 : i64} {
  func.func @text_encoder_kernel(%arg0: i32, %arg1: memref<2xi32, #tpu.memory_space<smem>>, %arg2: memref<16x32xf32, #tpu.memory_space<vmem>>, %arg3: memref<1x32xf32, #tpu.memory_space<vmem>>, %arg4: memref<1x32xf32, #tpu.memory_space<vmem>>, %arg5: memref<32x96xf32, #tpu.memory_space<vmem>>, %arg6: memref<1x96xf32, #tpu.memory_space<vmem>>, %arg7: memref<32x32xf32, #tpu.memory_space<vmem>>, %arg8: memref<1x32xf32, #tpu.memory_space<vmem>>, %arg9: memref<1x32xf32, #tpu.memory_space<vmem>>, %arg10: memref<1x32xf32, #tpu.memory_space<vmem>>, %arg11: memref<32x128xf32, #tpu.memory_space<vmem>>, %arg12: memref<1x128xf32, #tpu.memory_space<vmem>>, %arg13: memref<128x32xf32, #tpu.memory_space<vmem>>, %arg14: memref<1x32xf32, #tpu.memory_space<vmem>>, %arg15: memref<1x32xf32, #tpu.memory_space<vmem>>, %arg16: memref<1x32xf32, #tpu.memory_space<vmem>>, %arg17: memref<32x96xf32, #tpu.memory_space<vmem>>, %arg18: memref<1x96xf32, #tpu.memory_space<vmem>>, %arg19: memref<32x32xf32, #tpu.memory_space<vmem>>, %arg20: memref<1x32xf32, #tpu.memory_space<vmem>>, %arg21: memref<1x32xf32, #tpu.memory_space<vmem>>, %arg22: memref<1x32xf32, #tpu.memory_space<vmem>>, %arg23: memref<32x128xf32, #tpu.memory_space<vmem>>, %arg24: memref<1x128xf32, #tpu.memory_space<vmem>>, %arg25: memref<128x32xf32, #tpu.memory_space<vmem>>, %arg26: memref<1x32xf32, #tpu.memory_space<vmem>>, %arg27: memref<1x32xf32, #tpu.memory_space<vmem>>, %arg28: memref<1x32xf32, #tpu.memory_space<vmem>>, %arg29: memref<32x128xf32, #tpu.memory_space<vmem>>, %arg30: memref<2x128xf32, #tpu.memory_space<vmem>>, %arg31: memref<16x32xf32, #tpu.memory_space<vmem>>) attributes {dimension_semantics = [#tpu.dimension_semantics<arbitrary>], iteration_bounds = array<i64: 1>, scalar_prefetch = 1 : i64, scratch_operands = 1 : i64, tpu.core_type = #tpu.core_type<tc>, window_params = [{pipeline_mode = #tpu.pipeline_mode<synchronous>, transform_indices = @transform_0, window_bounds = array<i64: 16, 32>}, {pipeline_mode = #tpu.pipeline_mode<synchronous>, transform_indices = @transform_1, window_bounds = array<i64: 1, 32>}, {pipeline_mode = #tpu.pipeline_mode<synchronous>, transform_indices = @transform_2, window_bounds = array<i64: 1, 32>}, {pipeline_mode = #tpu.pipeline_mode<synchronous>, transform_indices = @transform_3, window_bounds = array<i64: 32, 96>}, {pipeline_mode = #tpu.pipeline_mode<synchronous>, transform_indices = @transform_4, window_bounds = array<i64: 1, 96>}, {pipeline_mode = #tpu.pipeline_mode<synchronous>, transform_indices = @transform_5, window_bounds = array<i64: 32, 32>}, {pipeline_mode = #tpu.pipeline_mode<synchronous>, transform_indices = @transform_6, window_bounds = array<i64: 1, 32>}, {pipeline_mode = #tpu.pipeline_mode<synchronous>, transform_indices = @transform_7, window_bounds = array<i64: 1, 32>}, {pipeline_mode = #tpu.pipeline_mode<synchronous>, transform_indices = @transform_8, window_bounds = array<i64: 1, 32>}, {pipeline_mode = #tpu.pipeline_mode<synchronous>, transform_indices = @transform_9, window_bounds = array<i64: 32, 128>}, {pipeline_mode = #tpu.pipeline_mode<synchronous>, transform_indices = @transform_10, window_bounds = array<i64: 1, 128>}, {pipeline_mode = #tpu.pipeline_mode<synchronous>, transform_indices = @transform_11, window_bounds = array<i64: 128, 32>}, {pipeline_mode = #tpu.pipeline_mode<synchronous>, transform_indices = @transform_12, window_bounds = array<i64: 1, 32>}, {pipeline_mode = #tpu.pipeline_mode<synchronous>, transform_indices = @transform_13, window_bounds = array<i64: 1, 32>}, {pipeline_mode = #tpu.pipeline_mode<synchronous>, transform_indices = @transform_14, window_bounds = array<i64: 1, 32>}, {pipeline_mode = #tpu.pipeline_mode<synchronous>, transform_indices = @transform_15, window_bounds = array<i64: 32, 96>}, {pipeline_mode = #tpu.pipeline_mode<synchronous>, transform_indices = @transform_16, window_bounds = array<i64: 1, 96>}, {pipeline_mode = #tpu.pipeline_mode<synchronous>, transform_indices = @transform_17, window_bounds = array<i64: 32, 32>}, {pipeline_mode = #tpu.pipeline_mode<synchronous>, transform_indices = @transform_18, window_bounds = array<i64: 1, 32>}, {pipeline_mode = #tpu.pipeline_mode<synchronous>, transform_indices = @transform_19, window_bounds = array<i64: 1, 32>}, {pipeline_mode = #tpu.pipeline_mode<synchronous>, transform_indices = @transform_20, window_bounds = array<i64: 1, 32>}, {pipeline_mode = #tpu.pipeline_mode<synchronous>, transform_indices = @transform_21, window_bounds = array<i64: 32, 128>}, {pipeline_mode = #tpu.pipeline_mode<synchronous>, transform_indices = @transform_22, window_bounds = array<i64: 1, 128>}, {pipeline_mode = #tpu.pipeline_mode<synchronous>, transform_indices = @transform_23, window_bounds = array<i64: 128, 32>}, {pipeline_mode = #tpu.pipeline_mode<synchronous>, transform_indices = @transform_24, window_bounds = array<i64: 1, 32>}, {pipeline_mode = #tpu.pipeline_mode<synchronous>, transform_indices = @transform_25, window_bounds = array<i64: 1, 32>}, {pipeline_mode = #tpu.pipeline_mode<synchronous>, transform_indices = @transform_26, window_bounds = array<i64: 1, 32>}, {pipeline_mode = #tpu.pipeline_mode<synchronous>, transform_indices = @transform_27, window_bounds = array<i64: 32, 128>}, {pipeline_mode = #tpu.pipeline_mode<synchronous>, transform_indices = @transform_28, window_bounds = array<i64: 2, 128>}]} {
    %0 = tpu.iota {dimensions = array<i32: 0>} : vector<8x8xi32>
    %1 = tpu.iota {dimensions = array<i32: 1>} : vector<8x8xi32>
    %2 = arith.cmpi sle, %1, %0 : vector<8x8xi32>
    %cst = arith.constant 0.000000e+00 : f32
    %cst_0 = arith.constant -1.000000e+09 : f32
    %3 = vector.broadcast %cst : f32 to vector<8x8xf32>
    %4 = vector.broadcast %cst_0 : f32 to vector<8x8xf32>
    %5 = arith.select %2, %3, %4 : vector<8x8xi1>, vector<8x8xf32>
    %c0 = arith.constant 0 : index
    %c0_1 = arith.constant 0 : index
    %6 = vector.load %arg2[%c0, %c0_1] : memref<16x32xf32, #tpu.memory_space<vmem>>, vector<16x32xf32>
    %c0_2 = arith.constant 0 : index
    %c0_3 = arith.constant 0 : index
    %7 = vector.load %arg3[%c0_2, %c0_3] : memref<1x32xf32, #tpu.memory_space<vmem>>, vector<1x32xf32>
    %c0_4 = arith.constant 0 : index
    %c0_5 = arith.constant 0 : index
    %8 = vector.load %arg4[%c0_4, %c0_5] : memref<1x32xf32, #tpu.memory_space<vmem>>, vector<1x32xf32>
    %c0_6 = arith.constant 0 : index
    %c0_7 = arith.constant 0 : index
    %9 = vector.load %arg5[%c0_6, %c0_7] : memref<32x96xf32, #tpu.memory_space<vmem>>, vector<32x96xf32>
    %c0_8 = arith.constant 0 : index
    %c0_9 = arith.constant 0 : index
    %10 = vector.load %arg6[%c0_8, %c0_9] : memref<1x96xf32, #tpu.memory_space<vmem>>, vector<1x96xf32>
    %c0_10 = arith.constant 0 : index
    %c0_11 = arith.constant 0 : index
    %11 = vector.load %arg7[%c0_10, %c0_11] : memref<32x32xf32, #tpu.memory_space<vmem>>, vector<32x32xf32>
    %c0_12 = arith.constant 0 : index
    %c0_13 = arith.constant 0 : index
    %12 = vector.load %arg8[%c0_12, %c0_13] : memref<1x32xf32, #tpu.memory_space<vmem>>, vector<1x32xf32>
    %c0_14 = arith.constant 0 : index
    %c0_15 = arith.constant 0 : index
    %13 = vector.load %arg9[%c0_14, %c0_15] : memref<1x32xf32, #tpu.memory_space<vmem>>, vector<1x32xf32>
    %c0_16 = arith.constant 0 : index
    %c0_17 = arith.constant 0 : index
    %14 = vector.load %arg10[%c0_16, %c0_17] : memref<1x32xf32, #tpu.memory_space<vmem>>, vector<1x32xf32>
    %c0_18 = arith.constant 0 : index
    %c0_19 = arith.constant 0 : index
    %15 = vector.load %arg11[%c0_18, %c0_19] : memref<32x128xf32, #tpu.memory_space<vmem>>, vector<32x128xf32>
    %c0_20 = arith.constant 0 : index
    %c0_21 = arith.constant 0 : index
    %16 = vector.load %arg12[%c0_20, %c0_21] : memref<1x128xf32, #tpu.memory_space<vmem>>, vector<1x128xf32>
    %c0_22 = arith.constant 0 : index
    %c0_23 = arith.constant 0 : index
    %17 = vector.load %arg13[%c0_22, %c0_23] : memref<128x32xf32, #tpu.memory_space<vmem>>, vector<128x32xf32>
    %c0_24 = arith.constant 0 : index
    %c0_25 = arith.constant 0 : index
    %18 = vector.load %arg14[%c0_24, %c0_25] : memref<1x32xf32, #tpu.memory_space<vmem>>, vector<1x32xf32>
    %cst_26 = arith.constant dense<0.000000e+00> : vector<16xf32>
    %19 = vector.multi_reduction <add>, %6, %cst_26 [1] : vector<16x32xf32> to vector<16xf32>
    %20 = vector.shape_cast %19 : vector<16xf32> to vector<16x1xf32>
    %cst_27 = arith.constant 3.200000e+01 : f32
    %21 = vector.broadcast %cst_27 : f32 to vector<16x1xf32>
    %22 = arith.divf %20, %21 : vector<16x1xf32>
    %23 = vector.broadcast %22 : vector<16x1xf32> to vector<16x32xf32>
    %24 = arith.subf %6, %23 : vector<16x32xf32>
    %25 = arith.mulf %24, %24 : vector<16x32xf32>
    %cst_28 = arith.constant dense<0.000000e+00> : vector<16xf32>
    %26 = vector.multi_reduction <add>, %25, %cst_28 [1] : vector<16x32xf32> to vector<16xf32>
    %27 = vector.shape_cast %26 : vector<16xf32> to vector<16x1xf32>
    %cst_29 = arith.constant 3.200000e+01 : f32
    %28 = vector.broadcast %cst_29 : f32 to vector<16x1xf32>
    %29 = arith.divf %27, %28 : vector<16x1xf32>
    %30 = vector.broadcast %22 : vector<16x1xf32> to vector<16x32xf32>
    %31 = arith.subf %6, %30 : vector<16x32xf32>
    %cst_30 = arith.constant 9.99999974E-6 : f32
    %32 = vector.broadcast %cst_30 : f32 to vector<16x1xf32>
    %33 = arith.addf %29, %32 : vector<16x1xf32>
    %34 = math.rsqrt %33 : vector<16x1xf32>
    %35 = vector.broadcast %34 : vector<16x1xf32> to vector<16x32xf32>
    %36 = arith.mulf %31, %35 : vector<16x32xf32>
    %37 = vector.broadcast %7 : vector<1x32xf32> to vector<16x32xf32>
    %38 = arith.mulf %36, %37 : vector<16x32xf32>
    %39 = vector.broadcast %8 : vector<1x32xf32> to vector<16x32xf32>
    %40 = arith.addf %38, %39 : vector<16x32xf32>
    %41 = arith.truncf %40 : vector<16x32xf32> to vector<16x32xbf16>
    %42 = arith.truncf %9 : vector<32x96xf32> to vector<32x96xbf16>
    %cst_31 = arith.constant dense<0.000000e+00> : vector<16x96xf32>
    %43 = tpu.matmul %41, %42, %cst_31 {dimension_numbers = #tpu.dot_dimension_numbers<[1], [0], [0], [1], [0, 0, 1, 1], [], []>} : vector<16x32xbf16>, vector<32x96xbf16>, vector<16x96xf32> -> vector<16x96xf32>
    %44 = vector.broadcast %10 : vector<1x96xf32> to vector<16x96xf32>
    %45 = arith.addf %43, %44 : vector<16x96xf32>
    %46 = vector.extract_strided_slice %45 {offsets = [0, 0], sizes = [16, 8], strides = [1, 1]} : vector<16x96xf32> to vector<16x8xf32>
    %47 = vector.shape_cast %46 : vector<16x8xf32> to vector<2x8x8xf32>
    %48 = vector.extract_strided_slice %45 {offsets = [0, 32], sizes = [16, 8], strides = [1, 1]} : vector<16x96xf32> to vector<16x8xf32>
    %49 = vector.shape_cast %48 : vector<16x8xf32> to vector<2x8x8xf32>
    %50 = vector.extract_strided_slice %45 {offsets = [0, 64], sizes = [16, 8], strides = [1, 1]} : vector<16x96xf32> to vector<16x8xf32>
    %51 = vector.shape_cast %50 : vector<16x8xf32> to vector<2x8x8xf32>
    %52 = arith.truncf %47 : vector<2x8x8xf32> to vector<2x8x8xbf16>
    %53 = arith.truncf %49 : vector<2x8x8xf32> to vector<2x8x8xbf16>
    "tpu.trace_start"() <{level = 10 : i32, message = "bld,bmd->blm"}> : () -> ()
    %cst_32 = arith.constant dense<0.000000e+00> : vector<2x8x8xf32>
    %54 = tpu.matmul %52, %53, %cst_32 {dimension_numbers = #tpu.dot_dimension_numbers<[2], [2], [1], [1], [0, 0, 0, 1, 1, 1], [0], [0]>} : vector<2x8x8xbf16>, vector<2x8x8xbf16>, vector<2x8x8xf32> -> vector<2x8x8xf32>
    "tpu.trace_stop"() : () -> ()
    %cst_33 = arith.constant 0.353553385 : f32
    %55 = vector.broadcast %cst_33 : f32 to vector<2x8x8xf32>
    %56 = arith.mulf %54, %55 : vector<2x8x8xf32>
    %57 = vector.shape_cast %5 : vector<8x8xf32> to vector<1x8x8xf32>
    %58 = vector.broadcast %57 : vector<1x8x8xf32> to vector<2x8x8xf32>
    %59 = arith.addf %56, %58 : vector<2x8x8xf32>
    %cst_34 = arith.constant dense<0xFF800000> : vector<2x8xf32>
    %60 = vector.multi_reduction <maximumf>, %59, %cst_34 [2] : vector<2x8x8xf32> to vector<2x8xf32>
    %61 = vector.shape_cast %60 : vector<2x8xf32> to vector<2x8x1xf32>
    %62 = vector.broadcast %61 : vector<2x8x1xf32> to vector<2x8x8xf32>
    %63 = arith.subf %59, %62 : vector<2x8x8xf32>
    %64 = math.exp %63 : vector<2x8x8xf32>
    %cst_35 = arith.constant dense<0.000000e+00> : vector<2x8xf32>
    %65 = vector.multi_reduction <add>, %64, %cst_35 [2] : vector<2x8x8xf32> to vector<2x8xf32>
    %66 = vector.shape_cast %65 : vector<2x8xf32> to vector<2x8x1xf32>
    %67 = vector.broadcast %66 : vector<2x8x1xf32> to vector<2x8x8xf32>
    %68 = arith.divf %64, %67 : vector<2x8x8xf32>
    %69 = arith.truncf %68 : vector<2x8x8xf32> to vector<2x8x8xbf16>
    %70 = arith.truncf %51 : vector<2x8x8xf32> to vector<2x8x8xbf16>
    "tpu.trace_start"() <{level = 10 : i32, message = "blm,bmd->bld"}> : () -> ()
    %cst_36 = arith.constant dense<0.000000e+00> : vector<2x8x8xf32>
    %71 = tpu.matmul %69, %70, %cst_36 {dimension_numbers = #tpu.dot_dimension_numbers<[2], [1], [1], [2], [0, 0, 0, 1, 1, 2], [0], [0]>} : vector<2x8x8xbf16>, vector<2x8x8xbf16>, vector<2x8x8xf32> -> vector<2x8x8xf32>
    "tpu.trace_stop"() : () -> ()
    %72 = vector.shape_cast %71 : vector<2x8x8xf32> to vector<16x8xf32>
    %73 = vector.extract_strided_slice %11 {offsets = [0, 0], sizes = [8, 32], strides = [1, 1]} : vector<32x32xf32> to vector<8x32xf32>
    %74 = arith.truncf %72 : vector<16x8xf32> to vector<16x8xbf16>
    %75 = arith.truncf %73 : vector<8x32xf32> to vector<8x32xbf16>
    %cst_37 = arith.constant dense<0.000000e+00> : vector<16x32xf32>
    %76 = tpu.matmul %74, %75, %cst_37 {dimension_numbers = #tpu.dot_dimension_numbers<[1], [0], [0], [1], [0, 0, 1, 1], [], []>} : vector<16x8xbf16>, vector<8x32xbf16>, vector<16x32xf32> -> vector<16x32xf32>
    %77 = vector.extract_strided_slice %45 {offsets = [0, 8], sizes = [16, 8], strides = [1, 1]} : vector<16x96xf32> to vector<16x8xf32>
    %78 = vector.shape_cast %77 : vector<16x8xf32> to vector<2x8x8xf32>
    %79 = vector.extract_strided_slice %45 {offsets = [0, 40], sizes = [16, 8], strides = [1, 1]} : vector<16x96xf32> to vector<16x8xf32>
    %80 = vector.shape_cast %79 : vector<16x8xf32> to vector<2x8x8xf32>
    %81 = vector.extract_strided_slice %45 {offsets = [0, 72], sizes = [16, 8], strides = [1, 1]} : vector<16x96xf32> to vector<16x8xf32>
    %82 = vector.shape_cast %81 : vector<16x8xf32> to vector<2x8x8xf32>
    %83 = arith.truncf %78 : vector<2x8x8xf32> to vector<2x8x8xbf16>
    %84 = arith.truncf %80 : vector<2x8x8xf32> to vector<2x8x8xbf16>
    "tpu.trace_start"() <{level = 10 : i32, message = "bld,bmd->blm"}> : () -> ()
    %cst_38 = arith.constant dense<0.000000e+00> : vector<2x8x8xf32>
    %85 = tpu.matmul %83, %84, %cst_38 {dimension_numbers = #tpu.dot_dimension_numbers<[2], [2], [1], [1], [0, 0, 0, 1, 1, 1], [0], [0]>} : vector<2x8x8xbf16>, vector<2x8x8xbf16>, vector<2x8x8xf32> -> vector<2x8x8xf32>
    "tpu.trace_stop"() : () -> ()
    %cst_39 = arith.constant 0.353553385 : f32
    %86 = vector.broadcast %cst_39 : f32 to vector<2x8x8xf32>
    %87 = arith.mulf %85, %86 : vector<2x8x8xf32>
    %88 = vector.shape_cast %5 : vector<8x8xf32> to vector<1x8x8xf32>
    %89 = vector.broadcast %88 : vector<1x8x8xf32> to vector<2x8x8xf32>
    %90 = arith.addf %87, %89 : vector<2x8x8xf32>
    %cst_40 = arith.constant dense<0xFF800000> : vector<2x8xf32>
    %91 = vector.multi_reduction <maximumf>, %90, %cst_40 [2] : vector<2x8x8xf32> to vector<2x8xf32>
    %92 = vector.shape_cast %91 : vector<2x8xf32> to vector<2x8x1xf32>
    %93 = vector.broadcast %92 : vector<2x8x1xf32> to vector<2x8x8xf32>
    %94 = arith.subf %90, %93 : vector<2x8x8xf32>
    %95 = math.exp %94 : vector<2x8x8xf32>
    %cst_41 = arith.constant dense<0.000000e+00> : vector<2x8xf32>
    %96 = vector.multi_reduction <add>, %95, %cst_41 [2] : vector<2x8x8xf32> to vector<2x8xf32>
    %97 = vector.shape_cast %96 : vector<2x8xf32> to vector<2x8x1xf32>
    %98 = vector.broadcast %97 : vector<2x8x1xf32> to vector<2x8x8xf32>
    %99 = arith.divf %95, %98 : vector<2x8x8xf32>
    %100 = arith.truncf %99 : vector<2x8x8xf32> to vector<2x8x8xbf16>
    %101 = arith.truncf %82 : vector<2x8x8xf32> to vector<2x8x8xbf16>
    "tpu.trace_start"() <{level = 10 : i32, message = "blm,bmd->bld"}> : () -> ()
    %cst_42 = arith.constant dense<0.000000e+00> : vector<2x8x8xf32>
    %102 = tpu.matmul %100, %101, %cst_42 {dimension_numbers = #tpu.dot_dimension_numbers<[2], [1], [1], [2], [0, 0, 0, 1, 1, 2], [0], [0]>} : vector<2x8x8xbf16>, vector<2x8x8xbf16>, vector<2x8x8xf32> -> vector<2x8x8xf32>
    "tpu.trace_stop"() : () -> ()
    %103 = vector.shape_cast %102 : vector<2x8x8xf32> to vector<16x8xf32>
    %104 = vector.extract_strided_slice %11 {offsets = [8, 0], sizes = [8, 32], strides = [1, 1]} : vector<32x32xf32> to vector<8x32xf32>
    %105 = arith.truncf %103 : vector<16x8xf32> to vector<16x8xbf16>
    %106 = arith.truncf %104 : vector<8x32xf32> to vector<8x32xbf16>
    %cst_43 = arith.constant dense<0.000000e+00> : vector<16x32xf32>
    %107 = tpu.matmul %105, %106, %cst_43 {dimension_numbers = #tpu.dot_dimension_numbers<[1], [0], [0], [1], [0, 0, 1, 1], [], []>} : vector<16x8xbf16>, vector<8x32xbf16>, vector<16x32xf32> -> vector<16x32xf32>
    %108 = arith.addf %76, %107 : vector<16x32xf32>
    %109 = vector.extract_strided_slice %45 {offsets = [0, 16], sizes = [16, 8], strides = [1, 1]} : vector<16x96xf32> to vector<16x8xf32>
    %110 = vector.shape_cast %109 : vector<16x8xf32> to vector<2x8x8xf32>
    %111 = vector.extract_strided_slice %45 {offsets = [0, 48], sizes = [16, 8], strides = [1, 1]} : vector<16x96xf32> to vector<16x8xf32>
    %112 = vector.shape_cast %111 : vector<16x8xf32> to vector<2x8x8xf32>
    %113 = vector.extract_strided_slice %45 {offsets = [0, 80], sizes = [16, 8], strides = [1, 1]} : vector<16x96xf32> to vector<16x8xf32>
    %114 = vector.shape_cast %113 : vector<16x8xf32> to vector<2x8x8xf32>
    %115 = arith.truncf %110 : vector<2x8x8xf32> to vector<2x8x8xbf16>
    %116 = arith.truncf %112 : vector<2x8x8xf32> to vector<2x8x8xbf16>
    "tpu.trace_start"() <{level = 10 : i32, message = "bld,bmd->blm"}> : () -> ()
    %cst_44 = arith.constant dense<0.000000e+00> : vector<2x8x8xf32>
    %117 = tpu.matmul %115, %116, %cst_44 {dimension_numbers = #tpu.dot_dimension_numbers<[2], [2], [1], [1], [0, 0, 0, 1, 1, 1], [0], [0]>} : vector<2x8x8xbf16>, vector<2x8x8xbf16>, vector<2x8x8xf32> -> vector<2x8x8xf32>
    "tpu.trace_stop"() : () -> ()
    %cst_45 = arith.constant 0.353553385 : f32
    %118 = vector.broadcast %cst_45 : f32 to vector<2x8x8xf32>
    %119 = arith.mulf %117, %118 : vector<2x8x8xf32>
    %120 = vector.shape_cast %5 : vector<8x8xf32> to vector<1x8x8xf32>
    %121 = vector.broadcast %120 : vector<1x8x8xf32> to vector<2x8x8xf32>
    %122 = arith.addf %119, %121 : vector<2x8x8xf32>
    %cst_46 = arith.constant dense<0xFF800000> : vector<2x8xf32>
    %123 = vector.multi_reduction <maximumf>, %122, %cst_46 [2] : vector<2x8x8xf32> to vector<2x8xf32>
    %124 = vector.shape_cast %123 : vector<2x8xf32> to vector<2x8x1xf32>
    %125 = vector.broadcast %124 : vector<2x8x1xf32> to vector<2x8x8xf32>
    %126 = arith.subf %122, %125 : vector<2x8x8xf32>
    %127 = math.exp %126 : vector<2x8x8xf32>
    %cst_47 = arith.constant dense<0.000000e+00> : vector<2x8xf32>
    %128 = vector.multi_reduction <add>, %127, %cst_47 [2] : vector<2x8x8xf32> to vector<2x8xf32>
    %129 = vector.shape_cast %128 : vector<2x8xf32> to vector<2x8x1xf32>
    %130 = vector.broadcast %129 : vector<2x8x1xf32> to vector<2x8x8xf32>
    %131 = arith.divf %127, %130 : vector<2x8x8xf32>
    %132 = arith.truncf %131 : vector<2x8x8xf32> to vector<2x8x8xbf16>
    %133 = arith.truncf %114 : vector<2x8x8xf32> to vector<2x8x8xbf16>
    "tpu.trace_start"() <{level = 10 : i32, message = "blm,bmd->bld"}> : () -> ()
    %cst_48 = arith.constant dense<0.000000e+00> : vector<2x8x8xf32>
    %134 = tpu.matmul %132, %133, %cst_48 {dimension_numbers = #tpu.dot_dimension_numbers<[2], [1], [1], [2], [0, 0, 0, 1, 1, 2], [0], [0]>} : vector<2x8x8xbf16>, vector<2x8x8xbf16>, vector<2x8x8xf32> -> vector<2x8x8xf32>
    "tpu.trace_stop"() : () -> ()
    %135 = vector.shape_cast %134 : vector<2x8x8xf32> to vector<16x8xf32>
    %136 = vector.extract_strided_slice %11 {offsets = [16, 0], sizes = [8, 32], strides = [1, 1]} : vector<32x32xf32> to vector<8x32xf32>
    %137 = arith.truncf %135 : vector<16x8xf32> to vector<16x8xbf16>
    %138 = arith.truncf %136 : vector<8x32xf32> to vector<8x32xbf16>
    %cst_49 = arith.constant dense<0.000000e+00> : vector<16x32xf32>
    %139 = tpu.matmul %137, %138, %cst_49 {dimension_numbers = #tpu.dot_dimension_numbers<[1], [0], [0], [1], [0, 0, 1, 1], [], []>} : vector<16x8xbf16>, vector<8x32xbf16>, vector<16x32xf32> -> vector<16x32xf32>
    %140 = arith.addf %108, %139 : vector<16x32xf32>
    %141 = vector.extract_strided_slice %45 {offsets = [0, 24], sizes = [16, 8], strides = [1, 1]} : vector<16x96xf32> to vector<16x8xf32>
    %142 = vector.shape_cast %141 : vector<16x8xf32> to vector<2x8x8xf32>
    %143 = vector.extract_strided_slice %45 {offsets = [0, 56], sizes = [16, 8], strides = [1, 1]} : vector<16x96xf32> to vector<16x8xf32>
    %144 = vector.shape_cast %143 : vector<16x8xf32> to vector<2x8x8xf32>
    %145 = vector.extract_strided_slice %45 {offsets = [0, 88], sizes = [16, 8], strides = [1, 1]} : vector<16x96xf32> to vector<16x8xf32>
    %146 = vector.shape_cast %145 : vector<16x8xf32> to vector<2x8x8xf32>
    %147 = arith.truncf %142 : vector<2x8x8xf32> to vector<2x8x8xbf16>
    %148 = arith.truncf %144 : vector<2x8x8xf32> to vector<2x8x8xbf16>
    "tpu.trace_start"() <{level = 10 : i32, message = "bld,bmd->blm"}> : () -> ()
    %cst_50 = arith.constant dense<0.000000e+00> : vector<2x8x8xf32>
    %149 = tpu.matmul %147, %148, %cst_50 {dimension_numbers = #tpu.dot_dimension_numbers<[2], [2], [1], [1], [0, 0, 0, 1, 1, 1], [0], [0]>} : vector<2x8x8xbf16>, vector<2x8x8xbf16>, vector<2x8x8xf32> -> vector<2x8x8xf32>
    "tpu.trace_stop"() : () -> ()
    %cst_51 = arith.constant 0.353553385 : f32
    %150 = vector.broadcast %cst_51 : f32 to vector<2x8x8xf32>
    %151 = arith.mulf %149, %150 : vector<2x8x8xf32>
    %152 = vector.shape_cast %5 : vector<8x8xf32> to vector<1x8x8xf32>
    %153 = vector.broadcast %152 : vector<1x8x8xf32> to vector<2x8x8xf32>
    %154 = arith.addf %151, %153 : vector<2x8x8xf32>
    %cst_52 = arith.constant dense<0xFF800000> : vector<2x8xf32>
    %155 = vector.multi_reduction <maximumf>, %154, %cst_52 [2] : vector<2x8x8xf32> to vector<2x8xf32>
    %156 = vector.shape_cast %155 : vector<2x8xf32> to vector<2x8x1xf32>
    %157 = vector.broadcast %156 : vector<2x8x1xf32> to vector<2x8x8xf32>
    %158 = arith.subf %154, %157 : vector<2x8x8xf32>
    %159 = math.exp %158 : vector<2x8x8xf32>
    %cst_53 = arith.constant dense<0.000000e+00> : vector<2x8xf32>
    %160 = vector.multi_reduction <add>, %159, %cst_53 [2] : vector<2x8x8xf32> to vector<2x8xf32>
    %161 = vector.shape_cast %160 : vector<2x8xf32> to vector<2x8x1xf32>
    %162 = vector.broadcast %161 : vector<2x8x1xf32> to vector<2x8x8xf32>
    %163 = arith.divf %159, %162 : vector<2x8x8xf32>
    %164 = arith.truncf %163 : vector<2x8x8xf32> to vector<2x8x8xbf16>
    %165 = arith.truncf %146 : vector<2x8x8xf32> to vector<2x8x8xbf16>
    "tpu.trace_start"() <{level = 10 : i32, message = "blm,bmd->bld"}> : () -> ()
    %cst_54 = arith.constant dense<0.000000e+00> : vector<2x8x8xf32>
    %166 = tpu.matmul %164, %165, %cst_54 {dimension_numbers = #tpu.dot_dimension_numbers<[2], [1], [1], [2], [0, 0, 0, 1, 1, 2], [0], [0]>} : vector<2x8x8xbf16>, vector<2x8x8xbf16>, vector<2x8x8xf32> -> vector<2x8x8xf32>
    "tpu.trace_stop"() : () -> ()
    %167 = vector.shape_cast %166 : vector<2x8x8xf32> to vector<16x8xf32>
    %168 = vector.extract_strided_slice %11 {offsets = [24, 0], sizes = [8, 32], strides = [1, 1]} : vector<32x32xf32> to vector<8x32xf32>
    %169 = arith.truncf %167 : vector<16x8xf32> to vector<16x8xbf16>
    %170 = arith.truncf %168 : vector<8x32xf32> to vector<8x32xbf16>
    %cst_55 = arith.constant dense<0.000000e+00> : vector<16x32xf32>
    %171 = tpu.matmul %169, %170, %cst_55 {dimension_numbers = #tpu.dot_dimension_numbers<[1], [0], [0], [1], [0, 0, 1, 1], [], []>} : vector<16x8xbf16>, vector<8x32xbf16>, vector<16x32xf32> -> vector<16x32xf32>
    %172 = arith.addf %140, %171 : vector<16x32xf32>
    %173 = vector.broadcast %12 : vector<1x32xf32> to vector<16x32xf32>
    %174 = arith.addf %172, %173 : vector<16x32xf32>
    %175 = arith.addf %6, %174 : vector<16x32xf32>
    %cst_56 = arith.constant dense<0.000000e+00> : vector<16xf32>
    %176 = vector.multi_reduction <add>, %175, %cst_56 [1] : vector<16x32xf32> to vector<16xf32>
    %177 = vector.shape_cast %176 : vector<16xf32> to vector<16x1xf32>
    %cst_57 = arith.constant 3.200000e+01 : f32
    %178 = vector.broadcast %cst_57 : f32 to vector<16x1xf32>
    %179 = arith.divf %177, %178 : vector<16x1xf32>
    %180 = vector.broadcast %179 : vector<16x1xf32> to vector<16x32xf32>
    %181 = arith.subf %175, %180 : vector<16x32xf32>
    %182 = arith.mulf %181, %181 : vector<16x32xf32>
    %cst_58 = arith.constant dense<0.000000e+00> : vector<16xf32>
    %183 = vector.multi_reduction <add>, %182, %cst_58 [1] : vector<16x32xf32> to vector<16xf32>
    %184 = vector.shape_cast %183 : vector<16xf32> to vector<16x1xf32>
    %cst_59 = arith.constant 3.200000e+01 : f32
    %185 = vector.broadcast %cst_59 : f32 to vector<16x1xf32>
    %186 = arith.divf %184, %185 : vector<16x1xf32>
    %187 = vector.broadcast %179 : vector<16x1xf32> to vector<16x32xf32>
    %188 = arith.subf %175, %187 : vector<16x32xf32>
    %cst_60 = arith.constant 9.99999974E-6 : f32
    %189 = vector.broadcast %cst_60 : f32 to vector<16x1xf32>
    %190 = arith.addf %186, %189 : vector<16x1xf32>
    %191 = math.rsqrt %190 : vector<16x1xf32>
    %192 = vector.broadcast %191 : vector<16x1xf32> to vector<16x32xf32>
    %193 = arith.mulf %188, %192 : vector<16x32xf32>
    %194 = vector.broadcast %13 : vector<1x32xf32> to vector<16x32xf32>
    %195 = arith.mulf %193, %194 : vector<16x32xf32>
    %196 = vector.broadcast %14 : vector<1x32xf32> to vector<16x32xf32>
    %197 = arith.addf %195, %196 : vector<16x32xf32>
    %198 = arith.truncf %197 : vector<16x32xf32> to vector<16x32xbf16>
    %199 = arith.truncf %15 : vector<32x128xf32> to vector<32x128xbf16>
    %cst_61 = arith.constant dense<0.000000e+00> : vector<16x128xf32>
    %200 = tpu.matmul %198, %199, %cst_61 {dimension_numbers = #tpu.dot_dimension_numbers<[1], [0], [0], [1], [0, 0, 1, 1], [], []>} : vector<16x32xbf16>, vector<32x128xbf16>, vector<16x128xf32> -> vector<16x128xf32>
    %201 = vector.broadcast %16 : vector<1x128xf32> to vector<16x128xf32>
    %202 = arith.addf %200, %201 : vector<16x128xf32>
    %cst_62 = arith.constant 1.702000e+00 : f32
    %203 = vector.broadcast %cst_62 : f32 to vector<16x128xf32>
    %204 = arith.mulf %203, %202 : vector<16x128xf32>
    %205 = arith.negf %204 : vector<16x128xf32>
    %206 = math.exp %205 : vector<16x128xf32>
    %cst_63 = arith.constant 1.000000e+00 : f32
    %207 = vector.broadcast %cst_63 : f32 to vector<16x128xf32>
    %208 = arith.addf %207, %206 : vector<16x128xf32>
    %209 = arith.divf %207, %208 : vector<16x128xf32>
    %210 = arith.mulf %202, %209 : vector<16x128xf32>
    %211 = arith.truncf %210 : vector<16x128xf32> to vector<16x128xbf16>
    %212 = arith.truncf %17 : vector<128x32xf32> to vector<128x32xbf16>
    %cst_64 = arith.constant dense<0.000000e+00> : vector<16x32xf32>
    %213 = tpu.matmul %211, %212, %cst_64 {dimension_numbers = #tpu.dot_dimension_numbers<[1], [0], [0], [1], [0, 0, 1, 1], [], []>} : vector<16x128xbf16>, vector<128x32xbf16>, vector<16x32xf32> -> vector<16x32xf32>
    %214 = vector.broadcast %18 : vector<1x32xf32> to vector<16x32xf32>
    %215 = arith.addf %213, %214 : vector<16x32xf32>
    %216 = arith.addf %175, %215 : vector<16x32xf32>
    %c0_65 = arith.constant 0 : index
    %c0_66 = arith.constant 0 : index
    %217 = vector.load %arg15[%c0_65, %c0_66] : memref<1x32xf32, #tpu.memory_space<vmem>>, vector<1x32xf32>
    %c0_67 = arith.constant 0 : index
    %c0_68 = arith.constant 0 : index
    %218 = vector.load %arg16[%c0_67, %c0_68] : memref<1x32xf32, #tpu.memory_space<vmem>>, vector<1x32xf32>
    %c0_69 = arith.constant 0 : index
    %c0_70 = arith.constant 0 : index
    %219 = vector.load %arg17[%c0_69, %c0_70] : memref<32x96xf32, #tpu.memory_space<vmem>>, vector<32x96xf32>
    %c0_71 = arith.constant 0 : index
    %c0_72 = arith.constant 0 : index
    %220 = vector.load %arg18[%c0_71, %c0_72] : memref<1x96xf32, #tpu.memory_space<vmem>>, vector<1x96xf32>
    %c0_73 = arith.constant 0 : index
    %c0_74 = arith.constant 0 : index
    %221 = vector.load %arg19[%c0_73, %c0_74] : memref<32x32xf32, #tpu.memory_space<vmem>>, vector<32x32xf32>
    %c0_75 = arith.constant 0 : index
    %c0_76 = arith.constant 0 : index
    %222 = vector.load %arg20[%c0_75, %c0_76] : memref<1x32xf32, #tpu.memory_space<vmem>>, vector<1x32xf32>
    %c0_77 = arith.constant 0 : index
    %c0_78 = arith.constant 0 : index
    %223 = vector.load %arg21[%c0_77, %c0_78] : memref<1x32xf32, #tpu.memory_space<vmem>>, vector<1x32xf32>
    %c0_79 = arith.constant 0 : index
    %c0_80 = arith.constant 0 : index
    %224 = vector.load %arg22[%c0_79, %c0_80] : memref<1x32xf32, #tpu.memory_space<vmem>>, vector<1x32xf32>
    %c0_81 = arith.constant 0 : index
    %c0_82 = arith.constant 0 : index
    %225 = vector.load %arg23[%c0_81, %c0_82] : memref<32x128xf32, #tpu.memory_space<vmem>>, vector<32x128xf32>
    %c0_83 = arith.constant 0 : index
    %c0_84 = arith.constant 0 : index
    %226 = vector.load %arg24[%c0_83, %c0_84] : memref<1x128xf32, #tpu.memory_space<vmem>>, vector<1x128xf32>
    %c0_85 = arith.constant 0 : index
    %c0_86 = arith.constant 0 : index
    %227 = vector.load %arg25[%c0_85, %c0_86] : memref<128x32xf32, #tpu.memory_space<vmem>>, vector<128x32xf32>
    %c0_87 = arith.constant 0 : index
    %c0_88 = arith.constant 0 : index
    %228 = vector.load %arg26[%c0_87, %c0_88] : memref<1x32xf32, #tpu.memory_space<vmem>>, vector<1x32xf32>
    %cst_89 = arith.constant dense<0.000000e+00> : vector<16xf32>
    %229 = vector.multi_reduction <add>, %216, %cst_89 [1] : vector<16x32xf32> to vector<16xf32>
    %230 = vector.shape_cast %229 : vector<16xf32> to vector<16x1xf32>
    %cst_90 = arith.constant 3.200000e+01 : f32
    %231 = vector.broadcast %cst_90 : f32 to vector<16x1xf32>
    %232 = arith.divf %230, %231 : vector<16x1xf32>
    %233 = vector.broadcast %232 : vector<16x1xf32> to vector<16x32xf32>
    %234 = arith.subf %216, %233 : vector<16x32xf32>
    %235 = arith.mulf %234, %234 : vector<16x32xf32>
    %cst_91 = arith.constant dense<0.000000e+00> : vector<16xf32>
    %236 = vector.multi_reduction <add>, %235, %cst_91 [1] : vector<16x32xf32> to vector<16xf32>
    %237 = vector.shape_cast %236 : vector<16xf32> to vector<16x1xf32>
    %cst_92 = arith.constant 3.200000e+01 : f32
    %238 = vector.broadcast %cst_92 : f32 to vector<16x1xf32>
    %239 = arith.divf %237, %238 : vector<16x1xf32>
    %240 = vector.broadcast %232 : vector<16x1xf32> to vector<16x32xf32>
    %241 = arith.subf %216, %240 : vector<16x32xf32>
    %cst_93 = arith.constant 9.99999974E-6 : f32
    %242 = vector.broadcast %cst_93 : f32 to vector<16x1xf32>
    %243 = arith.addf %239, %242 : vector<16x1xf32>
    %244 = math.rsqrt %243 : vector<16x1xf32>
    %245 = vector.broadcast %244 : vector<16x1xf32> to vector<16x32xf32>
    %246 = arith.mulf %241, %245 : vector<16x32xf32>
    %247 = vector.broadcast %217 : vector<1x32xf32> to vector<16x32xf32>
    %248 = arith.mulf %246, %247 : vector<16x32xf32>
    %249 = vector.broadcast %218 : vector<1x32xf32> to vector<16x32xf32>
    %250 = arith.addf %248, %249 : vector<16x32xf32>
    %251 = arith.truncf %250 : vector<16x32xf32> to vector<16x32xbf16>
    %252 = arith.truncf %219 : vector<32x96xf32> to vector<32x96xbf16>
    %cst_94 = arith.constant dense<0.000000e+00> : vector<16x96xf32>
    %253 = tpu.matmul %251, %252, %cst_94 {dimension_numbers = #tpu.dot_dimension_numbers<[1], [0], [0], [1], [0, 0, 1, 1], [], []>} : vector<16x32xbf16>, vector<32x96xbf16>, vector<16x96xf32> -> vector<16x96xf32>
    %254 = vector.broadcast %220 : vector<1x96xf32> to vector<16x96xf32>
    %255 = arith.addf %253, %254 : vector<16x96xf32>
    %256 = vector.extract_strided_slice %255 {offsets = [0, 0], sizes = [16, 8], strides = [1, 1]} : vector<16x96xf32> to vector<16x8xf32>
    %257 = vector.shape_cast %256 : vector<16x8xf32> to vector<2x8x8xf32>
    %258 = vector.extract_strided_slice %255 {offsets = [0, 32], sizes = [16, 8], strides = [1, 1]} : vector<16x96xf32> to vector<16x8xf32>
    %259 = vector.shape_cast %258 : vector<16x8xf32> to vector<2x8x8xf32>
    %260 = vector.extract_strided_slice %255 {offsets = [0, 64], sizes = [16, 8], strides = [1, 1]} : vector<16x96xf32> to vector<16x8xf32>
    %261 = vector.shape_cast %260 : vector<16x8xf32> to vector<2x8x8xf32>
    %262 = arith.truncf %257 : vector<2x8x8xf32> to vector<2x8x8xbf16>
    %263 = arith.truncf %259 : vector<2x8x8xf32> to vector<2x8x8xbf16>
    "tpu.trace_start"() <{level = 10 : i32, message = "bld,bmd->blm"}> : () -> ()
    %cst_95 = arith.constant dense<0.000000e+00> : vector<2x8x8xf32>
    %264 = tpu.matmul %262, %263, %cst_95 {dimension_numbers = #tpu.dot_dimension_numbers<[2], [2], [1], [1], [0, 0, 0, 1, 1, 1], [0], [0]>} : vector<2x8x8xbf16>, vector<2x8x8xbf16>, vector<2x8x8xf32> -> vector<2x8x8xf32>
    "tpu.trace_stop"() : () -> ()
    %cst_96 = arith.constant 0.353553385 : f32
    %265 = vector.broadcast %cst_96 : f32 to vector<2x8x8xf32>
    %266 = arith.mulf %264, %265 : vector<2x8x8xf32>
    %267 = vector.shape_cast %5 : vector<8x8xf32> to vector<1x8x8xf32>
    %268 = vector.broadcast %267 : vector<1x8x8xf32> to vector<2x8x8xf32>
    %269 = arith.addf %266, %268 : vector<2x8x8xf32>
    %cst_97 = arith.constant dense<0xFF800000> : vector<2x8xf32>
    %270 = vector.multi_reduction <maximumf>, %269, %cst_97 [2] : vector<2x8x8xf32> to vector<2x8xf32>
    %271 = vector.shape_cast %270 : vector<2x8xf32> to vector<2x8x1xf32>
    %272 = vector.broadcast %271 : vector<2x8x1xf32> to vector<2x8x8xf32>
    %273 = arith.subf %269, %272 : vector<2x8x8xf32>
    %274 = math.exp %273 : vector<2x8x8xf32>
    %cst_98 = arith.constant dense<0.000000e+00> : vector<2x8xf32>
    %275 = vector.multi_reduction <add>, %274, %cst_98 [2] : vector<2x8x8xf32> to vector<2x8xf32>
    %276 = vector.shape_cast %275 : vector<2x8xf32> to vector<2x8x1xf32>
    %277 = vector.broadcast %276 : vector<2x8x1xf32> to vector<2x8x8xf32>
    %278 = arith.divf %274, %277 : vector<2x8x8xf32>
    %279 = arith.truncf %278 : vector<2x8x8xf32> to vector<2x8x8xbf16>
    %280 = arith.truncf %261 : vector<2x8x8xf32> to vector<2x8x8xbf16>
    "tpu.trace_start"() <{level = 10 : i32, message = "blm,bmd->bld"}> : () -> ()
    %cst_99 = arith.constant dense<0.000000e+00> : vector<2x8x8xf32>
    %281 = tpu.matmul %279, %280, %cst_99 {dimension_numbers = #tpu.dot_dimension_numbers<[2], [1], [1], [2], [0, 0, 0, 1, 1, 2], [0], [0]>} : vector<2x8x8xbf16>, vector<2x8x8xbf16>, vector<2x8x8xf32> -> vector<2x8x8xf32>
    "tpu.trace_stop"() : () -> ()
    %282 = vector.shape_cast %281 : vector<2x8x8xf32> to vector<16x8xf32>
    %283 = vector.extract_strided_slice %221 {offsets = [0, 0], sizes = [8, 32], strides = [1, 1]} : vector<32x32xf32> to vector<8x32xf32>
    %284 = arith.truncf %282 : vector<16x8xf32> to vector<16x8xbf16>
    %285 = arith.truncf %283 : vector<8x32xf32> to vector<8x32xbf16>
    %cst_100 = arith.constant dense<0.000000e+00> : vector<16x32xf32>
    %286 = tpu.matmul %284, %285, %cst_100 {dimension_numbers = #tpu.dot_dimension_numbers<[1], [0], [0], [1], [0, 0, 1, 1], [], []>} : vector<16x8xbf16>, vector<8x32xbf16>, vector<16x32xf32> -> vector<16x32xf32>
    %287 = vector.extract_strided_slice %255 {offsets = [0, 8], sizes = [16, 8], strides = [1, 1]} : vector<16x96xf32> to vector<16x8xf32>
    %288 = vector.shape_cast %287 : vector<16x8xf32> to vector<2x8x8xf32>
    %289 = vector.extract_strided_slice %255 {offsets = [0, 40], sizes = [16, 8], strides = [1, 1]} : vector<16x96xf32> to vector<16x8xf32>
    %290 = vector.shape_cast %289 : vector<16x8xf32> to vector<2x8x8xf32>
    %291 = vector.extract_strided_slice %255 {offsets = [0, 72], sizes = [16, 8], strides = [1, 1]} : vector<16x96xf32> to vector<16x8xf32>
    %292 = vector.shape_cast %291 : vector<16x8xf32> to vector<2x8x8xf32>
    %293 = arith.truncf %288 : vector<2x8x8xf32> to vector<2x8x8xbf16>
    %294 = arith.truncf %290 : vector<2x8x8xf32> to vector<2x8x8xbf16>
    "tpu.trace_start"() <{level = 10 : i32, message = "bld,bmd->blm"}> : () -> ()
    %cst_101 = arith.constant dense<0.000000e+00> : vector<2x8x8xf32>
    %295 = tpu.matmul %293, %294, %cst_101 {dimension_numbers = #tpu.dot_dimension_numbers<[2], [2], [1], [1], [0, 0, 0, 1, 1, 1], [0], [0]>} : vector<2x8x8xbf16>, vector<2x8x8xbf16>, vector<2x8x8xf32> -> vector<2x8x8xf32>
    "tpu.trace_stop"() : () -> ()
    %cst_102 = arith.constant 0.353553385 : f32
    %296 = vector.broadcast %cst_102 : f32 to vector<2x8x8xf32>
    %297 = arith.mulf %295, %296 : vector<2x8x8xf32>
    %298 = vector.shape_cast %5 : vector<8x8xf32> to vector<1x8x8xf32>
    %299 = vector.broadcast %298 : vector<1x8x8xf32> to vector<2x8x8xf32>
    %300 = arith.addf %297, %299 : vector<2x8x8xf32>
    %cst_103 = arith.constant dense<0xFF800000> : vector<2x8xf32>
    %301 = vector.multi_reduction <maximumf>, %300, %cst_103 [2] : vector<2x8x8xf32> to vector<2x8xf32>
    %302 = vector.shape_cast %301 : vector<2x8xf32> to vector<2x8x1xf32>
    %303 = vector.broadcast %302 : vector<2x8x1xf32> to vector<2x8x8xf32>
    %304 = arith.subf %300, %303 : vector<2x8x8xf32>
    %305 = math.exp %304 : vector<2x8x8xf32>
    %cst_104 = arith.constant dense<0.000000e+00> : vector<2x8xf32>
    %306 = vector.multi_reduction <add>, %305, %cst_104 [2] : vector<2x8x8xf32> to vector<2x8xf32>
    %307 = vector.shape_cast %306 : vector<2x8xf32> to vector<2x8x1xf32>
    %308 = vector.broadcast %307 : vector<2x8x1xf32> to vector<2x8x8xf32>
    %309 = arith.divf %305, %308 : vector<2x8x8xf32>
    %310 = arith.truncf %309 : vector<2x8x8xf32> to vector<2x8x8xbf16>
    %311 = arith.truncf %292 : vector<2x8x8xf32> to vector<2x8x8xbf16>
    "tpu.trace_start"() <{level = 10 : i32, message = "blm,bmd->bld"}> : () -> ()
    %cst_105 = arith.constant dense<0.000000e+00> : vector<2x8x8xf32>
    %312 = tpu.matmul %310, %311, %cst_105 {dimension_numbers = #tpu.dot_dimension_numbers<[2], [1], [1], [2], [0, 0, 0, 1, 1, 2], [0], [0]>} : vector<2x8x8xbf16>, vector<2x8x8xbf16>, vector<2x8x8xf32> -> vector<2x8x8xf32>
    "tpu.trace_stop"() : () -> ()
    %313 = vector.shape_cast %312 : vector<2x8x8xf32> to vector<16x8xf32>
    %314 = vector.extract_strided_slice %221 {offsets = [8, 0], sizes = [8, 32], strides = [1, 1]} : vector<32x32xf32> to vector<8x32xf32>
    %315 = arith.truncf %313 : vector<16x8xf32> to vector<16x8xbf16>
    %316 = arith.truncf %314 : vector<8x32xf32> to vector<8x32xbf16>
    %cst_106 = arith.constant dense<0.000000e+00> : vector<16x32xf32>
    %317 = tpu.matmul %315, %316, %cst_106 {dimension_numbers = #tpu.dot_dimension_numbers<[1], [0], [0], [1], [0, 0, 1, 1], [], []>} : vector<16x8xbf16>, vector<8x32xbf16>, vector<16x32xf32> -> vector<16x32xf32>
    %318 = arith.addf %286, %317 : vector<16x32xf32>
    %319 = vector.extract_strided_slice %255 {offsets = [0, 16], sizes = [16, 8], strides = [1, 1]} : vector<16x96xf32> to vector<16x8xf32>
    %320 = vector.shape_cast %319 : vector<16x8xf32> to vector<2x8x8xf32>
    %321 = vector.extract_strided_slice %255 {offsets = [0, 48], sizes = [16, 8], strides = [1, 1]} : vector<16x96xf32> to vector<16x8xf32>
    %322 = vector.shape_cast %321 : vector<16x8xf32> to vector<2x8x8xf32>
    %323 = vector.extract_strided_slice %255 {offsets = [0, 80], sizes = [16, 8], strides = [1, 1]} : vector<16x96xf32> to vector<16x8xf32>
    %324 = vector.shape_cast %323 : vector<16x8xf32> to vector<2x8x8xf32>
    %325 = arith.truncf %320 : vector<2x8x8xf32> to vector<2x8x8xbf16>
    %326 = arith.truncf %322 : vector<2x8x8xf32> to vector<2x8x8xbf16>
    "tpu.trace_start"() <{level = 10 : i32, message = "bld,bmd->blm"}> : () -> ()
    %cst_107 = arith.constant dense<0.000000e+00> : vector<2x8x8xf32>
    %327 = tpu.matmul %325, %326, %cst_107 {dimension_numbers = #tpu.dot_dimension_numbers<[2], [2], [1], [1], [0, 0, 0, 1, 1, 1], [0], [0]>} : vector<2x8x8xbf16>, vector<2x8x8xbf16>, vector<2x8x8xf32> -> vector<2x8x8xf32>
    "tpu.trace_stop"() : () -> ()
    %cst_108 = arith.constant 0.353553385 : f32
    %328 = vector.broadcast %cst_108 : f32 to vector<2x8x8xf32>
    %329 = arith.mulf %327, %328 : vector<2x8x8xf32>
    %330 = vector.shape_cast %5 : vector<8x8xf32> to vector<1x8x8xf32>
    %331 = vector.broadcast %330 : vector<1x8x8xf32> to vector<2x8x8xf32>
    %332 = arith.addf %329, %331 : vector<2x8x8xf32>
    %cst_109 = arith.constant dense<0xFF800000> : vector<2x8xf32>
    %333 = vector.multi_reduction <maximumf>, %332, %cst_109 [2] : vector<2x8x8xf32> to vector<2x8xf32>
    %334 = vector.shape_cast %333 : vector<2x8xf32> to vector<2x8x1xf32>
    %335 = vector.broadcast %334 : vector<2x8x1xf32> to vector<2x8x8xf32>
    %336 = arith.subf %332, %335 : vector<2x8x8xf32>
    %337 = math.exp %336 : vector<2x8x8xf32>
    %cst_110 = arith.constant dense<0.000000e+00> : vector<2x8xf32>
    %338 = vector.multi_reduction <add>, %337, %cst_110 [2] : vector<2x8x8xf32> to vector<2x8xf32>
    %339 = vector.shape_cast %338 : vector<2x8xf32> to vector<2x8x1xf32>
    %340 = vector.broadcast %339 : vector<2x8x1xf32> to vector<2x8x8xf32>
    %341 = arith.divf %337, %340 : vector<2x8x8xf32>
    %342 = arith.truncf %341 : vector<2x8x8xf32> to vector<2x8x8xbf16>
    %343 = arith.truncf %324 : vector<2x8x8xf32> to vector<2x8x8xbf16>
    "tpu.trace_start"() <{level = 10 : i32, message = "blm,bmd->bld"}> : () -> ()
    %cst_111 = arith.constant dense<0.000000e+00> : vector<2x8x8xf32>
    %344 = tpu.matmul %342, %343, %cst_111 {dimension_numbers = #tpu.dot_dimension_numbers<[2], [1], [1], [2], [0, 0, 0, 1, 1, 2], [0], [0]>} : vector<2x8x8xbf16>, vector<2x8x8xbf16>, vector<2x8x8xf32> -> vector<2x8x8xf32>
    "tpu.trace_stop"() : () -> ()
    %345 = vector.shape_cast %344 : vector<2x8x8xf32> to vector<16x8xf32>
    %346 = vector.extract_strided_slice %221 {offsets = [16, 0], sizes = [8, 32], strides = [1, 1]} : vector<32x32xf32> to vector<8x32xf32>
    %347 = arith.truncf %345 : vector<16x8xf32> to vector<16x8xbf16>
    %348 = arith.truncf %346 : vector<8x32xf32> to vector<8x32xbf16>
    %cst_112 = arith.constant dense<0.000000e+00> : vector<16x32xf32>
    %349 = tpu.matmul %347, %348, %cst_112 {dimension_numbers = #tpu.dot_dimension_numbers<[1], [0], [0], [1], [0, 0, 1, 1], [], []>} : vector<16x8xbf16>, vector<8x32xbf16>, vector<16x32xf32> -> vector<16x32xf32>
    %350 = arith.addf %318, %349 : vector<16x32xf32>
    %351 = vector.extract_strided_slice %255 {offsets = [0, 24], sizes = [16, 8], strides = [1, 1]} : vector<16x96xf32> to vector<16x8xf32>
    %352 = vector.shape_cast %351 : vector<16x8xf32> to vector<2x8x8xf32>
    %353 = vector.extract_strided_slice %255 {offsets = [0, 56], sizes = [16, 8], strides = [1, 1]} : vector<16x96xf32> to vector<16x8xf32>
    %354 = vector.shape_cast %353 : vector<16x8xf32> to vector<2x8x8xf32>
    %355 = vector.extract_strided_slice %255 {offsets = [0, 88], sizes = [16, 8], strides = [1, 1]} : vector<16x96xf32> to vector<16x8xf32>
    %356 = vector.shape_cast %355 : vector<16x8xf32> to vector<2x8x8xf32>
    %357 = arith.truncf %352 : vector<2x8x8xf32> to vector<2x8x8xbf16>
    %358 = arith.truncf %354 : vector<2x8x8xf32> to vector<2x8x8xbf16>
    "tpu.trace_start"() <{level = 10 : i32, message = "bld,bmd->blm"}> : () -> ()
    %cst_113 = arith.constant dense<0.000000e+00> : vector<2x8x8xf32>
    %359 = tpu.matmul %357, %358, %cst_113 {dimension_numbers = #tpu.dot_dimension_numbers<[2], [2], [1], [1], [0, 0, 0, 1, 1, 1], [0], [0]>} : vector<2x8x8xbf16>, vector<2x8x8xbf16>, vector<2x8x8xf32> -> vector<2x8x8xf32>
    "tpu.trace_stop"() : () -> ()
    %cst_114 = arith.constant 0.353553385 : f32
    %360 = vector.broadcast %cst_114 : f32 to vector<2x8x8xf32>
    %361 = arith.mulf %359, %360 : vector<2x8x8xf32>
    %362 = vector.shape_cast %5 : vector<8x8xf32> to vector<1x8x8xf32>
    %363 = vector.broadcast %362 : vector<1x8x8xf32> to vector<2x8x8xf32>
    %364 = arith.addf %361, %363 : vector<2x8x8xf32>
    %cst_115 = arith.constant dense<0xFF800000> : vector<2x8xf32>
    %365 = vector.multi_reduction <maximumf>, %364, %cst_115 [2] : vector<2x8x8xf32> to vector<2x8xf32>
    %366 = vector.shape_cast %365 : vector<2x8xf32> to vector<2x8x1xf32>
    %367 = vector.broadcast %366 : vector<2x8x1xf32> to vector<2x8x8xf32>
    %368 = arith.subf %364, %367 : vector<2x8x8xf32>
    %369 = math.exp %368 : vector<2x8x8xf32>
    %cst_116 = arith.constant dense<0.000000e+00> : vector<2x8xf32>
    %370 = vector.multi_reduction <add>, %369, %cst_116 [2] : vector<2x8x8xf32> to vector<2x8xf32>
    %371 = vector.shape_cast %370 : vector<2x8xf32> to vector<2x8x1xf32>
    %372 = vector.broadcast %371 : vector<2x8x1xf32> to vector<2x8x8xf32>
    %373 = arith.divf %369, %372 : vector<2x8x8xf32>
    %374 = arith.truncf %373 : vector<2x8x8xf32> to vector<2x8x8xbf16>
    %375 = arith.truncf %356 : vector<2x8x8xf32> to vector<2x8x8xbf16>
    "tpu.trace_start"() <{level = 10 : i32, message = "blm,bmd->bld"}> : () -> ()
    %cst_117 = arith.constant dense<0.000000e+00> : vector<2x8x8xf32>
    %376 = tpu.matmul %374, %375, %cst_117 {dimension_numbers = #tpu.dot_dimension_numbers<[2], [1], [1], [2], [0, 0, 0, 1, 1, 2], [0], [0]>} : vector<2x8x8xbf16>, vector<2x8x8xbf16>, vector<2x8x8xf32> -> vector<2x8x8xf32>
    "tpu.trace_stop"() : () -> ()
    %377 = vector.shape_cast %376 : vector<2x8x8xf32> to vector<16x8xf32>
    %378 = vector.extract_strided_slice %221 {offsets = [24, 0], sizes = [8, 32], strides = [1, 1]} : vector<32x32xf32> to vector<8x32xf32>
    %379 = arith.truncf %377 : vector<16x8xf32> to vector<16x8xbf16>
    %380 = arith.truncf %378 : vector<8x32xf32> to vector<8x32xbf16>
    %cst_118 = arith.constant dense<0.000000e+00> : vector<16x32xf32>
    %381 = tpu.matmul %379, %380, %cst_118 {dimension_numbers = #tpu.dot_dimension_numbers<[1], [0], [0], [1], [0, 0, 1, 1], [], []>} : vector<16x8xbf16>, vector<8x32xbf16>, vector<16x32xf32> -> vector<16x32xf32>
    %382 = arith.addf %350, %381 : vector<16x32xf32>
    %383 = vector.broadcast %222 : vector<1x32xf32> to vector<16x32xf32>
    %384 = arith.addf %382, %383 : vector<16x32xf32>
    %385 = arith.addf %216, %384 : vector<16x32xf32>
    %cst_119 = arith.constant dense<0.000000e+00> : vector<16xf32>
    %386 = vector.multi_reduction <add>, %385, %cst_119 [1] : vector<16x32xf32> to vector<16xf32>
    %387 = vector.shape_cast %386 : vector<16xf32> to vector<16x1xf32>
    %cst_120 = arith.constant 3.200000e+01 : f32
    %388 = vector.broadcast %cst_120 : f32 to vector<16x1xf32>
    %389 = arith.divf %387, %388 : vector<16x1xf32>
    %390 = vector.broadcast %389 : vector<16x1xf32> to vector<16x32xf32>
    %391 = arith.subf %385, %390 : vector<16x32xf32>
    %392 = arith.mulf %391, %391 : vector<16x32xf32>
    %cst_121 = arith.constant dense<0.000000e+00> : vector<16xf32>
    %393 = vector.multi_reduction <add>, %392, %cst_121 [1] : vector<16x32xf32> to vector<16xf32>
    %394 = vector.shape_cast %393 : vector<16xf32> to vector<16x1xf32>
    %cst_122 = arith.constant 3.200000e+01 : f32
    %395 = vector.broadcast %cst_122 : f32 to vector<16x1xf32>
    %396 = arith.divf %394, %395 : vector<16x1xf32>
    %397 = vector.broadcast %389 : vector<16x1xf32> to vector<16x32xf32>
    %398 = arith.subf %385, %397 : vector<16x32xf32>
    %cst_123 = arith.constant 9.99999974E-6 : f32
    %399 = vector.broadcast %cst_123 : f32 to vector<16x1xf32>
    %400 = arith.addf %396, %399 : vector<16x1xf32>
    %401 = math.rsqrt %400 : vector<16x1xf32>
    %402 = vector.broadcast %401 : vector<16x1xf32> to vector<16x32xf32>
    %403 = arith.mulf %398, %402 : vector<16x32xf32>
    %404 = vector.broadcast %223 : vector<1x32xf32> to vector<16x32xf32>
    %405 = arith.mulf %403, %404 : vector<16x32xf32>
    %406 = vector.broadcast %224 : vector<1x32xf32> to vector<16x32xf32>
    %407 = arith.addf %405, %406 : vector<16x32xf32>
    %408 = arith.truncf %407 : vector<16x32xf32> to vector<16x32xbf16>
    %409 = arith.truncf %225 : vector<32x128xf32> to vector<32x128xbf16>
    %cst_124 = arith.constant dense<0.000000e+00> : vector<16x128xf32>
    %410 = tpu.matmul %408, %409, %cst_124 {dimension_numbers = #tpu.dot_dimension_numbers<[1], [0], [0], [1], [0, 0, 1, 1], [], []>} : vector<16x32xbf16>, vector<32x128xbf16>, vector<16x128xf32> -> vector<16x128xf32>
    %411 = vector.broadcast %226 : vector<1x128xf32> to vector<16x128xf32>
    %412 = arith.addf %410, %411 : vector<16x128xf32>
    %cst_125 = arith.constant 1.702000e+00 : f32
    %413 = vector.broadcast %cst_125 : f32 to vector<16x128xf32>
    %414 = arith.mulf %413, %412 : vector<16x128xf32>
    %415 = arith.negf %414 : vector<16x128xf32>
    %416 = math.exp %415 : vector<16x128xf32>
    %cst_126 = arith.constant 1.000000e+00 : f32
    %417 = vector.broadcast %cst_126 : f32 to vector<16x128xf32>
    %418 = arith.addf %417, %416 : vector<16x128xf32>
    %419 = arith.divf %417, %418 : vector<16x128xf32>
    %420 = arith.mulf %412, %419 : vector<16x128xf32>
    %421 = arith.truncf %420 : vector<16x128xf32> to vector<16x128xbf16>
    %422 = arith.truncf %227 : vector<128x32xf32> to vector<128x32xbf16>
    %cst_127 = arith.constant dense<0.000000e+00> : vector<16x32xf32>
    %423 = tpu.matmul %421, %422, %cst_127 {dimension_numbers = #tpu.dot_dimension_numbers<[1], [0], [0], [1], [0, 0, 1, 1], [], []>} : vector<16x128xbf16>, vector<128x32xbf16>, vector<16x32xf32> -> vector<16x32xf32>
    %424 = vector.broadcast %228 : vector<1x32xf32> to vector<16x32xf32>
    %425 = arith.addf %423, %424 : vector<16x32xf32>
    %426 = arith.addf %385, %425 : vector<16x32xf32>
    %c0_128 = arith.constant 0 : index
    %c0_129 = arith.constant 0 : index
    %427 = vector.load %arg27[%c0_128, %c0_129] : memref<1x32xf32, #tpu.memory_space<vmem>>, vector<1x32xf32>
    %c0_130 = arith.constant 0 : index
    %c0_131 = arith.constant 0 : index
    %428 = vector.load %arg28[%c0_130, %c0_131] : memref<1x32xf32, #tpu.memory_space<vmem>>, vector<1x32xf32>
    %c0_132 = arith.constant 0 : index
    %c0_133 = arith.constant 0 : index
    %429 = vector.load %arg29[%c0_132, %c0_133] : memref<32x128xf32, #tpu.memory_space<vmem>>, vector<32x128xf32>
    %cst_134 = arith.constant dense<0.000000e+00> : vector<16xf32>
    %430 = vector.multi_reduction <add>, %426, %cst_134 [1] : vector<16x32xf32> to vector<16xf32>
    %431 = vector.shape_cast %430 : vector<16xf32> to vector<16x1xf32>
    %cst_135 = arith.constant 3.200000e+01 : f32
    %432 = vector.broadcast %cst_135 : f32 to vector<16x1xf32>
    %433 = arith.divf %431, %432 : vector<16x1xf32>
    %434 = vector.broadcast %433 : vector<16x1xf32> to vector<16x32xf32>
    %435 = arith.subf %426, %434 : vector<16x32xf32>
    %436 = arith.mulf %435, %435 : vector<16x32xf32>
    %cst_136 = arith.constant dense<0.000000e+00> : vector<16xf32>
    %437 = vector.multi_reduction <add>, %436, %cst_136 [1] : vector<16x32xf32> to vector<16xf32>
    %438 = vector.shape_cast %437 : vector<16xf32> to vector<16x1xf32>
    %cst_137 = arith.constant 3.200000e+01 : f32
    %439 = vector.broadcast %cst_137 : f32 to vector<16x1xf32>
    %440 = arith.divf %438, %439 : vector<16x1xf32>
    %441 = vector.broadcast %433 : vector<16x1xf32> to vector<16x32xf32>
    %442 = arith.subf %426, %441 : vector<16x32xf32>
    %cst_138 = arith.constant 9.99999974E-6 : f32
    %443 = vector.broadcast %cst_138 : f32 to vector<16x1xf32>
    %444 = arith.addf %440, %443 : vector<16x1xf32>
    %445 = math.rsqrt %444 : vector<16x1xf32>
    %446 = vector.broadcast %445 : vector<16x1xf32> to vector<16x32xf32>
    %447 = arith.mulf %442, %446 : vector<16x32xf32>
    %448 = vector.broadcast %427 : vector<1x32xf32> to vector<16x32xf32>
    %449 = arith.mulf %447, %448 : vector<16x32xf32>
    %450 = vector.broadcast %428 : vector<1x32xf32> to vector<16x32xf32>
    %451 = arith.addf %449, %450 : vector<16x32xf32>
    %c0_139 = arith.constant 0 : index
    %c0_140 = arith.constant 0 : index
    %452 = vector.load %arg31[%c0_139, %c0_140] : memref<16x32xf32, #tpu.memory_space<vmem>>, vector<16x32xf32>
    tpu.vector_store %arg31[%c0_139, %c0_140], %451 {strides = array<i32>} : memref<16x32xf32, #tpu.memory_space<vmem>>, vector<16x32xf32>,
    %c0_141 = arith.constant 0 : index
    %453 = memref.load %arg1[%c0_141] : memref<2xi32, #tpu.memory_space<smem>>
    %c0_i32 = arith.constant 0 : i32
    %454 = arith.addi %c0_i32, %453 : i32
    %455 = arith.index_cast %454 : i32 to index
    %c0_142 = arith.constant 0 : index
    %456 = vector.load %arg31[%455, %c0_142] : memref<16x32xf32, #tpu.memory_space<vmem>>, vector<1x32xf32>
    %c1 = arith.constant 1 : index
    %457 = memref.load %arg1[%c1] : memref<2xi32, #tpu.memory_space<smem>>
    %c8_i32 = arith.constant 8 : i32
    %458 = arith.addi %c8_i32, %457 : i32
    %459 = arith.index_cast %458 : i32 to index
    %c0_143 = arith.constant 0 : index
    %460 = vector.load %arg31[%459, %c0_143] : memref<16x32xf32, #tpu.memory_space<vmem>>, vector<1x32xf32>
    %461 = tpu.concatenate %456, %460 in 0 : vector<1x32xf32>, vector<1x32xf32> -> vector<2x32xf32>
    %462 = arith.truncf %461 : vector<2x32xf32> to vector<2x32xbf16>
    %463 = arith.truncf %429 : vector<32x128xf32> to vector<32x128xbf16>
    %cst_144 = arith.constant dense<0.000000e+00> : vector<2x128xf32>
    %464 = tpu.matmul %462, %463, %cst_144 {dimension_numbers = #tpu.dot_dimension_numbers<[1], [0], [0], [1], [0, 0, 1, 1], [], []>} : vector<2x32xbf16>, vector<32x128xbf16>, vector<2x128xf32> -> vector<2x128xf32>
    %c0_145 = arith.constant 0 : index
    %c0_146 = arith.constant 0 : index
    %465 = vector.load %arg30[%c0_145, %c0_146] : memref<2x128xf32, #tpu.memory_space<vmem>>, vector<2x128xf32>
    tpu.vector_store %arg30[%c0_145, %c0_146], %464 {strides = array<i32>} : memref<2x128xf32, #tpu.memory_space<vmem>>, vector<2x128xf32>,
    return
  }
  func.func @transform_0(%arg0: i32, %arg1: memref<2xi32, #tpu.memory_space<smem>>) -> (i32, i32) {
    %c0_i32 = arith.constant 0 : i32
    %c0_i32_0 = arith.constant 0 : i32
    %c0_i32_1 = arith.constant 0 : i32
    return %c0_i32, %c0_i32_0 : i32, i32
  }
  func.func @transform_1(%arg0: i32, %arg1: memref<2xi32, #tpu.memory_space<smem>>) -> (i32, i32) {
    %c0_i32 = arith.constant 0 : i32
    %c0_i32_0 = arith.constant 0 : i32
    %c0_i32_1 = arith.constant 0 : i32
    return %c0_i32, %c0_i32_0 : i32, i32
  }
  func.func @transform_2(%arg0: i32, %arg1: memref<2xi32, #tpu.memory_space<smem>>) -> (i32, i32) {
    %c0_i32 = arith.constant 0 : i32
    %c0_i32_0 = arith.constant 0 : i32
    %c0_i32_1 = arith.constant 0 : i32
    return %c0_i32, %c0_i32_0 : i32, i32
  }
  func.func @transform_3(%arg0: i32, %arg1: memref<2xi32, #tpu.memory_space<smem>>) -> (i32, i32) {
    %c0_i32 = arith.constant 0 : i32
    %c0_i32_0 = arith.constant 0 : i32
    %c0_i32_1 = arith.constant 0 : i32
    return %c0_i32, %c0_i32_0 : i32, i32
  }
  func.func @transform_4(%arg0: i32, %arg1: memref<2xi32, #tpu.memory_space<smem>>) -> (i32, i32) {
    %c0_i32 = arith.constant 0 : i32
    %c0_i32_0 = arith.constant 0 : i32
    %c0_i32_1 = arith.constant 0 : i32
    return %c0_i32, %c0_i32_0 : i32, i32
  }
  func.func @transform_5(%arg0: i32, %arg1: memref<2xi32, #tpu.memory_space<smem>>) -> (i32, i32) {
    %c0_i32 = arith.constant 0 : i32
    %c0_i32_0 = arith.constant 0 : i32
    %c0_i32_1 = arith.constant 0 : i32
    return %c0_i32, %c0_i32_0 : i32, i32
  }
  func.func @transform_6(%arg0: i32, %arg1: memref<2xi32, #tpu.memory_space<smem>>) -> (i32, i32) {
    %c0_i32 = arith.constant 0 : i32
    %c0_i32_0 = arith.constant 0 : i32
    %c0_i32_1 = arith.constant 0 : i32
    return %c0_i32, %c0_i32_0 : i32, i32
  }
  func.func @transform_7(%arg0: i32, %arg1: memref<2xi32, #tpu.memory_space<smem>>) -> (i32, i32) {
    %c0_i32 = arith.constant 0 : i32
    %c0_i32_0 = arith.constant 0 : i32
    %c0_i32_1 = arith.constant 0 : i32
    return %c0_i32, %c0_i32_0 : i32, i32
  }
  func.func @transform_8(%arg0: i32, %arg1: memref<2xi32, #tpu.memory_space<smem>>) -> (i32, i32) {
    %c0_i32 = arith.constant 0 : i32
    %c0_i32_0 = arith.constant 0 : i32
    %c0_i32_1 = arith.constant 0 : i32
    return %c0_i32, %c0_i32_0 : i32, i32
  }
  func.func @transform_9(%arg0: i32, %arg1: memref<2xi32, #tpu.memory_space<smem>>) -> (i32, i32) {
    %c0_i32 = arith.constant 0 : i32
    %c0_i32_0 = arith.constant 0 : i32
    %c0_i32_1 = arith.constant 0 : i32
    return %c0_i32, %c0_i32_0 : i32, i32
  }
  func.func @transform_10(%arg0: i32, %arg1: memref<2xi32, #tpu.memory_space<smem>>) -> (i32, i32) {
    %c0_i32 = arith.constant 0 : i32
    %c0_i32_0 = arith.constant 0 : i32
    %c0_i32_1 = arith.constant 0 : i32
    return %c0_i32, %c0_i32_0 : i32, i32
  }
  func.func @transform_11(%arg0: i32, %arg1: memref<2xi32, #tpu.memory_space<smem>>) -> (i32, i32) {
    %c0_i32 = arith.constant 0 : i32
    %c0_i32_0 = arith.constant 0 : i32
    %c0_i32_1 = arith.constant 0 : i32
    return %c0_i32, %c0_i32_0 : i32, i32
  }
  func.func @transform_12(%arg0: i32, %arg1: memref<2xi32, #tpu.memory_space<smem>>) -> (i32, i32) {
    %c0_i32 = arith.constant 0 : i32
    %c0_i32_0 = arith.constant 0 : i32
    %c0_i32_1 = arith.constant 0 : i32
    return %c0_i32, %c0_i32_0 : i32, i32
  }
  func.func @transform_13(%arg0: i32, %arg1: memref<2xi32, #tpu.memory_space<smem>>) -> (i32, i32) {
    %c0_i32 = arith.constant 0 : i32
    %c0_i32_0 = arith.constant 0 : i32
    %c0_i32_1 = arith.constant 0 : i32
    return %c0_i32, %c0_i32_0 : i32, i32
  }
  func.func @transform_14(%arg0: i32, %arg1: memref<2xi32, #tpu.memory_space<smem>>) -> (i32, i32) {
    %c0_i32 = arith.constant 0 : i32
    %c0_i32_0 = arith.constant 0 : i32
    %c0_i32_1 = arith.constant 0 : i32
    return %c0_i32, %c0_i32_0 : i32, i32
  }
  func.func @transform_15(%arg0: i32, %arg1: memref<2xi32, #tpu.memory_space<smem>>) -> (i32, i32) {
    %c0_i32 = arith.constant 0 : i32
    %c0_i32_0 = arith.constant 0 : i32
    %c0_i32_1 = arith.constant 0 : i32
    return %c0_i32, %c0_i32_0 : i32, i32
  }
  func.func @transform_16(%arg0: i32, %arg1: memref<2xi32, #tpu.memory_space<smem>>) -> (i32, i32) {
    %c0_i32 = arith.constant 0 : i32
    %c0_i32_0 = arith.constant 0 : i32
    %c0_i32_1 = arith.constant 0 : i32
    return %c0_i32, %c0_i32_0 : i32, i32
  }
  func.func @transform_17(%arg0: i32, %arg1: memref<2xi32, #tpu.memory_space<smem>>) -> (i32, i32) {
    %c0_i32 = arith.constant 0 : i32
    %c0_i32_0 = arith.constant 0 : i32
    %c0_i32_1 = arith.constant 0 : i32
    return %c0_i32, %c0_i32_0 : i32, i32
  }
  func.func @transform_18(%arg0: i32, %arg1: memref<2xi32, #tpu.memory_space<smem>>) -> (i32, i32) {
    %c0_i32 = arith.constant 0 : i32
    %c0_i32_0 = arith.constant 0 : i32
    %c0_i32_1 = arith.constant 0 : i32
    return %c0_i32, %c0_i32_0 : i32, i32
  }
  func.func @transform_19(%arg0: i32, %arg1: memref<2xi32, #tpu.memory_space<smem>>) -> (i32, i32) {
    %c0_i32 = arith.constant 0 : i32
    %c0_i32_0 = arith.constant 0 : i32
    %c0_i32_1 = arith.constant 0 : i32
    return %c0_i32, %c0_i32_0 : i32, i32
  }
  func.func @transform_20(%arg0: i32, %arg1: memref<2xi32, #tpu.memory_space<smem>>) -> (i32, i32) {
    %c0_i32 = arith.constant 0 : i32
    %c0_i32_0 = arith.constant 0 : i32
    %c0_i32_1 = arith.constant 0 : i32
    return %c0_i32, %c0_i32_0 : i32, i32
  }
  func.func @transform_21(%arg0: i32, %arg1: memref<2xi32, #tpu.memory_space<smem>>) -> (i32, i32) {
    %c0_i32 = arith.constant 0 : i32
    %c0_i32_0 = arith.constant 0 : i32
    %c0_i32_1 = arith.constant 0 : i32
    return %c0_i32, %c0_i32_0 : i32, i32
  }
  func.func @transform_22(%arg0: i32, %arg1: memref<2xi32, #tpu.memory_space<smem>>) -> (i32, i32) {
    %c0_i32 = arith.constant 0 : i32
    %c0_i32_0 = arith.constant 0 : i32
    %c0_i32_1 = arith.constant 0 : i32
    return %c0_i32, %c0_i32_0 : i32, i32
  }
  func.func @transform_23(%arg0: i32, %arg1: memref<2xi32, #tpu.memory_space<smem>>) -> (i32, i32) {
    %c0_i32 = arith.constant 0 : i32
    %c0_i32_0 = arith.constant 0 : i32
    %c0_i32_1 = arith.constant 0 : i32
    return %c0_i32, %c0_i32_0 : i32, i32
  }
  func.func @transform_24(%arg0: i32, %arg1: memref<2xi32, #tpu.memory_space<smem>>) -> (i32, i32) {
    %c0_i32 = arith.constant 0 : i32
    %c0_i32_0 = arith.constant 0 : i32
    %c0_i32_1 = arith.constant 0 : i32
    return %c0_i32, %c0_i32_0 : i32, i32
  }
  func.func @transform_25(%arg0: i32, %arg1: memref<2xi32, #tpu.memory_space<smem>>) -> (i32, i32) {
    %c0_i32 = arith.constant 0 : i32
    %c0_i32_0 = arith.constant 0 : i32
    %c0_i32_1 = arith.constant 0 : i32
    return %c0_i32, %c0_i32_0 : i32, i32
  }
  func.func @transform_26(%arg0: i32, %arg1: memref<2xi32, #tpu.memory_space<smem>>) -> (i32, i32) {
    %c0_i32 = arith.constant 0 : i32
    %c0_i32_0 = arith.constant 0 : i32
    %c0_i32_1 = arith.constant 0 : i32
    return %c0_i32, %c0_i32_0 : i32, i32
  }
  func.func @transform_27(%arg0: i32, %arg1: memref<2xi32, #tpu.memory_space<smem>>) -> (i32, i32) {
    %c0_i32 = arith.constant 0 : i32
    %c0_i32_0 = arith.constant 0 : i32
    %c0_i32_1 = arith.constant 0 : i32
    return %c0_i32, %c0_i32_0 : i32, i32
  }
  func.func @transform_28(%arg0: i32, %arg1: memref<2xi32, #tpu.memory_space<smem>>) -> (i32, i32) {
    %c0_i32 = arith.constant 0 : i32
    %c0_i32_0 = arith.constant 0 : i32
    %c0_i32_1 = arith.constant 0 : i32
    return %c0_i32, %c0_i32_0 : i32, i32
  }
}

</mosaic_0001>

<bundles_post_ra>
// kernel: text_encoder_forward.1
= control target key start
LH: loop header
LB: loop body
LE: loop exit
PB: predicated region body
PF: predicated region fallthrough
CT: control target
= control target key end

     0   :  { %s3790_s6 = smov 1   ;;  %s3791_s10 = smov 2   ;;  %s4583_s0 = inlined_call_operand.smem [shape: u32[30], index: -1, kind: input, shape index: {}] }
   0x1   :  { %s3843_s5 = sld [smem:[%s4583_s0]]   ;;  %s3792_s14 = smov 3  }
   0x2   :  { %s3848_s9 = sld [smem:[%s4583_s0 + %s3790_s6]]   ;;  %s3793_s18 = smov 4  }
   0x3   :  { %s3853_s13 = sld [smem:[%s4583_s0 + %s3791_s10]]   ;;  %s3794_s22 = smov 5  }
   0x4   :  { %s3858_s17 = sld [smem:[%s4583_s0 + %s3792_s14]]   ;;  %s3795_s26 = smov 6  }
   0x5   :  { %s3863_s21 = sld [smem:[%s4583_s0 + %s3793_s18]]   ;;  %s3796_s30 = smov 7  }
   0x6   :  { %s3868_s25 = sld [smem:[%s4583_s0 + %s3794_s22]]   ;;  %s3797_s4 = smov 8  }
   0x7   :  { %s3873_s29 = sld [smem:[%s4583_s0 + %s3795_s26]]   ;;  %s3798_s10 = smov 9  }
   0x8   :  { %s3878_s3 = sld [smem:[%s4583_s0 + %s3796_s30]]   ;;  %s3799_s15 = smov 10  }
   0x9   :  { %s3883_s8 = sld [smem:[%s4583_s0 + %s3797_s4]]   ;;  %s3800_s20 = smov 11  }
   0xa   :  { %s3888_s14 = sld [smem:[%s4583_s0 + %s3798_s10]]   ;;  %s3801_s26 = smov 12  }
   0xb   :  { %s3893_s19 = sld [smem:[%s4583_s0 + %s3799_s15]]   ;;  %s3802_s1 = smov 13  }
   0xc   :  { %s3898_s24 = sld [smem:[%s4583_s0 + %s3800_s20]]   ;;  %s3803_s7 = smov 14  }
   0xd   :  { %s3903_s30 = sld [smem:[%s4583_s0 + %s3801_s26]]   ;;  %s3804_s15 = smov 15  }
   0xe   :  { %s3908_s6 = sld [smem:[%s4583_s0 + %s3802_s1]]   ;;  %s3805_s22 = smov 16  }
   0xf   :  { %s3913_s12 = sld [smem:[%s4583_s0 + %s3803_s7]]   ;;  %s3806_s28 = smov 17  }
  0x10   :  { %s3918_s20 = sld [smem:[%s4583_s0 + %s3804_s15]]   ;;  %s3807_s7 = smov 18  }
  0x11   :  { %s3923_s27 = sld [smem:[%s4583_s0 + %s3805_s22]]   ;;  %s3808_s15 = smov 19  }
  0x12   :  { %s3928_s4 = sld [smem:[%s4583_s0 + %s3806_s28]]   ;;  %s3809_s22 = smov 20  }
  0x13   :  { %s3943_s1 = sld [smem:[%s4583_s0 + %s3809_s22]]   ;;  %s3810_s28 = smov 21  }
  0x14   :  { %s3948_s10 = sld [smem:[%s4583_s0 + %s3810_s28]]   ;;  %s3813_s22 = smov 24  }
  0x15   :  { %4588 = sst [smem:[#allocation9_spill]] %s3913_s12 }
  0x16   :  { %4589 = sst [smem:[#allocation10_spill]] %s3918_s20 }
  0x17   :  { %4590 = sst [smem:[#allocation11_spill]] %s3923_s27 }
  0x18   :  { %4591 = sst [smem:[#allocation12_spill]] %s3928_s4  ;;  %s3814_s4 = smov 25  }
  0x19   :  { %s3933_s12 = sld [smem:[%s4583_s0 + %s3807_s7]]   ;;  %s3811_s7 = smov 22  }
  0x1a   :  { %s3938_s20 = sld [smem:[%s4583_s0 + %s3808_s15]]   ;;  %s3812_s15 = smov 23  }
  0x1b   :  { %4594 = sst [smem:[#allocation15_spill]] %s3943_s1  ;;  %s64_s1 = sshll.u32 %s3843_s5, 4  ;;  %s65_s1 = int_to_ptr.vmem [resolvable:$true] %s64_s1 }
  0x1c   :  { %4595 = sst [smem:[#allocation16_spill]] %s3948_s10  ;;  %p3759_p1 = scmp.lt.s32.totalorder %s65_s1, %s65_s1 }
  0x1d   :  { %s3953_s16 = sld [smem:[%s4583_s0 + %s3811_s7]]   ;;  %s3754_s7 = scalar_lea.vmem %s65_s1, 16 }
  0x1e   :  { %s3958_s23 = sld [smem:[%s4583_s0 + %s3812_s15]]   ;;  %p3755_p0 = scmp.ne.s32.totalorder %s65_s1, %s3754_s7 }
  0x1f   :  { %4592 = sst [smem:[#allocation13_spill]] %s3933_s12  ;;  %s3815_s12 = smov 26  }
  0x20   :  { %4593 = sst [smem:[#allocation14_spill]] %s3938_s20  ;;  %s3816_s20 = smov 27  }
  0x21   :  { %s3963_s27 = sld [smem:[%s4583_s0 + %s3813_s22]]   ;;  %s3817_s22 = smov 28  }
  0x22   :  { %s3968_s10 = sld [smem:[%s4583_s0 + %s3814_s4]]   ;;  %s3818_s4 = smov 29  }
  0x23   :  { %4596 = sst [smem:[#allocation17_spill]] %s3953_s16  ;;  %p3760_p2 = scmp.lt.s32.totalorder %s3754_s7, %s3754_s7 }
  0x24   :  { %4597 = sst [smem:[#allocation18_spill]] %s3958_s23 }
  0x25   :  { %s3973_s16 = sld [smem:[%s4583_s0 + %s3815_s12]]   ;;  %p3761_p3 = por %p3760_p2, %p3759_p1 }
  0x26   :  { %s3978_s23 = sld [smem:[%s4583_s0 + %s3816_s20]]  }
  0x27   :  { %4598 = sst [smem:[#allocation19_spill]] %s3963_s27  ;;  %p3762_p4 = pnand %p3761_p3, %p3755_p0 }
  0x28   :  { %4599 = sst [smem:[#allocation20_spill]] %s3968_s10 }
  0x29   :  { %s3984_s28 = sld [smem:[%s4583_s0 + %s3817_s22]]  }
  0x2a   :  { %s3989_s12 = sld [smem:[%s4583_s0 + %s3818_s4]]  }
  0x2b   :  { %3765 = shalt.err (!%p3762_p4)  }
  0x2c   :  { %s3819_s5 = smov [#allocation4]  }
  0x2d   :  { %67 = dma.vmem_to_smem %s65_s1, 16, %s3819_s5, [#allocation3] }
  0x2e   :  { %3786 = dma.done.wait [#allocation3], 16 }
  0x2f   :  { %3787 = vsyncadd [#allocation3], 4294967280 }
  0x30   :  { %69 = sfence }
  0x31   :  { %v3992_v0 = vld [vmem:[%s3848_s9] sm:$0xff]  ;;  %vm172_vm0 = vcmask 261120   ;;  %v3995_v1 = vld [vmem:[%s3848_s9 + $0x8] sm:$0xff] }
  0x32   :  { %70 = vsyncpa [#allocation6], 0  ;;  %v173_v2 = vsel %vm172_vm0, %v3992_v0, 0.0  ;;  %v176_v3 = vsel %vm172_vm0, %v3995_v1, 0.0  ;;  %v140_v14 = vld [vmem:[%s3863_s21 + $0x10] sm:$0xff]  ;;  %v141_v15 = vld [vmem:[%s3863_s21 + $0x18] sm:$0xff]  ;;  %v128_v51 = vlaneseq }
  0x33   :  { %174 = vadd.xlane.f32.xlu0 %v173_v2  ;;  %v138_v16 = vld [vmem:[%s3863_s21] sm:$0xff]  ;;  %v3820_v17 = vmov 0.0   ;;  %v218_v18 = vpack.c.bf16 %v141_v15, %v140_v14  ;;  %v139_v19 = vld [vmem:[%s3863_s21 + $0x8] sm:$0xff]  ;;  %vm3821_vm1 = vmmov 0   ;;  %s3822_s0 = smov 96   ;;  %vm274_vm2 = vcmask 64512  }
  0x34   :  { %3289 = vmatprep.subr.bf16.mxu1 %v3820_v17  ;;  %3293 = vmatprep.mubr.msk.bf16.mxu1 %vm3821_vm1, %v3820_v17  ;;  %v217_v20 = vpack.c.bf16 %v139_v19, %v138_v16  ;;  %v3107_v29 = vld [vmem:[%s3853_s13] ss:$0 sm:$0xff]  ;;  %v129_v52 = vshrl.u32 %v128_v51, 7  ;;  %v131_v53 = vand.u32 127, %v128_v51  ;;  %v3823_v55 = vmov -1e+09  }
  0x35   :  { %3303 = vmatprep.subr.bf16.mxu0 %v3820_v17  ;;  %3305 = vmatprep.mubr.msk.bf16.mxu0 %vm3821_vm1, %v3820_v17  ;;  %v3108_v33 = vld [vmem:[%s3858_s17] ss:$0 sm:$0xff]  ;;  %s3824_s9 = smov 64   ;;  %s3825_s13 = smov 88   ;;  %vm403_vm4 = vcmask 1043456   ;;  %vm3012_vm5 = vcmask 1040384  }
  0x36   :  { %3290 = vmatpush3.bf16.msra.mxu1 %v218_v18  ;;  %v3109_v38 = vld [vmem:[%s3868_s25] ss:$0 sm:$0xff]  ;;  %vm132_vm3 = vcmp.le.s32.totalorder %v131_v53, %v129_v52  ;;  %s3826_s17 = smov 120   ;;  %s3827_s21 = smov 56  }
  0x37   :  { %177 = vadd.xlane.f32.xlu0 %v176_v3  ;;  %3291 = vmatprep.subr.bf16.mxu1 %v3820_v17  ;;  %v4043_v56 = vsel %vm132_vm3, 0.0, %v3823_v55  ;;  %s3828_s25 = smov 80   ;;  %s3829_s27 = smov 112  }
  0x38   :  { %s3830_s10 = smov 48   ;;  %s3831_s11 = smov 72  }
  0x39   :  { %s3832_s20 = smov 104   ;;  %s3833_s15 = smov 40  }
  0x3a   :  { %3292 = vmatpush3.bf16.msra.mxu1 %v217_v20  ;;  %s4608_s18 = sld [smem:[#allocation16_spill]] }
  0x3b   :  { %3297 = vmatprep.subr.bf16.mxu1 %v3820_v17  ;;  %s4609_s1 = sld [smem:[#allocation19_spill]] }
  0x3c   :  { %s4610_s22 = sld [smem:[#allocation18_spill]] }
  0x3d   :  { %s4611_s26 = sld [smem:[#allocation20_spill]] }
  0x3e   :  { %s3002_s4 = sld [smem:[#allocation4]] }
  0x44   :  { %s3003_s7 = scalar_lea.vmem [#allocation2], %s3002_s4 }
  0xbc   :  { %v175_v4 = vpop.xlane.xlu0 %174 }
  0xbd   :  { %v180_v5 = vmul.f32 0.03125, %v175_v4 }
  0xbf   :  { %v182_v6 = vsub.f32 %v3992_v0, %v180_v5 }
  0xc0   :  { %v178_v7 = vpop.xlane.xlu0 %177 }
  0xc1   :  { %v181_v8 = vmul.f32 0.03125, %v178_v7  ;;  %v184_v9 = vmul.f32 %v182_v6, %v182_v6 }
  0xc3   :  { %v183_v10 = vsub.f32 %v3995_v1, %v181_v8  ;;  %v186_v11 = vsel %vm172_vm0, %v184_v9, 0.0 }
  0xc4   :  { %187 = vadd.xlane.f32.xlu1 %v186_v11 }
  0xc5   :  { %v185_v12 = vmul.f32 %v183_v10, %v183_v10 }
  0xc7   :  { %v189_v13 = vsel %vm172_vm0, %v185_v12, 0.0 }
  0xc8   :  { %190 = vadd.xlane.f32.xlu1 %v189_v13 }
 0x14d   :  { %v188_v21 = vpop.xlane.xlu1 %187 }
 0x14e   :  { %v192_v22 = vmul.f32 0.03125, %v188_v21 }
 0x150   :  { %v194_v23 = vadd.f32 1e-05, %v192_v22 }
 0x151   :  { %v191_v24 = vpop.xlane.xlu1 %190 }
 0x152   :  { %3654 = vrsqrt.f32 %v194_v23  ;;  %v193_v25 = vmul.f32 0.03125, %v191_v24 }
 0x154   :  { %v195_v26 = vadd.f32 1e-05, %v193_v25 }
 0x156   :  { %3656 = vrsqrt.f32 %v195_v26 }
 0x15f   :  { %v3655_v27 = vpop.eup %3654 }
 0x160   :  { %v198_v28 = vmul.f32 %v3655_v27, %v182_v6 }
 0x162   :  { %v206_v32 = vmul.f32 %v3107_v29, %v198_v28 }
 0x163   :  { %v3657_v30 = vpop.eup %3656 }
 0x164   :  { %v199_v31 = vmul.f32 %v3657_v30, %v183_v10  ;;  %v214_v35 = vadd.f32 %v3108_v33, %v206_v32 }
 0x166   :  { %v207_v34 = vmul.f32 %v3107_v29, %v199_v31 }
 0x168   :  { %v215_v36 = vadd.f32 %v3108_v33, %v207_v34 }
 0x16a   :  { %v216_v37 = vpack.c.bf16 %v215_v36, %v214_v35 }
 0x16c   :  { %3294 = vmatmul.mubr.msk.bf16.vlgmr.msra.gmra.mxu1 %vm172_vm0, %v216_v37 }
 0x16d   :  { %3299 = vmatprep.mubr.msk.bf16.mxu1 %vm3821_vm1, %v3820_v17 }
 0x22c   :  { %v262_v39 = vpop.f32.mrf.mxu1 }
 0x22d   :  { %v263_v40 = vadd.f32 %v3109_v38, %v262_v39 }
 0x22e   :  { %v3295_v41 = vpop.f32.mrf.mxu1 }
 0x22f   :  { %v4023_v42 = vpack.c.bf16 %v263_v40, %v263_v40 }
 0x230   :  { %v265_v43 = vpop.f32.mrf.mxu1 }
 0x231   :  { %v266_v44 = vadd.f32 %v3109_v38, %v265_v43  ;;  %272 = vrot.lane.b32.xlu0 %v4023_v42, %s3822_s0 }
 0x232   :  { %v3296_v45 = vpop.f32.mrf.mxu1 }
 0x233   :  { %v4027_v46 = vpack.c.bf16 %v266_v44, %v266_v44 }
 0x235   :  { %322 = vrot.lane.b32.xlu1 %v4027_v46, %s3822_s0 }
 0x2a3   :  { %v273_v47 = vpop.permute.xlu0 %272 }
 0x2a4   :  { %v279_v48 = vsel %vm274_vm2, %v273_v47, 0 }
 0x2a5   :  { %3298 = vmatpush3.bf16.xpose.msra.mxu1 %v279_v48 }
 0x2a6   :  { %3309 = vmatprep.subr.bf16.mxu1 %v3820_v17 }
 0x2a7   :  { %v323_v49 = vpop.permute.xlu1 %322 }
 0x2a8   :  { %v328_v50 = vsel %vm274_vm2, %v323_v49, 0 }
 0x2a9   :  { %3304 = vmatpush3.bf16.xpose.msra.mxu0 %v328_v50 }
 0x2aa   :  { %3315 = vmatprep.subr.bf16.mxu0 %v3820_v17 }
 0x2ac   :  { %3300 = vmatmul.mubr.msk.bf16.vlgmr.msra.gmra.mxu1 %vm274_vm2, %v4023_v42 }
 0x2ad   :  { %3311 = vmatprep.mubr.msk.bf16.mxu1 %vm3821_vm1, %v3820_v17 }
 0x2b0   :  { %3306 = vmatmul.mubr.msk.bf16.vlgmr.msra.gmra.mxu0 %vm274_vm2, %v4027_v46 }
 0x2b1   :  { %3317 = vmatprep.mubr.msk.bf16.mxu0 %vm3821_vm1, %v3820_v17 }
 0x36c   :  { %v315_v54 = vpop.f32.mrf.mxu1 }
 0x36d   :  { %v370_v57 = vmul.f32 0.35355338, %v315_v54 }
 0x36e   :  { %v3301_v58 = vpop.f32.mrf.mxu1 }
 0x36f   :  { %v372_v59 = vadd.f32 %v370_v57, %v4043_v56 }
 0x370   :  { %v318_v60 = vpop.f32.mrf.mxu1  ;;  %v364_v61 = vpop.f32.mrf.mxu0 }
 0x371   :  { %v371_v62 = vmul.f32 0.35355338, %v364_v61  ;;  %v374_v63 = vsel %vm274_vm2, %v372_v59, -inf }
 0x372   :  { %v3302_v2 = vpop.f32.mrf.mxu1  ;;  %v3307_v3 = vpop.f32.mrf.mxu0  ;;  %375 = vmax.xlane.f32.xlu1 %v374_v63 }
 0x373   :  { %v373_v4 = vadd.f32 %v371_v62, %v4043_v56 }
 0x374   :  { %v367_v5 = vpop.f32.mrf.mxu0 }
 0x375   :  { %v377_v6 = vsel %vm274_vm2, %v373_v4, -inf }
 0x376   :  { %v3308_v7 = vpop.f32.mrf.mxu0  ;;  %378 = vmax.xlane.f32.xlu0 %v377_v6 }
 0x383   :  { %447 = vrot.lane.b32.xlu1 %v4027_v46, %s3824_s9 }
 0x387   :  { %499 = vrot.lane.b32.xlu1 %v4023_v42, %s3825_s13 }
 0x3fb   :  { %v376_v8 = vpop.xlane.xlu1 %375 }
 0x3fc   :  { %v380_v9 = vsub.f32 %v372_v59, %v376_v8 }
 0x3fe   :  { %v382_v10 = vmul.f32 1.442695, %v380_v9 }
 0x3ff   :  { %v379_v11 = vpop.xlane.xlu0 %378  ;;  %v448_v12 = vpop.permute.xlu1 %447 }
 0x400   :  { %3658 = vpow2.f32 %v382_v10  ;;  %v381_v13 = vsub.f32 %v373_v4, %v379_v11  ;;  %v453_v14 = vsel %vm403_vm4, %v448_v12, 0 }
 0x401   :  { %3316 = vmatpush3.bf16.msra.mxu0 %v453_v14 }
 0x402   :  { %v384_v15 = vmul.f32 1.442695, %v381_v13  ;;  %3327 = vmatprep.subr.bf16.mxu0 %v3820_v17 }
 0x403   :  { %v500_v21 = vpop.permute.xlu1 %499 }
 0x404   :  { %3660 = vpow2.f32 %v384_v15  ;;  %v505_v30 = vsel %vm274_vm2, %v500_v21, 0 }
 0x40d   :  { %v3659_v16 = vpop.eup %3658 }
 0x40e   :  { %v386_v18 = vsel %vm274_vm2, %v3659_v16, 0.0 }
 0x40f   :  { %387 = vadd.xlane.f32.xlu0 %v386_v18 }
 0x411   :  { %v3661_v19 = vpop.eup %3660 }
 0x412   :  { %v389_v20 = vsel %vm274_vm2, %v3661_v19, 0.0 }
 0x413   :  { %390 = vadd.xlane.f32.xlu1 %v389_v20 }
 0x424   :  { %549 = vrot.lane.b32.xlu1 %v4027_v46, %s3825_s13 }
 0x425   :  { %398 = vrot.lane.b32.xlu0 %v4023_v42, %s3824_s9 }
 0x428   :  { %547 = vrot.lane.b32.xlu1 %v4027_v46, %s3826_s17 }
 0x429   :  { %497 = vrot.lane.b32.xlu0 %v4023_v42, %s3826_s17 }
 0x498   :  { %v388_v22 = vpop.xlane.xlu0 %387 }
 0x499   :  { %3662 = vrcp.f32 %v388_v22 }
 0x49c   :  { %v399_v23 = vpop.permute.xlu0 %398  ;;  %v391_v24 = vpop.xlane.xlu1 %390 }
 0x49d   :  { %v405_v25 = vsel %vm403_vm4, %v399_v23, 0  ;;  %3664 = vrcp.f32 %v391_v24 }
 0x49e   :  { %3310 = vmatpush3.bf16.msra.mxu1 %v405_v25 }
 0x49f   :  { %3321 = vmatprep.subr.bf16.mxu1 %v3820_v17 }
 0x4a0   :  { %v550_v32 = vpop.permute.xlu1 %549  ;;  %v498_v35 = vpop.permute.xlu0 %497 }
 0x4a1   :  { %v555_v34 = vsel %vm274_vm2, %v550_v32, 0 }
 0x4a4   :  { %v548_v36 = vpop.permute.xlu1 %547 }
 0x4a6   :  { %v3663_v26 = vpop.eup %3662 }
 0x4a7   :  { %v393_v27 = vmul.f32 %v3663_v26, %v3659_v16 }
 0x4a9   :  { %v396_v28 = vpack.c.bf16 %v393_v27, %v393_v27 }
 0x4aa   :  { %v3665_v29 = vpop.eup %3664 }
 0x4ab   :  { %3312 = vmatmul.mubr.msk.bf16.vlgmr.msra.gmra.mxu1 %vm274_vm2, %v396_v28  ;;  %v395_v31 = vmul.f32 %v3665_v29, %v3661_v19  ;;  %v143_v19 = vld [vmem:[%s3873_s29] sm:$0xff] }
 0x4ac   :  { %3322 = vmatpush3.bf16.xpose.msra.mxu1 %v505_v30  ;;  %3323 = vmatprep.mubr.msk.bf16.mxu1 %vm3821_vm1, %v3820_v17  ;;  %v496_v22 = vpack.c.bf16 %v143_v19, %v143_v19 }
 0x4ad   :  { %v397_v33 = vpack.c.bf16 %v395_v31, %v395_v31  ;;  %3333 = vmatprep.subr.bf16.mxu1 %v3820_v17  ;;  %v144_v31 = vld [vmem:[%s3873_s29 + $0x8] sm:$0xff] }
 0x4ae   :  { %v774_v26 = vsel %vm403_vm4, %v496_v22, 0  ;;  %v722_v32 = vpack.c.bf16 %v144_v31, %v144_v31 }
 0x4af   :  { %3318 = vmatmul.mubr.msk.bf16.vlgmr.msra.gmra.mxu0 %vm274_vm2, %v397_v33 }
 0x4b0   :  { %3328 = vmatpush3.bf16.xpose.msra.mxu0 %v555_v34  ;;  %3329 = vmatprep.mubr.msk.bf16.mxu0 %vm3821_vm1, %v3820_v17  ;;  %v727_v33 = vsel %vm403_vm4, %v722_v32, 0 }
 0x4b1   :  { %3339 = vmatprep.subr.bf16.mxu0 %v3820_v17 }
 0x4b3   :  { %3324 = vmatmul.mubr.msk.bf16.vlgmr.msra.gmra.mxu1 %vm274_vm2, %v498_v35 }
 0x4b4   :  { %3335 = vmatprep.mubr.msk.bf16.mxu1 %vm3821_vm1, %v3820_v17 }
 0x4b7   :  { %3330 = vmatmul.mubr.msk.bf16.vlgmr.msra.gmra.mxu0 %vm274_vm2, %v548_v36 }
 0x4b8   :  { %3341 = vmatprep.mubr.msk.bf16.mxu0 %vm3821_vm1, %v3820_v17 }
 0x56b   :  { %v4083_v37 = vpop.f32.mrf.mxu1 }
 0x56d   :  { %v3313_v38 = vpop.f32.mrf.mxu1 }
 0x56f   :  { %v444_v39 = vpop.f32.mrf.mxu1  ;;  %v4085_v40 = vpop.f32.mrf.mxu0 }
 0x570   :  { %v495_v41 = vpack.c.bf16 %v4085_v40, %v4083_v37 }
 0x571   :  { %v3314_v43 = vpop.f32.mrf.mxu1  ;;  %v3319_v44 = vpop.f32.mrf.mxu0 }
 0x573   :  { %v492_v45 = vpop.f32.mrf.mxu0  ;;  %v541_v47 = vpop.f32.mrf.mxu1 }
 0x574   :  { %v597_v48 = vmul.f32 0.35355338, %v541_v47 }
 0x575   :  { %v3320_v49 = vpop.f32.mrf.mxu0  ;;  %v3325_v50 = vpop.f32.mrf.mxu1 }
 0x576   :  { %v599_v51 = vadd.f32 %v597_v48, %v4043_v56 }
 0x577   :  { %v544_v52 = vpop.f32.mrf.mxu1  ;;  %v591_v53 = vpop.f32.mrf.mxu0 }
 0x578   :  { %v598_v54 = vmul.f32 0.35355338, %v591_v53  ;;  %v601_v55 = vsel %vm274_vm2, %v599_v51, -inf }
 0x579   :  { %602 = vmax.xlane.f32.xlu0 %v601_v55  ;;  %v3326_v57 = vpop.f32.mrf.mxu1  ;;  %v3331_v58 = vpop.f32.mrf.mxu0 }
 0x57a   :  { %v600_v59 = vadd.f32 %v598_v54, %v4043_v56 }
 0x57b   :  { %v594_v60 = vpop.f32.mrf.mxu0 }
 0x57c   :  { %v604_v61 = vsel %vm274_vm2, %v600_v59, -inf }
 0x57d   :  { %605 = vmax.xlane.f32.xlu1 %v604_v61  ;;  %v3332_v62 = vpop.f32.mrf.mxu0 }
 0x58e   :  { %673 = vrot.lane.b32.xlu1 %v4027_v46, %s3827_s21 }
 0x592   :  { %819 = vrot.lane.b32.xlu1 %v4023_v42, %s3828_s25 }
 0x596   :  { %869 = vrot.lane.b32.xlu1 %v4027_v46, %s3828_s25 }
 0x59a   :  { %867 = vrot.lane.b32.xlu1 %v4027_v46, %s3829_s27 }
 0x602   :  { %v603_v63 = vpop.xlane.xlu0 %602 }
 0x603   :  { %v607_v2 = vsub.f32 %v599_v51, %v603_v63 }
 0x605   :  { %v609_v3 = vmul.f32 1.442695, %v607_v2 }
 0x606   :  { %v606_v4 = vpop.xlane.xlu1 %605 }
 0x607   :  { %3666 = vpow2.f32 %v609_v3  ;;  %v608_v5 = vsub.f32 %v600_v59, %v606_v4 }
 0x609   :  { %v611_v6 = vmul.f32 1.442695, %v608_v5 }
 0x60a   :  { %v674_v7 = vpop.permute.xlu1 %673 }
 0x60b   :  { %3668 = vpow2.f32 %v611_v6  ;;  %v679_v8 = vsel %vm403_vm4, %v674_v7, 0 }
 0x60c   :  { %3340 = vmatpush3.bf16.msra.mxu0 %v679_v8 }
 0x60d   :  { %3351 = vmatprep.subr.bf16.mxu0 %v3820_v17 }
 0x60e   :  { %v820_v27 = vpop.permute.xlu1 %819 }
 0x612   :  { %v870_v28 = vpop.permute.xlu1 %869 }
 0x613   :  { %v875_v29 = vsel %vm274_vm2, %v870_v28, 0 }
 0x614   :  { %v3667_v9 = vpop.eup %3666 }
 0x615   :  { %v613_v10 = vsel %vm274_vm2, %v3667_v9, 0.0 }
 0x616   :  { %614 = vadd.xlane.f32.xlu0 %v613_v10  ;;  %v868_v30 = vpop.permute.xlu1 %867 }
 0x618   :  { %v3669_v11 = vpop.eup %3668 }
 0x619   :  { %v616_v12 = vsel %vm274_vm2, %v3669_v11, 0.0 }
 0x61a   :  { %617 = vadd.xlane.f32.xlu0 %v616_v12 }
 0x630   :  { %625 = vrot.lane.b32.xlu0 %v4023_v42, %s3827_s21 }
 0x634   :  { %817 = vrot.lane.b32.xlu0 %v4023_v42, %s3829_s27 }
 0x69f   :  { %v615_v13 = vpop.xlane.xlu0 %614 }
 0x6a0   :  { %3670 = vrcp.f32 %v615_v13 }
 0x6a3   :  { %v618_v14 = vpop.xlane.xlu0 %617 }
 0x6a4   :  { %3672 = vrcp.f32 %v618_v14 }
 0x6a7   :  { %v626_v15 = vpop.permute.xlu0 %625 }
 0x6a8   :  { %v631_v16 = vsel %vm403_vm4, %v626_v15, 0 }
 0x6a9   :  { %3334 = vmatpush3.bf16.msra.mxu1 %v631_v16 }
 0x6aa   :  { %3345 = vmatprep.subr.bf16.mxu1 %v3820_v17 }
 0x6ab   :  { %v818_v47 = vpop.permute.xlu0 %817 }
 0x6ad   :  { %v3671_v18 = vpop.eup %3670 }
 0x6ae   :  { %v620_v20 = vmul.f32 %v3671_v18, %v3667_v9 }
 0x6b0   :  { %v623_v21 = vpack.c.bf16 %v620_v20, %v620_v20 }
 0x6b1   :  { %v3673_v23 = vpop.eup %3672 }
 0x6b2   :  { %3336 = vmatmul.mubr.msk.bf16.vlgmr.msra.gmra.mxu1 %vm274_vm2, %v623_v21  ;;  %v622_v24 = vmul.f32 %v3673_v23, %v3669_v11 }
 0x6b3   :  { %3347 = vmatprep.mubr.msk.bf16.mxu1 %vm3821_vm1, %v3820_v17  ;;  %3346 = vmatpush3.bf16.msra.mxu1 %v727_v33 }
 0x6b4   :  { %v624_v25 = vpack.c.bf16 %v622_v24, %v622_v24  ;;  %3357 = vmatprep.subr.bf16.mxu1 %v3820_v17 }
 0x6b6   :  { %3342 = vmatmul.mubr.msk.bf16.vlgmr.msra.gmra.mxu0 %vm274_vm2, %v624_v25 }
 0x6b7   :  { %3352 = vmatpush3.bf16.msra.mxu0 %v774_v26  ;;  %3353 = vmatprep.mubr.msk.bf16.mxu0 %vm3821_vm1, %v3820_v17 }
 0x6b8   :  { %3363 = vmatprep.subr.bf16.mxu0 %v3820_v17 }
 0x6be   :  { %3354 = vmatmul.mubr.msk.bf16.vlgmr.msra.gmra.mxu0 %vm274_vm2, %v495_v41  ;;  %v825_v41 = vsel %vm274_vm2, %v820_v27, 0 }
 0x6bf   :  { %3364 = vmatpush3.bf16.xpose.msra.mxu0 %v875_v29  ;;  %3365 = vmatprep.mubr.msk.bf16.mxu0 %vm3821_vm1, %v3820_v17 }
 0x6c0   :  { %3375 = vmatprep.subr.bf16.mxu0 %v3820_v17 }
 0x6c6   :  { %3366 = vmatmul.mubr.msk.bf16.vlgmr.msra.gmra.mxu0 %vm274_vm2, %v868_v30 }
 0x6c7   :  { %3377 = vmatprep.mubr.msk.bf16.mxu0 %vm3821_vm1, %v3820_v17 }
 0x772   :  { %v667_v34 = vpop.f32.mrf.mxu1 }
 0x774   :  { %v3337_v35 = vpop.f32.mrf.mxu1 }
 0x776   :  { %v670_v36 = vpop.f32.mrf.mxu1  ;;  %v715_v37 = vpop.f32.mrf.mxu0 }
 0x777   :  { %v721_v38 = vpack.c.bf16 %v715_v37, %v667_v34 }
 0x778   :  { %v3338_v39 = vpop.f32.mrf.mxu1  ;;  %v3343_v40 = vpop.f32.mrf.mxu0 }
 0x779   :  { %3348 = vmatmul.mubr.msk.bf16.vlgmr.msra.gmra.mxu1 %vm274_vm2, %v721_v38  ;;  %v145_v38 = vld [vmem:[%s3873_s29 + $0x10] sm:$0xff] }
 0x77a   :  { %3358 = vmatpush3.bf16.xpose.msra.mxu1 %v825_v41  ;;  %v718_v43 = vpop.f32.mrf.mxu0  ;;  %3359 = vmatprep.mubr.msk.bf16.mxu1 %vm3821_vm1, %v3820_v17  ;;  %v1042_v39 = vpack.c.bf16 %v145_v38, %v145_v38 }
 0x77b   :  { %3369 = vmatprep.subr.bf16.mxu1 %v3820_v17 }
 0x77c   :  { %v3344_v44 = vpop.f32.mrf.mxu0  ;;  %v1047_v40 = vsel %vm403_vm4, %v1042_v39, 0 }
 0x77e   :  { %v4139_v45 = vpop.f32.mrf.mxu0 }
 0x780   :  { %v3355_v48 = vpop.f32.mrf.mxu0 }
 0x781   :  { %3360 = vmatmul.mubr.msk.bf16.vlgmr.msra.gmra.mxu1 %vm274_vm2, %v818_v47 }
 0x782   :  { %v4142_v49 = vpop.f32.mrf.mxu0  ;;  %3371 = vmatprep.mubr.msk.bf16.mxu1 %vm3821_vm1, %v3820_v17 }
 0x784   :  { %v3356_v50 = vpop.f32.mrf.mxu0 }
 0x786   :  { %v911_v51 = vpop.f32.mrf.mxu0 }
 0x787   :  { %v918_v52 = vmul.f32 0.35355338, %v911_v51 }
 0x788   :  { %v3367_v53 = vpop.f32.mrf.mxu0 }
 0x789   :  { %v920_v54 = vadd.f32 %v918_v52, %v4043_v56 }
 0x78a   :  { %v914_v55 = vpop.f32.mrf.mxu0 }
 0x78b   :  { %v924_v57 = vsel %vm274_vm2, %v920_v54, -inf }
 0x78c   :  { %925 = vmax.xlane.f32.xlu1 %v924_v57  ;;  %v3368_v58 = vpop.f32.mrf.mxu0 }
 0x79d   :  { %993 = vrot.lane.b32.xlu1 %v4027_v46, %s3830_s10 }
 0x7a1   :  { %1094 = vrot.lane.b32.xlu1 %v4023_v42, %s3831_s11 }
 0x7a5   :  { %1144 = vrot.lane.b32.xlu1 %v4027_v46, %s3831_s11 }
 0x7a9   :  { %1142 = vrot.lane.b32.xlu1 %v4027_v46, %s3832_s20 }
 0x815   :  { %v926_v59 = vpop.xlane.xlu1 %925 }
 0x816   :  { %v928_v62 = vsub.f32 %v920_v54, %v926_v59 }
 0x818   :  { %v931_v63 = vmul.f32 1.442695, %v928_v62 }
 0x819   :  { %v994_v60 = vpop.permute.xlu1 %993 }
 0x81a   :  { %v999_v61 = vsel %vm403_vm4, %v994_v60, 0  ;;  %3674 = vpow2.f32 %v931_v63 }
 0x81b   :  { %3376 = vmatpush3.bf16.msra.mxu0 %v999_v61 }
 0x81c   :  { %3387 = vmatprep.subr.bf16.mxu0 %v3820_v17 }
 0x81d   :  { %v1095_v24 = vpop.permute.xlu1 %1094 }
 0x81e   :  { %v1100_v26 = vsel %vm274_vm2, %v1095_v24, 0 }
 0x821   :  { %v1145_v52 = vpop.permute.xlu1 %1144 }
 0x822   :  { %v1150_v57 = vsel %vm274_vm2, %v1145_v52, 0 }
 0x825   :  { %v1143_v60 = vpop.permute.xlu1 %1142 }
 0x827   :  { %v3675_v12 = vpop.eup %3674 }
 0x828   :  { %v936_v14 = vsel %vm274_vm2, %v3675_v12, 0.0 }
 0x839   :  { %v4158_v2 = vpop.f32.mrf.mxu1 }
 0x83b   :  { %v3349_v3 = vpop.f32.mrf.mxu1 }
 0x83d   :  { %v4160_v4 = vpop.f32.mrf.mxu1 }
 0x83f   :  { %v3350_v5 = vpop.f32.mrf.mxu1 }
 0x841   :  { %v861_v6 = vpop.f32.mrf.mxu1 }
 0x842   :  { %v917_v7 = vmul.f32 0.35355338, %v861_v6  ;;  %v811_v6 = vadd.f32 %v4139_v45, %v4158_v2 }
 0x843   :  { %v3361_v8 = vpop.f32.mrf.mxu1 }
 0x844   :  { %v919_v9 = vadd.f32 %v917_v7, %v4043_v56 }
 0x845   :  { %v864_v10 = vpop.f32.mrf.mxu1 }
 0x846   :  { %v921_v11 = vsel %vm274_vm2, %v919_v9, -inf  ;;  %v814_v10 = vadd.f32 %v4142_v49, %v4160_v4 }
 0x847   :  { %922 = vmax.xlane.f32.xlu0 %v921_v11  ;;  %v3362_v13 = vpop.f32.mrf.mxu1 }
 0x84b   :  { %937 = vadd.xlane.f32.xlu0 %v936_v14 }
 0x8d0   :  { %v923_v15 = vpop.xlane.xlu0 %922 }
 0x8d1   :  { %v927_v16 = vsub.f32 %v919_v9, %v923_v15 }
 0x8d3   :  { %v929_v18 = vmul.f32 1.442695, %v927_v16 }
 0x8d4   :  { %v938_v19 = vpop.xlane.xlu0 %937 }
 0x8d5   :  { %3676 = vpow2.f32 %v929_v18 }
 0x8d6   :  { %3678 = vrcp.f32 %v938_v19 }
 0x8e2   :  { %v3677_v20 = vpop.eup %3676 }
 0x8e3   :  { %v3679_v21 = vpop.eup %3678  ;;  %v933_v22 = vsel %vm274_vm2, %v3677_v20, 0.0 }
 0x8e4   :  { %934 = vadd.xlane.f32.xlu0 %v933_v22  ;;  %v942_v23 = vmul.f32 %v3679_v21, %v3675_v12 }
 0x8e6   :  { %v944_v25 = vpack.c.bf16 %v942_v23, %v942_v23 }
 0x8e8   :  { %3378 = vmatmul.mubr.msk.bf16.vlgmr.msra.gmra.mxu0 %vm274_vm2, %v944_v25 }
 0x8e9   :  { %3388 = vmatpush3.bf16.xpose.msra.mxu0 %v1100_v26  ;;  %3389 = vmatprep.mubr.msk.bf16.mxu0 %vm3821_vm1, %v3820_v17 }
 0x8ea   :  { %3399 = vmatprep.subr.bf16.mxu0 %v3820_v17 }
 0x8fa   :  { %945 = vrot.lane.b32.xlu0 %v4023_v42, %s3830_s10 }
 0x8fe   :  { %1092 = vrot.lane.b32.xlu0 %v4023_v42, %s3832_s20 }
 0x96d   :  { %v935_v27 = vpop.xlane.xlu0 %934 }
 0x96e   :  { %3680 = vrcp.f32 %v935_v27 }
 0x971   :  { %v946_v28 = vpop.permute.xlu0 %945 }
 0x972   :  { %v951_v29 = vsel %vm403_vm4, %v946_v28, 0 }
 0x973   :  { %3370 = vmatpush3.bf16.msra.mxu1 %v951_v29 }
 0x974   :  { %3381 = vmatprep.subr.bf16.mxu1 %v3820_v17 }
 0x975   :  { %v1093_v30 = vpop.permute.xlu0 %1092 }
 0x976   :  { %3390 = vmatmul.mubr.msk.bf16.vlgmr.msra.gmra.mxu0 %vm274_vm2, %v1093_v30 }
 0x977   :  { %3401 = vmatprep.mubr.msk.bf16.mxu0 %vm3821_vm1, %v3820_v17 }
 0x97b   :  { %v3681_v31 = vpop.eup %3680 }
 0x97c   :  { %v940_v32 = vmul.f32 %v3681_v31, %v3677_v20 }
 0x97e   :  { %v943_v33 = vpack.c.bf16 %v940_v32, %v940_v32 }
 0x980   :  { %3372 = vmatmul.mubr.msk.bf16.vlgmr.msra.gmra.mxu1 %vm274_vm2, %v943_v33  ;;  %v146_v33 = vld [vmem:[%s3873_s29 + $0x18] sm:$0xff]  ;;  %s4600_s29 = sld [smem:[#allocation11_spill]] }
 0x981   :  { %3383 = vmatprep.mubr.msk.bf16.mxu1 %vm3821_vm1, %v3820_v17  ;;  %3382 = vmatpush3.bf16.msra.mxu1 %v1047_v40 }
 0x982   :  { %3393 = vmatprep.subr.bf16.mxu1 %v3820_v17 }
 0x9a8   :  { %v1035_v34 = vpop.f32.mrf.mxu0 }
 0x9aa   :  { %v3379_v35 = vpop.f32.mrf.mxu0 }
 0x9ac   :  { %v1038_v36 = vpop.f32.mrf.mxu0 }
 0x9ae   :  { %v3380_v37 = vpop.f32.mrf.mxu0 }
 0xa36   :  { %v1136_v41 = vpop.f32.mrf.mxu0 }
 0xa37   :  { %v1192_v43 = vmul.f32 0.35355338, %v1136_v41 }
 0xa38   :  { %v3391_v44 = vpop.f32.mrf.mxu0 }
 0xa39   :  { %v1194_v47 = vadd.f32 %v1192_v43, %v4043_v56 }
 0xa3a   :  { %v1139_v48 = vpop.f32.mrf.mxu0 }
 0xa3b   :  { %v1196_v50 = vsel %vm274_vm2, %v1194_v47, -inf  ;;  %v3131_v48 = vld [vmem:[%s3878_s3] ss:$0 sm:$0xff]  ;;  %s4601_s3 = sld [smem:[#allocation9_spill]] }
 0xa3c   :  { %1197 = vmax.xlane.f32.xlu0 %v1196_v50  ;;  %v3392_v51 = vpop.f32.mrf.mxu0 }
 0xa40   :  { %v987_v53 = vpop.f32.mrf.mxu1 }
 0xa41   :  { %v1041_v54 = vpack.c.bf16 %v1035_v34, %v987_v53  ;;  %v1317_v34 = vpack.c.bf16 %v146_v33, %v146_v33  ;;  %v168_v33 = vld [vmem:[%s3903_s30 + $0x68] sm:$0xff] }
 0xa42   :  { %v3373_v55 = vpop.f32.mrf.mxu1 }
 0xa43   :  { %3384 = vmatmul.mubr.msk.bf16.vlgmr.msra.gmra.mxu1 %vm274_vm2, %v1041_v54  ;;  %v1322_v35 = vsel %vm403_vm4, %v1317_v34, 0 }
 0xa44   :  { %3394 = vmatpush3.bf16.xpose.msra.mxu1 %v1150_v57  ;;  %v990_v58 = vpop.f32.mrf.mxu1  ;;  %3395 = vmatprep.mubr.msk.bf16.mxu1 %vm3821_vm1, %v3820_v17 }
 0xa45   :  { %3405 = vmatprep.subr.bf16.mxu1 %v3820_v17 }
 0xa46   :  { %v3374_v59 = vpop.f32.mrf.mxu1 }
 0xa4b   :  { %3396 = vmatmul.mubr.msk.bf16.vlgmr.msra.gmra.mxu1 %vm274_vm2, %v1143_v60 }
 0xa4c   :  { %3407 = vmatprep.mubr.msk.bf16.mxu1 %vm3821_vm1, %v3820_v17 }
 0xac5   :  { %v1198_v61 = vpop.xlane.xlu0 %1197 }
 0xac6   :  { %v1202_v62 = vsub.f32 %v1194_v47, %v1198_v61 }
 0xac8   :  { %v1204_v63 = vmul.f32 1.442695, %v1202_v62 }
 0xaca   :  { %3682 = vpow2.f32 %v1204_v63 }
 0xad7   :  { %v3683_v3 = vpop.eup %3682 }
 0xad8   :  { %v1208_v5 = vsel %vm274_vm2, %v3683_v3, 0.0 }
 0xad9   :  { %1209 = vadd.xlane.f32.xlu0 %v1208_v5 }
 0xb03   :  { %v1083_v7 = vpop.f32.mrf.mxu1 }
 0xb04   :  { %v4199_v8 = vadd.f32 %v1083_v7, %v811_v6 }
 0xb05   :  { %v3385_v9 = vpop.f32.mrf.mxu1 }
 0xb07   :  { %v1086_v11 = vpop.f32.mrf.mxu1 }
 0xb08   :  { %v4203_v12 = vadd.f32 %v1086_v11, %v814_v10  ;;  %v152_v11 = vld [vmem:[%s3893_s19 + $0x10] sm:$0xff] }
 0xb09   :  { %v3386_v13 = vpop.f32.mrf.mxu1 }
 0xb0a   :  { %v150_v13 = vld [vmem:[%s3893_s19] sm:$0xff] }
 0xb0b   :  { %v1186_v14 = vpop.f32.mrf.mxu1 }
 0xb0c   :  { %v1193_v15 = vmul.f32 0.35355338, %v1186_v14 }
 0xb0d   :  { %v3397_v16 = vpop.f32.mrf.mxu1 }
 0xb0e   :  { %v1195_v18 = vadd.f32 %v1193_v15, %v4043_v56  ;;  %v151_v15 = vld [vmem:[%s3893_s19 + $0x8] sm:$0xff] }
 0xb0f   :  { %v1189_v19 = vpop.f32.mrf.mxu1  ;;  %v1420_v16 = vpack.c.bf16 %v151_v15, %v150_v13 }
 0xb10   :  { %v1199_v20 = vsel %vm274_vm2, %v1195_v18, -inf }
 0xb11   :  { %1200 = vmax.xlane.f32.xlu1 %v1199_v20  ;;  %v3398_v45 = vpop.f32.mrf.mxu1 }
 0xb22   :  { %1268 = vrot.lane.b32.xlu1 %v4027_v46, %s3833_s15 }
 0xb62   :  { %v1210_v25 = vpop.xlane.xlu0 %1209 }
 0xb9a   :  { %v1201_v2 = vpop.xlane.xlu1 %1200 }
 0xb9b   :  { %v1203_v49 = vsub.f32 %v1195_v18, %v1201_v2 }
 0xb9d   :  { %v1206_v4 = vmul.f32 1.442695, %v1203_v49 }
 0xb9e   :  { %v1269_v21 = vpop.permute.xlu1 %1268 }
 0xb9f   :  { %3684 = vpow2.f32 %v1206_v4  ;;  %v1274_v22 = vsel %vm403_vm4, %v1269_v21, 0 }
 0xba0   :  { %3406 = vmatpush3.bf16.msra.mxu1 %v1274_v22  ;;  %3686 = vrcp.f32 %v1210_v25  ;;  %v3132_v22 = vld [vmem:[%s3883_s8] ss:$0 sm:$0xff]  ;;  %s4602_s8 = sld [smem:[#allocation10_spill]] }
 0xba1   :  { %3417 = vmatprep.subr.bf16.mxu1 %v3820_v17 }
 0xbac   :  { %v3685_v23 = vpop.eup %3684 }
 0xbad   :  { %v1211_v24 = vsel %vm274_vm2, %v3685_v23, 0.0  ;;  %v3687_v46 = vpop.eup %3686 }
 0xbae   :  { %1212 = vadd.xlane.f32.xlu0 %v1211_v24  ;;  %v1215_v27 = vmul.f32 %v3687_v46, %v3683_v3  ;;  %v3133_v46 = vld [vmem:[%s3888_s14] ss:$0 sm:$0xff]  ;;  %s4603_s14 = sld [smem:[#allocation12_spill]] }
 0xbb0   :  { %v1218_v30 = vpack.c.bf16 %v1215_v27, %v1215_v27 }
 0xbc4   :  { %1220 = vrot.lane.b32.xlu0 %v4023_v42, %s3833_s15 }
 0xc37   :  { %v1213_v26 = vpop.xlane.xlu0 %1212 }
 0xc38   :  { %3688 = vrcp.f32 %v1213_v26 }
 0xc3b   :  { %v1221_v28 = vpop.permute.xlu0 %1220 }
 0xc3c   :  { %v1226_v29 = vsel %vm403_vm4, %v1221_v28, 0 }
 0xc3d   :  { %3400 = vmatpush3.bf16.msra.mxu0 %v1226_v29 }
 0xc3e   :  { %3411 = vmatprep.subr.bf16.mxu0 %v3820_v17 }
 0xc40   :  { %3402 = vmatmul.mubr.msk.bf16.vlgmr.msra.gmra.mxu0 %vm274_vm2, %v1218_v30  ;;  %v169_v30 = vld [vmem:[%s3903_s30 + $0x70] sm:$0xff] }
 0xc41   :  { %3413 = vmatprep.mubr.msk.bf16.mxu0 %vm3821_vm1, %v3820_v17  ;;  %3412 = vmatpush3.bf16.msra.mxu0 %v1322_v35  ;;  %v165_v35 = vld [vmem:[%s3903_s30 + $0x50] sm:$0xff] }
 0xc42   :  { %3425 = vmatprep.subr.bf16.mxu0 %v3820_v17 }
 0xc45   :  { %v3689_v42 = vpop.eup %3688 }
 0xc46   :  { %v1217_v31 = vmul.f32 %v3689_v42, %v3685_v23  ;;  %v170_v42 = vld [vmem:[%s3903_s30 + $0x78] sm:$0xff] }
 0xc48   :  { %v1219_v32 = vpack.c.bf16 %v1217_v31, %v1217_v31  ;;  %v1496_v31 = vpack.c.bf16 %v170_v42, %v169_v30 }
 0xc4a   :  { %3408 = vmatmul.mubr.msk.bf16.vlgmr.msra.gmra.mxu1 %vm274_vm2, %v1219_v32  ;;  %v167_v32 = vld [vmem:[%s3903_s30 + $0x60] sm:$0xff] }
 0xc4b   :  { %3421 = vmatprep.mubr.msk.bf16.mxu1 %vm3821_vm1, %v3820_v17  ;;  %v1495_v34 = vpack.c.bf16 %v168_v33, %v167_v32  ;;  %v1550_v32 = vld [vmem:[%s4600_s29 + $0x10] sm:$0xff]  ;;  %v1551_v33 = vld [vmem:[%s4600_s29 + $0x18] sm:$0xff] }
 0xd00   :  { %v1262_v36 = vpop.f32.mrf.mxu0 }
 0xd02   :  { %v3403_v37 = vpop.f32.mrf.mxu0 }
 0xd04   :  { %v1265_v38 = vpop.f32.mrf.mxu0 }
 0xd05   :  { %v163_v38 = vld [vmem:[%s3903_s30 + $0x40] sm:$0xff] }
 0xd06   :  { %v3404_v39 = vpop.f32.mrf.mxu0 }
 0xd07   :  { %v164_v39 = vld [vmem:[%s3903_s30 + $0x48] sm:$0xff] }
 0xd0a   :  { %v1310_v40 = vpop.f32.mrf.mxu1 }
 0xd0b   :  { %v1316_v41 = vpack.c.bf16 %v1310_v40, %v1262_v36  ;;  %v166_v36 = vld [vmem:[%s3903_s30 + $0x58] sm:$0xff]  ;;  %v1493_v40 = vpack.c.bf16 %v164_v39, %v163_v38 }
 0xd0c   :  { %v3409_v43 = vpop.f32.mrf.mxu1  ;;  %v1494_v37 = vpack.c.bf16 %v166_v36, %v165_v35  ;;  %v1626_v35 = vpack.c.bf16 %v1551_v33, %v1550_v32  ;;  %v1549_v36 = vld [vmem:[%s4600_s29 + $0x8] sm:$0xff] }
 0xd0d   :  { %3414 = vmatmul.mubr.msk.bf16.vlgmr.msra.gmra.mxu0 %vm274_vm2, %v1316_v41  ;;  %v161_v41 = vld [vmem:[%s3903_s30 + $0x30] sm:$0xff]  ;;  %v162_v43 = vld [vmem:[%s3903_s30 + $0x38] sm:$0xff] }
 0xd0e   :  { %v1313_v44 = vpop.f32.mrf.mxu1  ;;  %3441 = vmatprep.mubr.msk.bf16.mxu0 %vm3821_vm1, %v3820_v17  ;;  %3426 = vmatpush3.bf16.msra.mxu0 %v1496_v31 }
 0xd0f   :  { %3427 = vmatprep.subr.bf16.mxu0 %v3820_v17  ;;  %v1492_v44 = vpack.c.bf16 %v162_v43, %v161_v41 }
 0xd10   :  { %v3410_v47 = vpop.f32.mrf.mxu1 }
 0xd11   :  { %v159_v47 = vld [vmem:[%s3903_s30 + $0x20] sm:$0xff] }
 0xd12   :  { %3428 = vmatpush3.bf16.msra.mxu0 %v1495_v34  ;;  %v1548_v34 = vld [vmem:[%s4600_s29] sm:$0xff] }
 0xd13   :  { %3429 = vmatprep.subr.bf16.mxu0 %v3820_v17 }
 0xd16   :  { %3430 = vmatpush3.bf16.msra.mxu0 %v1494_v37  ;;  %v1625_v37 = vpack.c.bf16 %v1549_v36, %v1548_v34 }
 0xd17   :  { %3431 = vmatprep.subr.bf16.mxu0 %v3820_v17 }
 0xd1a   :  { %3432 = vmatpush3.bf16.msra.mxu0 %v1493_v40 }
 0xd1b   :  { %3433 = vmatprep.subr.bf16.mxu0 %v3820_v17 }
 0xd1e   :  { %3434 = vmatpush3.bf16.msra.mxu0 %v1492_v44 }
 0xd1f   :  { %3435 = vmatprep.subr.bf16.mxu0 %v3820_v17 }
 0xdcd   :  { %v1358_v50 = vpop.f32.mrf.mxu0 }
 0xdce   :  { %v1365_v51 = vadd.f32 %v1358_v50, %v4199_v8 }
 0xdcf   :  { %v3415_v52 = vpop.f32.mrf.mxu0 }
 0xdd0   :  { %v1373_v53 = vadd.f32 %v3131_v48, %v1365_v51  ;;  %v157_v51 = vld [vmem:[%s3903_s30 + $0x10] sm:$0xff]  ;;  %v158_v52 = vld [vmem:[%s3903_s30 + $0x18] sm:$0xff] }
 0xdd1   :  { %v1361_v54 = vpop.f32.mrf.mxu0 }
 0xdd2   :  { %v4231_v55 = vadd.f32 %v1373_v53, %v3992_v0  ;;  %v1366_v57 = vadd.f32 %v1361_v54, %v4203_v12  ;;  %v153_v12 = vld [vmem:[%s3893_s19 + $0x18] sm:$0xff]  ;;  %v1490_v53 = vpack.c.bf16 %v158_v52, %v157_v51  ;;  %v155_v54 = vld [vmem:[%s3903_s30] sm:$0xff]  ;;  %s4604_s19 = sld [smem:[#allocation13_spill]] }
 0xdd3   :  { %v3416_v58 = vpop.f32.mrf.mxu0  ;;  %v1421_v14 = vpack.c.bf16 %v153_v12, %v152_v11 }
 0xdd4   :  { %v1374_v59 = vadd.f32 %v3131_v48, %v1366_v57  ;;  %v1377_v60 = vsel %vm172_vm0, %v4231_v55, 0.0  ;;  %v160_v48 = vld [vmem:[%s3903_s30 + $0x28] sm:$0xff] }
 0xdd5   :  { %1378 = vadd.xlane.f32.xlu1 %v1377_v60  ;;  %3418 = vmatpush3.bf16.msra.mxu1 %v1421_v14  ;;  %v1491_v50 = vpack.c.bf16 %v160_v48, %v159_v47  ;;  %v156_v57 = vld [vmem:[%s3903_s30 + $0x8] sm:$0xff]  ;;  %s4606_s30 = sld [smem:[#allocation17_spill]] }
 0xdd6   :  { %v4237_v61 = vadd.f32 %v1374_v59, %v3995_v1  ;;  %3419 = vmatprep.subr.bf16.mxu1 %v3820_v17  ;;  %v1489_v58 = vpack.c.bf16 %v156_v57, %v155_v54  ;;  %v3134_v59 = vld [vmem:[%s3898_s24] ss:$0 sm:$0xff]  ;;  %s4605_s24 = sld [smem:[#allocation14_spill]] }
 0xdd7   :  { %3436 = vmatpush3.bf16.msra.mxu0 %v1491_v50  ;;  %v3139_v50 = vld [vmem:[%s4601_s3] ss:$0 sm:$0xff] }
 0xdd8   :  { %v1380_v62 = vsel %vm172_vm0, %v4237_v61, 0.0  ;;  %3437 = vmatprep.subr.bf16.mxu0 %v3820_v17  ;;  %v3140_v54 = vld [vmem:[%s4602_s8] ss:$0 sm:$0xff] }
 0xdd9   :  { %1381 = vadd.xlane.f32.xlu0 %v1380_v62  ;;  %3420 = vmatpush3.bf16.msra.mxu1 %v1420_v16 }
 0xdda   :  { %3445 = vmatprep.subr.bf16.mxu1 %v3820_v17 }
 0xddb   :  { %3438 = vmatpush3.bf16.msra.mxu0 %v1490_v53 }
 0xddc   :  { %3439 = vmatprep.subr.bf16.mxu0 %v3820_v17 }
 0xddf   :  { %3440 = vmatpush3.bf16.msra.mxu0 %v1489_v58 }
 0xde0   :  { %3471 = vmatprep.subr.bf16.mxu0 %v3820_v17 }
 0xe5e   :  { %v1379_v0 = vpop.xlane.xlu1 %1378 }
 0xe5f   :  { %v1383_v63 = vmul.f32 0.03125, %v1379_v0 }
 0xe61   :  { %v1385_v3 = vsub.f32 %v4231_v55, %v1383_v63 }
 0xe62   :  { %v1382_v5 = vpop.xlane.xlu0 %1381 }
 0xe63   :  { %v1384_v6 = vmul.f32 0.03125, %v1382_v5  ;;  %v1387_v7 = vmul.f32 %v1385_v3, %v1385_v3 }
 0xe65   :  { %v1386_v8 = vsub.f32 %v4237_v61, %v1384_v6  ;;  %v1389_v9 = vsel %vm172_vm0, %v1387_v7, 0.0 }
 0xe66   :  { %1390 = vadd.xlane.f32.xlu0 %v1389_v9 }
 0xe67   :  { %v1388_v1 = vmul.f32 %v1386_v8, %v1386_v8 }
 0xe69   :  { %v1392_v10 = vsel %vm172_vm0, %v1388_v1, 0.0 }
 0xe6a   :  { %1393 = vadd.xlane.f32.xlu1 %v1392_v10 }
 0xeef   :  { %v1391_v18 = vpop.xlane.xlu0 %1390 }
 0xef0   :  { %v1395_v19 = vmul.f32 0.03125, %v1391_v18 }
 0xef2   :  { %v1397_v20 = vadd.f32 1e-05, %v1395_v19  ;;  %v3138_v19 = vld [vmem:[%s3908_s6] ss:$0 sm:$0xff]  ;;  %s4607_s6 = sld [smem:[#allocation15_spill]] }
 0xef3   :  { %v1394_v45 = vpop.xlane.xlu1 %1393 }
 0xef4   :  { %3690 = vrsqrt.f32 %v1397_v20  ;;  %v1396_v2 = vmul.f32 0.03125, %v1394_v45 }
 0xef6   :  { %v1398_v49 = vadd.f32 1e-05, %v1396_v2 }
 0xef8   :  { %3692 = vrsqrt.f32 %v1398_v49 }
 0xf01   :  { %v3691_v4 = vpop.eup %3690 }
 0xf02   :  { %v1401_v21 = vmul.f32 %v3691_v4, %v1385_v3 }
 0xf04   :  { %v1409_v25 = vmul.f32 %v3132_v22, %v1401_v21 }
 0xf05   :  { %v3693_v23 = vpop.eup %3692 }
 0xf06   :  { %v1402_v24 = vmul.f32 %v3693_v23, %v1386_v8  ;;  %v1417_v27 = vadd.f32 %v3133_v46, %v1409_v25 }
 0xf08   :  { %v1410_v26 = vmul.f32 %v3132_v22, %v1402_v24 }
 0xf0a   :  { %v1418_v28 = vadd.f32 %v3133_v46, %v1410_v26 }
 0xf0c   :  { %v1419_v29 = vpack.c.bf16 %v1418_v28, %v1417_v27 }
 0xf0e   :  { %3422 = vmatmul.mubr.msk.bf16.vlgmr.msra.gmra.mxu1 %vm172_vm0, %v1419_v29 }
 0xf0f   :  { %3449 = vmatprep.mubr.msk.bf16.mxu1 %vm3821_vm1, %v3820_v17  ;;  %3446 = vmatpush3.bf16.msra.mxu1 %v1626_v35 }
 0xf10   :  { %3447 = vmatprep.subr.bf16.mxu1 %v3820_v17 }
 0xf13   :  { %3448 = vmatpush3.bf16.msra.mxu1 %v1625_v37 }
 0xf14   :  { %3453 = vmatprep.subr.bf16.mxu1 %v3820_v17 }
 0xfce   :  { %v1465_v60 = vpop.f32.mrf.mxu1 }
 0xfcf   :  { %v1466_v62 = vadd.f32 %v3134_v59, %v1465_v60 }
 0xfd0   :  { %v3423_v0 = vpop.f32.mrf.mxu1 }
 0xfd1   :  { %v3136_v63 = vmul.f32 -1.702, %v1466_v62 }
 0xfd2   :  { %v1468_v3 = vpop.f32.mrf.mxu1 }
 0xfd3   :  { %v1476_v5 = vmul.f32 1.442695, %v3136_v63  ;;  %v1469_v6 = vadd.f32 %v3134_v59, %v1468_v3 }
 0xfd4   :  { %v3424_v7 = vpop.f32.mrf.mxu1 }
 0xfd5   :  { %3694 = vpow2.f32 %v1476_v5  ;;  %v3137_v8 = vmul.f32 -1.702, %v1469_v6 }
 0xfd7   :  { %v1478_v9 = vmul.f32 1.442695, %v3137_v8 }
 0xfd9   :  { %3696 = vpow2.f32 %v1478_v9 }
 0xfe2   :  { %v3695_v1 = vpop.eup %3694 }
 0xfe3   :  { %v1480_v10 = vadd.f32 1.0, %v3695_v1 }
 0xfe5   :  { %3698 = vrcp.f32 %v1480_v10 }
 0xfe6   :  { %v3697_v11 = vpop.eup %3696 }
 0xfe7   :  { %v1481_v12 = vadd.f32 1.0, %v3697_v11 }
 0xfe9   :  { %3700 = vrcp.f32 %v1481_v12 }
 0xff2   :  { %v3699_v13 = vpop.eup %3698 }
 0xff3   :  { %v1486_v15 = vmul.f32 %v3699_v13, %v1466_v62  ;;  %v3141_v62 = vld [vmem:[%s4603_s14] ss:$0 sm:$0xff] }
 0xff6   :  { %v3701_v14 = vpop.eup %3700 }
 0xff7   :  { %v1487_v16 = vmul.f32 %v3701_v14, %v1469_v6 }
 0xff9   :  { %v1488_v18 = vpack.c.bf16 %v1487_v16, %v1486_v15 }
 0xffb   :  { %3442 = vmatmul.mubr.bf16.vlgmr.msra.gmra.mxu0 %v1488_v18 }
 0xffc   :  { %3473 = vmatprep.mubr.msk.bf16.mxu0 %vm3821_vm1, %v3820_v17 }
0x10bb   :  { %v1537_v20 = vpop.f32.mrf.mxu0 }
0x10bc   :  { %v1538_v45 = vadd.f32 %v3138_v19, %v1537_v20 }
0x10bd   :  { %v3443_v2 = vpop.f32.mrf.mxu0 }
0x10be   :  { %v4285_v49 = vadd.f32 %v1538_v45, %v4231_v55 }
0x10bf   :  { %v1540_v4 = vpop.f32.mrf.mxu0 }
0x10c0   :  { %v1541_v21 = vadd.f32 %v3138_v19, %v1540_v4  ;;  %v1582_v22 = vsel %vm172_vm0, %v4285_v49, 0.0 }
0x10c1   :  { %1583 = vadd.xlane.f32.xlu0 %v1582_v22  ;;  %v3444_v23 = vpop.f32.mrf.mxu0 }
0x10c2   :  { %v4290_v24 = vadd.f32 %v1541_v21, %v4237_v61 }
0x10c4   :  { %v1585_v25 = vsel %vm172_vm0, %v4290_v24, 0.0 }
0x10c5   :  { %1586 = vadd.xlane.f32.xlu1 %v1585_v25 }
0x114a   :  { %v1584_v46 = vpop.xlane.xlu0 %1583 }
0x114b   :  { %v1588_v55 = vmul.f32 0.03125, %v1584_v46 }
0x114d   :  { %v1590_v26 = vsub.f32 %v4285_v49, %v1588_v55 }
0x114e   :  { %v1587_v27 = vpop.xlane.xlu1 %1586 }
0x114f   :  { %v1589_v28 = vmul.f32 0.03125, %v1587_v27  ;;  %v1592_v29 = vmul.f32 %v1590_v26, %v1590_v26 }
0x1151   :  { %v1591_v30 = vsub.f32 %v4290_v24, %v1589_v28  ;;  %v1594_v42 = vsel %vm172_vm0, %v1592_v29, 0.0 }
0x1152   :  { %1595 = vadd.xlane.f32.xlu0 %v1594_v42 }
0x1153   :  { %v1593_v61 = vmul.f32 %v1591_v30, %v1591_v30 }
0x1155   :  { %v1597_v31 = vsel %vm172_vm0, %v1593_v61, 0.0 }
0x1156   :  { %1598 = vadd.xlane.f32.xlu1 %v1597_v31 }
0x11db   :  { %v1596_v38 = vpop.xlane.xlu0 %1595 }
0x11dc   :  { %v1600_v39 = vmul.f32 0.03125, %v1596_v38 }
0x11de   :  { %v1602_v40 = vadd.f32 1e-05, %v1600_v39 }
0x11df   :  { %v1599_v41 = vpop.xlane.xlu1 %1598 }
0x11e0   :  { %3702 = vrsqrt.f32 %v1602_v40  ;;  %v1601_v43 = vmul.f32 0.03125, %v1599_v41 }
0x11e2   :  { %v1603_v44 = vadd.f32 1e-05, %v1601_v43 }
0x11e4   :  { %3704 = vrsqrt.f32 %v1603_v44 }
0x11ed   :  { %v3703_v47 = vpop.eup %3702 }
0x11ee   :  { %v1606_v48 = vmul.f32 %v3703_v47, %v1590_v26 }
0x11f0   :  { %v1614_v53 = vmul.f32 %v3139_v50, %v1606_v48 }
0x11f1   :  { %v3705_v51 = vpop.eup %3704 }
0x11f2   :  { %v1607_v52 = vmul.f32 %v3705_v51, %v1591_v30  ;;  %v1622_v58 = vadd.f32 %v3140_v54, %v1614_v53 }
0x11f4   :  { %v1615_v57 = vmul.f32 %v3139_v50, %v1607_v52 }
0x11f6   :  { %v1623_v59 = vadd.f32 %v3140_v54, %v1615_v57 }
0x11f8   :  { %v1624_v60 = vpack.c.bf16 %v1623_v59, %v1622_v58 }
0x11fa   :  { %3450 = vmatmul.mubr.msk.bf16.vlgmr.msra.gmra.mxu1 %vm172_vm0, %v1624_v60 }
0x11fb   :  { %3455 = vmatprep.mubr.msk.bf16.mxu1 %vm3821_vm1, %v3820_v17 }
0x12ba   :  { %v1670_v0 = vpop.f32.mrf.mxu1 }
0x12bb   :  { %v1671_v63 = vadd.f32 %v3141_v62, %v1670_v0 }
0x12bc   :  { %v3451_v3 = vpop.f32.mrf.mxu1 }
0x12bd   :  { %v4310_v5 = vpack.c.bf16 %v1671_v63, %v1671_v63 }
0x12be   :  { %v1673_v6 = vpop.f32.mrf.mxu1 }
0x12bf   :  { %v1674_v7 = vadd.f32 %v3141_v62, %v1673_v6  ;;  %1680 = vrot.lane.b32.xlu0 %v4310_v5, %s3822_s0 }
0x12c0   :  { %v3452_v8 = vpop.f32.mrf.mxu1 }
0x12c1   :  { %v4314_v9 = vpack.c.bf16 %v1674_v7, %v1674_v7 }
0x12c3   :  { %1729 = vrot.lane.b32.xlu1 %v4314_v9, %s3822_s0 }
0x1331   :  { %v1681_v1 = vpop.permute.xlu0 %1680 }
0x1332   :  { %v1686_v10 = vsel %vm274_vm2, %v1681_v1, 0 }
0x1333   :  { %3454 = vmatpush3.bf16.xpose.msra.mxu1 %v1686_v10 }
0x1334   :  { %3459 = vmatprep.subr.bf16.mxu1 %v3820_v17 }
0x1335   :  { %v1730_v11 = vpop.permute.xlu1 %1729 }
0x1336   :  { %v1735_v12 = vsel %vm274_vm2, %v1730_v11, 0 }
0x133a   :  { %3456 = vmatmul.mubr.msk.bf16.vlgmr.msra.gmra.mxu1 %vm274_vm2, %v4310_v5 }
0x133b   :  { %3460 = vmatpush3.bf16.xpose.msra.mxu1 %v1735_v12  ;;  %3461 = vmatprep.mubr.msk.bf16.mxu1 %vm3821_vm1, %v3820_v17 }
0x133c   :  { %3465 = vmatprep.subr.bf16.mxu1 %v3820_v17 }
0x1342   :  { %3462 = vmatmul.mubr.msk.bf16.vlgmr.msra.gmra.mxu1 %vm274_vm2, %v4314_v9 }
0x1343   :  { %3467 = vmatprep.mubr.msk.bf16.mxu1 %vm3821_vm1, %v3820_v17 }
0x13fa   :  { %v1722_v13 = vpop.f32.mrf.mxu1 }
0x13fb   :  { %v1777_v14 = vmul.f32 0.35355338, %v1722_v13 }
0x13fc   :  { %v3457_v15 = vpop.f32.mrf.mxu1 }
0x13fd   :  { %v1779_v16 = vadd.f32 %v1777_v14, %v4043_v56 }
0x13fe   :  { %v1725_v18 = vpop.f32.mrf.mxu1 }
0x13ff   :  { %v1781_v19 = vsel %vm274_vm2, %v1779_v16, -inf }
0x1400   :  { %1782 = vmax.xlane.f32.xlu1 %v1781_v19  ;;  %v3458_v20 = vpop.f32.mrf.mxu1 }
0x1402   :  { %v1771_v45 = vpop.f32.mrf.mxu1 }
0x1403   :  { %v1778_v2 = vmul.f32 0.35355338, %v1771_v45 }
0x1404   :  { %v3463_v4 = vpop.f32.mrf.mxu1 }
0x1405   :  { %v1780_v21 = vadd.f32 %v1778_v2, %v4043_v56 }
0x1406   :  { %v1774_v22 = vpop.f32.mrf.mxu1 }
0x1407   :  { %v1784_v23 = vsel %vm274_vm2, %v1780_v21, -inf }
0x1408   :  { %1785 = vmax.xlane.f32.xlu0 %v1784_v23  ;;  %v3464_v25 = vpop.f32.mrf.mxu1 }
0x1411   :  { %1853 = vrot.lane.b32.xlu1 %v4314_v9, %s3824_s9 }
0x1415   :  { %1905 = vrot.lane.b32.xlu1 %v4310_v5, %s3825_s13 }
0x1489   :  { %v1783_v46 = vpop.xlane.xlu1 %1782 }
0x148a   :  { %v1787_v55 = vsub.f32 %v1779_v16, %v1783_v46 }
0x148c   :  { %v1789_v26 = vmul.f32 1.442695, %v1787_v55 }
0x148d   :  { %v1854_v27 = vpop.permute.xlu1 %1853 }
0x148e   :  { %3706 = vpow2.f32 %v1789_v26  ;;  %v1859_v28 = vsel %vm403_vm4, %v1854_v27, 0 }
0x148f   :  { %3472 = vmatpush3.bf16.msra.mxu0 %v1859_v28 }
0x1490   :  { %3483 = vmatprep.subr.bf16.mxu0 %v3820_v17 }
0x1491   :  { %v1786_v29 = vpop.xlane.xlu0 %1785  ;;  %v1906_v35 = vpop.permute.xlu1 %1905 }
0x1492   :  { %v1788_v30 = vsub.f32 %v1780_v21, %v1786_v29  ;;  %v1911_v43 = vsel %vm274_vm2, %v1906_v35, 0 }
0x1494   :  { %v1791_v42 = vmul.f32 1.442695, %v1788_v30 }
0x1496   :  { %3708 = vpow2.f32 %v1791_v42 }
0x149b   :  { %v3707_v61 = vpop.eup %3706 }
0x149c   :  { %v1793_v31 = vsel %vm274_vm2, %v3707_v61, 0.0 }
0x149d   :  { %1794 = vadd.xlane.f32.xlu0 %v1793_v31 }
0x14a3   :  { %v3709_v32 = vpop.eup %3708 }
0x14a4   :  { %v1796_v33 = vsel %vm274_vm2, %v3709_v32, 0.0 }
0x14a5   :  { %1797 = vadd.xlane.f32.xlu1 %v1796_v33 }
0x14b3   :  { %1805 = vrot.lane.b32.xlu0 %v4310_v5, %s3824_s9 }
0x14b6   :  { %1955 = vrot.lane.b32.xlu1 %v4314_v9, %s3825_s13 }
0x14b7   :  { %1903 = vrot.lane.b32.xlu0 %v4310_v5, %s3826_s17 }
0x14ba   :  { %1953 = vrot.lane.b32.xlu1 %v4314_v9, %s3826_s17 }
0x1526   :  { %v1795_v34 = vpop.xlane.xlu0 %1794 }
0x1527   :  { %3710 = vrcp.f32 %v1795_v34  ;;  %v1553_v34 = vld [vmem:[%s4604_s19] sm:$0xff] }
0x1528   :  { %v1902_v35 = vpack.c.bf16 %v1553_v34, %v1553_v34 }
0x152a   :  { %v1806_v36 = vpop.permute.xlu0 %1805 }
0x152b   :  { %v1811_v37 = vsel %vm403_vm4, %v1806_v36, 0 }
0x152c   :  { %3466 = vmatpush3.bf16.msra.mxu1 %v1811_v37 }
0x152d   :  { %3477 = vmatprep.subr.bf16.mxu1 %v3820_v17 }
0x152e   :  { %v1798_v38 = vpop.xlane.xlu1 %1797  ;;  %v1904_v51 = vpop.permute.xlu0 %1903 }
0x152f   :  { %3712 = vrcp.f32 %v1798_v38 }
0x1532   :  { %v1956_v48 = vpop.permute.xlu1 %1955 }
0x1533   :  { %v1961_v52 = vsel %vm274_vm2, %v1956_v48, 0 }
0x1534   :  { %v3711_v39 = vpop.eup %3710 }
0x1535   :  { %v1800_v40 = vmul.f32 %v3711_v39, %v3707_v61  ;;  %v2180_v39 = vsel %vm403_vm4, %v1902_v35, 0 }
0x1536   :  { %v1954_v53 = vpop.permute.xlu1 %1953 }
0x1537   :  { %v1803_v41 = vpack.c.bf16 %v1800_v40, %v1800_v40 }
0x1539   :  { %3468 = vmatmul.mubr.msk.bf16.vlgmr.msra.gmra.mxu1 %vm274_vm2, %v1803_v41 }
0x153a   :  { %3478 = vmatpush3.bf16.xpose.msra.mxu1 %v1911_v43  ;;  %3479 = vmatprep.mubr.msk.bf16.mxu1 %vm3821_vm1, %v3820_v17 }
0x153b   :  { %3489 = vmatprep.subr.bf16.mxu1 %v3820_v17 }
0x153c   :  { %v3713_v44 = vpop.eup %3712 }
0x153d   :  { %v1802_v47 = vmul.f32 %v3713_v44, %v3709_v32 }
0x153f   :  { %v1804_v50 = vpack.c.bf16 %v1802_v47, %v1802_v47  ;;  %v1554_v47 = vld [vmem:[%s4604_s19 + $0x8] sm:$0xff] }
0x1540   :  { %v2128_v48 = vpack.c.bf16 %v1554_v47, %v1554_v47 }
0x1541   :  { %3474 = vmatmul.mubr.msk.bf16.vlgmr.msra.gmra.mxu0 %vm274_vm2, %v1804_v50  ;;  %3480 = vmatmul.mubr.msk.bf16.vlgmr.msra.gmra.mxu1 %vm274_vm2, %v1904_v51 }
0x1542   :  { %3484 = vmatpush3.bf16.xpose.msra.mxu0 %v1961_v52  ;;  %3485 = vmatprep.mubr.msk.bf16.mxu0 %vm3821_vm1, %v3820_v17  ;;  %v2133_v50 = vsel %vm403_vm4, %v2128_v48, 0 }
0x1543   :  { %3495 = vmatprep.subr.bf16.mxu0 %v3820_v17  ;;  %3491 = vmatprep.mubr.msk.bf16.mxu1 %vm3821_vm1, %v3820_v17 }
0x1549   :  { %3486 = vmatmul.mubr.msk.bf16.vlgmr.msra.gmra.mxu0 %vm274_vm2, %v1954_v53 }
0x154a   :  { %3497 = vmatprep.mubr.msk.bf16.mxu0 %vm3821_vm1, %v3820_v17 }
0x15f9   :  { %v4368_v54 = vpop.f32.mrf.mxu1 }
0x15fb   :  { %v3469_v57 = vpop.f32.mrf.mxu1 }
0x15fd   :  { %v1850_v58 = vpop.f32.mrf.mxu1 }
0x15ff   :  { %v3470_v59 = vpop.f32.mrf.mxu1 }
0x1601   :  { %v4370_v60 = vpop.f32.mrf.mxu0  ;;  %v1947_v62 = vpop.f32.mrf.mxu1 }
0x1602   :  { %v1901_v0 = vpack.c.bf16 %v4370_v60, %v4368_v54  ;;  %v2003_v63 = vmul.f32 0.35355338, %v1947_v62 }
0x1603   :  { %v3475_v3 = vpop.f32.mrf.mxu0  ;;  %v3481_v6 = vpop.f32.mrf.mxu1 }
0x1604   :  { %v2005_v7 = vadd.f32 %v2003_v63, %v4043_v56 }
0x1605   :  { %v1898_v8 = vpop.f32.mrf.mxu0  ;;  %v1950_v1 = vpop.f32.mrf.mxu1 }
0x1606   :  { %v2007_v10 = vsel %vm274_vm2, %v2005_v7, -inf }
0x1607   :  { %2008 = vmax.xlane.f32.xlu0 %v2007_v10  ;;  %v3476_v11 = vpop.f32.mrf.mxu0  ;;  %v3482_v12 = vpop.f32.mrf.mxu1 }
0x1609   :  { %v1997_v13 = vpop.f32.mrf.mxu0 }
0x160a   :  { %v2004_v14 = vmul.f32 0.35355338, %v1997_v13 }
0x160b   :  { %v3487_v15 = vpop.f32.mrf.mxu0 }
0x160c   :  { %v2006_v16 = vadd.f32 %v2004_v14, %v4043_v56 }
0x160d   :  { %v2000_v18 = vpop.f32.mrf.mxu0 }
0x160e   :  { %v2010_v19 = vsel %vm274_vm2, %v2006_v16, -inf }
0x160f   :  { %2011 = vmax.xlane.f32.xlu1 %v2010_v19  ;;  %v3488_v20 = vpop.f32.mrf.mxu0 }
0x1620   :  { %2079 = vrot.lane.b32.xlu1 %v4314_v9, %s3827_s21 }
0x1624   :  { %2225 = vrot.lane.b32.xlu1 %v4310_v5, %s3828_s25 }
0x1628   :  { %2275 = vrot.lane.b32.xlu1 %v4314_v9, %s3828_s25 }
0x162c   :  { %2273 = vrot.lane.b32.xlu1 %v4314_v9, %s3829_s27 }
0x1690   :  { %v2009_v45 = vpop.xlane.xlu0 %2008 }
0x1691   :  { %v2013_v2 = vsub.f32 %v2005_v7, %v2009_v45 }
0x1693   :  { %v2015_v4 = vmul.f32 1.442695, %v2013_v2 }
0x1695   :  { %3714 = vpow2.f32 %v2015_v4 }
0x1698   :  { %v2012_v21 = vpop.xlane.xlu1 %2011 }
0x1699   :  { %v2014_v22 = vsub.f32 %v2006_v16, %v2012_v21 }
0x169b   :  { %v2017_v23 = vmul.f32 1.442695, %v2014_v22 }
0x169c   :  { %v2080_v25 = vpop.permute.xlu1 %2079 }
0x169d   :  { %3716 = vpow2.f32 %v2017_v23  ;;  %v2085_v46 = vsel %vm403_vm4, %v2080_v25, 0 }
0x169e   :  { %3496 = vmatpush3.bf16.msra.mxu0 %v2085_v46 }
0x169f   :  { %3507 = vmatprep.subr.bf16.mxu0 %v3820_v17 }
0x16a0   :  { %v2226_v40 = vpop.permute.xlu1 %2225 }
0x16a1   :  { %v2231_v60 = vsel %vm274_vm2, %v2226_v40, 0 }
0x16a2   :  { %v3715_v55 = vpop.eup %3714 }
0x16a3   :  { %v2019_v26 = vsel %vm274_vm2, %v3715_v55, 0.0 }
0x16a4   :  { %2020 = vadd.xlane.f32.xlu0 %v2019_v26  ;;  %v2276_v41 = vpop.permute.xlu1 %2275 }
0x16a5   :  { %v2281_v43 = vsel %vm274_vm2, %v2276_v41, 0 }
0x16a8   :  { %v2274_v44 = vpop.permute.xlu1 %2273 }
0x16aa   :  { %v3717_v27 = vpop.eup %3716 }
0x16ab   :  { %v2022_v28 = vsel %vm274_vm2, %v3717_v27, 0.0 }
0x16ac   :  { %2023 = vadd.xlane.f32.xlu0 %v2022_v28 }
0x16c2   :  { %2031 = vrot.lane.b32.xlu0 %v4310_v5, %s3827_s21 }
0x16c6   :  { %2223 = vrot.lane.b32.xlu0 %v4310_v5, %s3829_s27 }
0x172d   :  { %v2021_v29 = vpop.xlane.xlu0 %2020 }
0x172e   :  { %3718 = vrcp.f32 %v2021_v29 }
0x1735   :  { %v2024_v30 = vpop.xlane.xlu0 %2023 }
0x1736   :  { %3720 = vrcp.f32 %v2024_v30 }
0x1739   :  { %v2032_v42 = vpop.permute.xlu0 %2031 }
0x173a   :  { %v2037_v61 = vsel %vm403_vm4, %v2032_v42, 0 }
0x173b   :  { %v3719_v31 = vpop.eup %3718  ;;  %3490 = vmatpush3.bf16.msra.mxu1 %v2037_v61 }
0x173c   :  { %v2026_v32 = vmul.f32 %v3719_v31, %v3715_v55  ;;  %3501 = vmatprep.subr.bf16.mxu1 %v3820_v17 }
0x173d   :  { %v2224_v3 = vpop.permute.xlu0 %2223 }
0x173e   :  { %v2029_v33 = vpack.c.bf16 %v2026_v32, %v2026_v32 }
0x1740   :  { %3492 = vmatmul.mubr.msk.bf16.vlgmr.msra.gmra.mxu1 %vm274_vm2, %v2029_v33 }
0x1741   :  { %3503 = vmatprep.mubr.msk.bf16.mxu1 %vm3821_vm1, %v3820_v17  ;;  %3502 = vmatpush3.bf16.msra.mxu1 %v2133_v50 }
0x1742   :  { %3513 = vmatprep.subr.bf16.mxu1 %v3820_v17 }
0x1743   :  { %v3721_v36 = vpop.eup %3720 }
0x1744   :  { %v2028_v37 = vmul.f32 %v3721_v36, %v3717_v27 }
0x1746   :  { %v2030_v38 = vpack.c.bf16 %v2028_v37, %v2028_v37 }
0x1748   :  { %3498 = vmatmul.mubr.msk.bf16.vlgmr.msra.gmra.mxu0 %vm274_vm2, %v2030_v38 }
0x1749   :  { %3508 = vmatpush3.bf16.msra.mxu0 %v2180_v39  ;;  %3509 = vmatprep.mubr.msk.bf16.mxu0 %vm3821_vm1, %v3820_v17 }
0x174a   :  { %3519 = vmatprep.subr.bf16.mxu0 %v3820_v17 }
0x1750   :  { %3510 = vmatmul.mubr.msk.bf16.vlgmr.msra.gmra.mxu0 %vm274_vm2, %v1901_v0 }
0x1751   :  { %3520 = vmatpush3.bf16.xpose.msra.mxu0 %v2281_v43  ;;  %3521 = vmatprep.mubr.msk.bf16.mxu0 %vm3821_vm1, %v3820_v17 }
0x1752   :  { %3531 = vmatprep.subr.bf16.mxu0 %v3820_v17 }
0x1758   :  { %3522 = vmatmul.mubr.msk.bf16.vlgmr.msra.gmra.mxu0 %vm274_vm2, %v2274_v44 }
0x1759   :  { %3533 = vmatprep.mubr.msk.bf16.mxu0 %vm3821_vm1, %v3820_v17 }
0x1800   :  { %v2073_v51 = vpop.f32.mrf.mxu1 }
0x1802   :  { %v3493_v52 = vpop.f32.mrf.mxu1 }
0x1804   :  { %v2076_v53 = vpop.f32.mrf.mxu1 }
0x1806   :  { %v3494_v54 = vpop.f32.mrf.mxu1 }
0x1808   :  { %v2121_v57 = vpop.f32.mrf.mxu0 }
0x1809   :  { %v2127_v58 = vpack.c.bf16 %v2121_v57, %v2073_v51  ;;  %v1555_v57 = vld [vmem:[%s4604_s19 + $0x10] sm:$0xff] }
0x180a   :  { %v3499_v59 = vpop.f32.mrf.mxu0 }
0x180b   :  { %3504 = vmatmul.mubr.msk.bf16.vlgmr.msra.gmra.mxu1 %vm274_vm2, %v2127_v58  ;;  %v2448_v58 = vpack.c.bf16 %v1555_v57, %v1555_v57 }
0x180c   :  { %3514 = vmatpush3.bf16.xpose.msra.mxu1 %v2231_v60  ;;  %v2124_v62 = vpop.f32.mrf.mxu0  ;;  %3515 = vmatprep.mubr.msk.bf16.mxu1 %vm3821_vm1, %v3820_v17 }
0x180d   :  { %3525 = vmatprep.subr.bf16.mxu1 %v3820_v17  ;;  %v2453_v59 = vsel %vm403_vm4, %v2448_v58, 0 }
0x180e   :  { %v3500_v0 = vpop.f32.mrf.mxu0 }
0x1810   :  { %v4424_v63 = vpop.f32.mrf.mxu0 }
0x1812   :  { %v3511_v6 = vpop.f32.mrf.mxu0 }
0x1813   :  { %3516 = vmatmul.mubr.msk.bf16.vlgmr.msra.gmra.mxu1 %vm274_vm2, %v2224_v3 }
0x1814   :  { %v4427_v7 = vpop.f32.mrf.mxu0  ;;  %3527 = vmatprep.mubr.msk.bf16.mxu1 %vm3821_vm1, %v3820_v17 }
0x1816   :  { %v3512_v8 = vpop.f32.mrf.mxu0 }
0x1818   :  { %v2317_v1 = vpop.f32.mrf.mxu0 }
0x1819   :  { %v2324_v10 = vmul.f32 0.35355338, %v2317_v1 }
0x181a   :  { %v3523_v11 = vpop.f32.mrf.mxu0 }
0x181b   :  { %v2326_v12 = vadd.f32 %v2324_v10, %v4043_v56 }
0x181c   :  { %v2320_v13 = vpop.f32.mrf.mxu0 }
0x181d   :  { %v2330_v14 = vsel %vm274_vm2, %v2326_v12, -inf }
0x181e   :  { %2331 = vmax.xlane.f32.xlu1 %v2330_v14  ;;  %v3524_v15 = vpop.f32.mrf.mxu0 }
0x182f   :  { %2399 = vrot.lane.b32.xlu1 %v4314_v9, %s3830_s10 }
0x1833   :  { %2500 = vrot.lane.b32.xlu1 %v4310_v5, %s3831_s11 }
0x1837   :  { %2550 = vrot.lane.b32.xlu1 %v4314_v9, %s3831_s11 }
0x183b   :  { %2548 = vrot.lane.b32.xlu1 %v4314_v9, %s3832_s20 }
0x18a7   :  { %v2332_v16 = vpop.xlane.xlu1 %2331 }
0x18a8   :  { %v2334_v20 = vsub.f32 %v2326_v12, %v2332_v16 }
0x18aa   :  { %v2337_v45 = vmul.f32 1.442695, %v2334_v20 }
0x18ab   :  { %v2400_v18 = vpop.permute.xlu1 %2399 }
0x18ac   :  { %v2405_v19 = vsel %vm403_vm4, %v2400_v18, 0  ;;  %3722 = vpow2.f32 %v2337_v45 }
0x18ad   :  { %3532 = vmatpush3.bf16.msra.mxu0 %v2405_v19 }
0x18ae   :  { %3543 = vmatprep.subr.bf16.mxu0 %v3820_v17 }
0x18af   :  { %v2501_v37 = vpop.permute.xlu1 %2500 }
0x18b0   :  { %v2506_v39 = vsel %vm274_vm2, %v2501_v37, 0 }
0x18b3   :  { %v2551_v10 = vpop.permute.xlu1 %2550 }
0x18b4   :  { %v2556_v14 = vsel %vm274_vm2, %v2551_v10, 0 }
0x18b7   :  { %v2549_v18 = vpop.permute.xlu1 %2548 }
0x18b9   :  { %v3723_v28 = vpop.eup %3722 }
0x18ba   :  { %v2342_v30 = vsel %vm274_vm2, %v3723_v28, 0.0 }
0x18cb   :  { %v4443_v2 = vpop.f32.mrf.mxu1 }
0x18cd   :  { %v3505_v4 = vpop.f32.mrf.mxu1 }
0x18cf   :  { %v4445_v21 = vpop.f32.mrf.mxu1 }
0x18d1   :  { %v3506_v22 = vpop.f32.mrf.mxu1 }
0x18d3   :  { %v2267_v23 = vpop.f32.mrf.mxu1 }
0x18d4   :  { %v2323_v25 = vmul.f32 0.35355338, %v2267_v23  ;;  %v2217_v23 = vadd.f32 %v4424_v63, %v4443_v2 }
0x18d5   :  { %v3517_v46 = vpop.f32.mrf.mxu1 }
0x18d6   :  { %v2325_v55 = vadd.f32 %v2323_v25, %v4043_v56 }
0x18d7   :  { %v2270_v26 = vpop.f32.mrf.mxu1 }
0x18d8   :  { %v2327_v27 = vsel %vm274_vm2, %v2325_v55, -inf  ;;  %v2220_v26 = vadd.f32 %v4427_v7, %v4445_v21 }
0x18d9   :  { %2328 = vmax.xlane.f32.xlu0 %v2327_v27  ;;  %v3518_v29 = vpop.f32.mrf.mxu1 }
0x18dd   :  { %2343 = vadd.xlane.f32.xlu0 %v2342_v30 }
0x1962   :  { %v2329_v42 = vpop.xlane.xlu0 %2328 }
0x1963   :  { %v2333_v61 = vsub.f32 %v2325_v55, %v2329_v42 }
0x1965   :  { %v2335_v31 = vmul.f32 1.442695, %v2333_v61 }
0x1966   :  { %v2344_v32 = vpop.xlane.xlu0 %2343 }
0x1967   :  { %3724 = vpow2.f32 %v2335_v31 }
0x1968   :  { %3726 = vrcp.f32 %v2344_v32 }
0x1974   :  { %v3725_v33 = vpop.eup %3724 }
0x1975   :  { %v3727_v34 = vpop.eup %3726  ;;  %v2339_v35 = vsel %vm274_vm2, %v3725_v33, 0.0 }
0x1976   :  { %2340 = vadd.xlane.f32.xlu0 %v2339_v35  ;;  %v2348_v36 = vmul.f32 %v3727_v34, %v3723_v28 }
0x1978   :  { %v2350_v38 = vpack.c.bf16 %v2348_v36, %v2348_v36 }
0x197a   :  { %3534 = vmatmul.mubr.msk.bf16.vlgmr.msra.gmra.mxu0 %vm274_vm2, %v2350_v38 }
0x197b   :  { %3544 = vmatpush3.bf16.xpose.msra.mxu0 %v2506_v39  ;;  %3545 = vmatprep.mubr.msk.bf16.mxu0 %vm3821_vm1, %v3820_v17 }
0x197c   :  { %3555 = vmatprep.subr.bf16.mxu0 %v3820_v17 }
0x198c   :  { %2351 = vrot.lane.b32.xlu0 %v4310_v5, %s3830_s10 }
0x1990   :  { %2498 = vrot.lane.b32.xlu0 %v4310_v5, %s3832_s20 }
0x19ff   :  { %v2341_v40 = vpop.xlane.xlu0 %2340 }
0x1a00   :  { %3728 = vrcp.f32 %v2341_v40 }
0x1a03   :  { %v2352_v41 = vpop.permute.xlu0 %2351 }
0x1a04   :  { %v2357_v43 = vsel %vm403_vm4, %v2352_v41, 0 }
0x1a05   :  { %3526 = vmatpush3.bf16.msra.mxu1 %v2357_v43 }
0x1a06   :  { %3537 = vmatprep.subr.bf16.mxu1 %v3820_v17 }
0x1a07   :  { %v2499_v44 = vpop.permute.xlu0 %2498 }
0x1a08   :  { %3546 = vmatmul.mubr.msk.bf16.vlgmr.msra.gmra.mxu0 %vm274_vm2, %v2499_v44 }
0x1a09   :  { %3557 = vmatprep.mubr.msk.bf16.mxu0 %vm3821_vm1, %v3820_v17 }
0x1a0d   :  { %v3729_v47 = vpop.eup %3728 }
0x1a0e   :  { %v2346_v48 = vmul.f32 %v3729_v47, %v3725_v33 }
0x1a10   :  { %v2349_v50 = vpack.c.bf16 %v2346_v48, %v2346_v48  ;;  %v1556_v48 = vld [vmem:[%s4604_s19 + $0x18] sm:$0xff] }
0x1a12   :  { %3528 = vmatmul.mubr.msk.bf16.vlgmr.msra.gmra.mxu1 %vm274_vm2, %v2349_v50  ;;  %v2723_v50 = vpack.c.bf16 %v1556_v48, %v1556_v48 }
0x1a13   :  { %3539 = vmatprep.mubr.msk.bf16.mxu1 %vm3821_vm1, %v3820_v17  ;;  %3538 = vmatpush3.bf16.msra.mxu1 %v2453_v59 }
0x1a14   :  { %3549 = vmatprep.subr.bf16.mxu1 %v3820_v17 }
0x1a3a   :  { %v2441_v51 = vpop.f32.mrf.mxu0 }
0x1a3c   :  { %v3535_v52 = vpop.f32.mrf.mxu0 }
0x1a3e   :  { %v2444_v53 = vpop.f32.mrf.mxu0 }
0x1a40   :  { %v3536_v54 = vpop.f32.mrf.mxu0 }
0x1ac8   :  { %v2542_v60 = vpop.f32.mrf.mxu0 }
0x1ac9   :  { %v2598_v62 = vmul.f32 0.35355338, %v2542_v60 }
0x1aca   :  { %v3547_v0 = vpop.f32.mrf.mxu0 }
0x1acb   :  { %v2600_v3 = vadd.f32 %v2598_v62, %v4043_v56 }
0x1acc   :  { %v2545_v6 = vpop.f32.mrf.mxu0 }
0x1acd   :  { %v2602_v8 = vsel %vm274_vm2, %v2600_v3, -inf }
0x1ace   :  { %2603 = vmax.xlane.f32.xlu0 %v2602_v8  ;;  %v3548_v1 = vpop.f32.mrf.mxu0 }
0x1ad2   :  { %v2393_v11 = vpop.f32.mrf.mxu1 }
0x1ad3   :  { %v2447_v12 = vpack.c.bf16 %v2441_v51, %v2393_v11  ;;  %v2728_v51 = vsel %vm403_vm4, %v2723_v50, 0  ;;  %v1575_v50 = vld [vmem:[%s4609_s1 + $0x50] sm:$0xff] }
0x1ad4   :  { %v3529_v13 = vpop.f32.mrf.mxu1 }
0x1ad5   :  { %3540 = vmatmul.mubr.msk.bf16.vlgmr.msra.gmra.mxu1 %vm274_vm2, %v2447_v12 }
0x1ad6   :  { %3550 = vmatpush3.bf16.xpose.msra.mxu1 %v2556_v14  ;;  %v2396_v15 = vpop.f32.mrf.mxu1  ;;  %3551 = vmatprep.mubr.msk.bf16.mxu1 %vm3821_vm1, %v3820_v17 }
0x1ad7   :  { %3561 = vmatprep.subr.bf16.mxu1 %v3820_v17 }
0x1ad8   :  { %v3530_v16 = vpop.f32.mrf.mxu1 }
0x1add   :  { %3552 = vmatmul.mubr.msk.bf16.vlgmr.msra.gmra.mxu1 %vm274_vm2, %v2549_v18 }
0x1ade   :  { %3563 = vmatprep.mubr.msk.bf16.mxu1 %vm3821_vm1, %v3820_v17 }
0x1b57   :  { %v2604_v19 = vpop.xlane.xlu0 %2603 }
0x1b58   :  { %v2608_v20 = vsub.f32 %v2600_v3, %v2604_v19  ;;  %v3163_v3 = vld [vmem:[%s4605_s24] ss:$0 sm:$0xff] }
0x1b5a   :  { %v2610_v45 = vmul.f32 1.442695, %v2608_v20 }
0x1b5c   :  { %3730 = vpow2.f32 %v2610_v45 }
0x1b69   :  { %v3731_v4 = vpop.eup %3730 }
0x1b6a   :  { %v2614_v22 = vsel %vm274_vm2, %v3731_v4, 0.0 }
0x1b6b   :  { %2615 = vadd.xlane.f32.xlu0 %v2614_v22 }
0x1b95   :  { %v2489_v25 = vpop.f32.mrf.mxu1 }
0x1b96   :  { %v4484_v46 = vadd.f32 %v2489_v25, %v2217_v23 }
0x1b97   :  { %v3541_v55 = vpop.f32.mrf.mxu1 }
0x1b99   :  { %v2492_v27 = vpop.f32.mrf.mxu1 }
0x1b9a   :  { %v4488_v28 = vadd.f32 %v2492_v27, %v2220_v26  ;;  %v1562_v26 = vld [vmem:[%s4606_s30 + $0x10] sm:$0xff]  ;;  %v1563_v27 = vld [vmem:[%s4606_s30 + $0x18] sm:$0xff] }
0x1b9b   :  { %v3542_v29 = vpop.f32.mrf.mxu1 }
0x1b9c   :  { %v2827_v29 = vpack.c.bf16 %v1563_v27, %v1562_v26 }
0x1b9d   :  { %v2592_v30 = vpop.f32.mrf.mxu1 }
0x1b9e   :  { %v2599_v42 = vmul.f32 0.35355338, %v2592_v30  ;;  %v1561_v30 = vld [vmem:[%s4606_s30 + $0x8] sm:$0xff] }
0x1b9f   :  { %v3553_v61 = vpop.f32.mrf.mxu1 }
0x1ba0   :  { %v2601_v31 = vadd.f32 %v2599_v42, %v4043_v56 }
0x1ba1   :  { %v2595_v32 = vpop.f32.mrf.mxu1 }
0x1ba2   :  { %v2605_v33 = vsel %vm274_vm2, %v2601_v31, -inf }
0x1ba3   :  { %2606 = vmax.xlane.f32.xlu1 %v2605_v33  ;;  %v3554_v63 = vpop.f32.mrf.mxu1 }
0x1bb4   :  { %2674 = vrot.lane.b32.xlu1 %v4314_v9, %s3833_s15 }
0x1bf4   :  { %v2616_v37 = vpop.xlane.xlu0 %2615 }
0x1c2c   :  { %v2607_v2 = vpop.xlane.xlu1 %2606 }
0x1c2d   :  { %v2609_v34 = vsub.f32 %v2601_v31, %v2607_v2 }
0x1c2f   :  { %v2612_v7 = vmul.f32 1.442695, %v2609_v34 }
0x1c30   :  { %v2675_v21 = vpop.permute.xlu1 %2674 }
0x1c31   :  { %3732 = vpow2.f32 %v2612_v7  ;;  %v2680_v35 = vsel %vm403_vm4, %v2675_v21, 0  ;;  %v3164_v21 = vld [vmem:[%s4607_s6] ss:$0 sm:$0xff] }
0x1c32   :  { %3562 = vmatpush3.bf16.msra.mxu1 %v2680_v35  ;;  %3734 = vrcp.f32 %v2616_v37  ;;  %v3165_v37 = vld [vmem:[%s4608_s18] ss:$0 sm:$0xff] }
0x1c33   :  { %3573 = vmatprep.subr.bf16.mxu1 %v3820_v17 }
0x1c3e   :  { %v3733_v36 = vpop.eup %3732 }
0x1c3f   :  { %v2617_v56 = vsel %vm274_vm2, %v3733_v36, 0.0  ;;  %v3735_v9 = vpop.eup %3734 }
0x1c40   :  { %2618 = vadd.xlane.f32.xlu0 %v2617_v56  ;;  %v2621_v39 = vmul.f32 %v3735_v9, %v3731_v4 }
0x1c42   :  { %v2624_v43 = vpack.c.bf16 %v2621_v39, %v2621_v39 }
0x1c56   :  { %2626 = vrot.lane.b32.xlu0 %v4310_v5, %s3833_s15 }
0x1cc9   :  { %v2619_v38 = vpop.xlane.xlu0 %2618 }
0x1cca   :  { %3736 = vrcp.f32 %v2619_v38 }
0x1ccd   :  { %v2627_v40 = vpop.permute.xlu0 %2626 }
0x1cce   :  { %v2632_v41 = vsel %vm403_vm4, %v2627_v40, 0 }
0x1ccf   :  { %3556 = vmatpush3.bf16.msra.mxu0 %v2632_v41  ;;  %v1579_v41 = vld [vmem:[%s4609_s1 + $0x70] sm:$0xff] }
0x1cd0   :  { %3567 = vmatprep.subr.bf16.mxu0 %v3820_v17 }
0x1cd2   :  { %3558 = vmatmul.mubr.msk.bf16.vlgmr.msra.gmra.mxu0 %vm274_vm2, %v2624_v43  ;;  %v1580_v43 = vld [vmem:[%s4609_s1 + $0x78] sm:$0xff] }
0x1cd3   :  { %3569 = vmatprep.mubr.msk.bf16.mxu0 %vm3821_vm1, %v3820_v17  ;;  %3568 = vmatpush3.bf16.msra.mxu0 %v2728_v51  ;;  %v1576_v51 = vld [vmem:[%s4609_s1 + $0x58] sm:$0xff] }
0x1cd4   :  { %3581 = vmatprep.subr.bf16.mxu0 %v3820_v17 }
0x1cd7   :  { %v3737_v5 = vpop.eup %3736 }
0x1cd8   :  { %v2623_v44 = vmul.f32 %v3737_v5, %v3733_v36  ;;  %v2902_v5 = vpack.c.bf16 %v1580_v43, %v1579_v41 }
0x1cda   :  { %v2625_v47 = vpack.c.bf16 %v2623_v44, %v2623_v44  ;;  %v1577_v44 = vld [vmem:[%s4609_s1 + $0x60] sm:$0xff] }
0x1cdc   :  { %3564 = vmatmul.mubr.msk.bf16.vlgmr.msra.gmra.mxu1 %vm274_vm2, %v2625_v47  ;;  %v1578_v47 = vld [vmem:[%s4609_s1 + $0x68] sm:$0xff] }
0x1cdd   :  { %3577 = vmatprep.mubr.msk.bf16.mxu1 %vm3821_vm1, %v3820_v17  ;;  %3574 = vmatpush3.bf16.msra.mxu1 %v2827_v29  ;;  %v2901_v48 = vpack.c.bf16 %v1578_v47, %v1577_v44  ;;  %v2957_v44 = vld [vmem:[%s3984_s28 + $0x18] sm:$0xff]  ;;  %v2954_v47 = vld [vmem:[%s3984_s28] sm:$0xff] }
0x1cde   :  { %3575 = vmatprep.subr.bf16.mxu1 %v3820_v17 }
0x1d92   :  { %v2668_v52 = vpop.f32.mrf.mxu0 }
0x1d94   :  { %v3559_v53 = vpop.f32.mrf.mxu0 }
0x1d95   :  { %v1573_v53 = vld [vmem:[%s4609_s1 + $0x40] sm:$0xff] }
0x1d96   :  { %v2671_v54 = vpop.f32.mrf.mxu0 }
0x1d97   :  { %v1574_v54 = vld [vmem:[%s4609_s1 + $0x48] sm:$0xff] }
0x1d98   :  { %v3560_v57 = vpop.f32.mrf.mxu0 }
0x1d99   :  { %v2899_v57 = vpack.c.bf16 %v1574_v54, %v1573_v53 }
0x1d9c   :  { %v2716_v58 = vpop.f32.mrf.mxu1 }
0x1d9d   :  { %v2722_v59 = vpack.c.bf16 %v2716_v58, %v2668_v52  ;;  %v2900_v52 = vpack.c.bf16 %v1576_v51, %v1575_v50  ;;  %v1571_v58 = vld [vmem:[%s4609_s1 + $0x30] sm:$0xff]  ;;  %v2955_v50 = vld [vmem:[%s3984_s28 + $0x8] sm:$0xff] }
0x1d9e   :  { %v3565_v60 = vpop.f32.mrf.mxu1  ;;  %v3015_v51 = vpack.c.bf16 %v2955_v50, %v2954_v47 }
0x1d9f   :  { %3570 = vmatmul.mubr.msk.bf16.vlgmr.msra.gmra.mxu0 %vm274_vm2, %v2722_v59  ;;  %v1572_v59 = vld [vmem:[%s4609_s1 + $0x38] sm:$0xff] }
0x1da0   :  { %v2719_v62 = vpop.f32.mrf.mxu1  ;;  %3597 = vmatprep.mubr.msk.bf16.mxu0 %vm3821_vm1, %v3820_v17  ;;  %3582 = vmatpush3.bf16.msra.mxu0 %v2902_v5  ;;  %v2898_v60 = vpack.c.bf16 %v1572_v59, %v1571_v58 }
0x1da1   :  { %3583 = vmatprep.subr.bf16.mxu0 %v3820_v17  ;;  %v1569_v62 = vld [vmem:[%s4609_s1 + $0x20] sm:$0xff] }
0x1da2   :  { %v3566_v0 = vpop.f32.mrf.mxu1 }
0x1da3   :  { %v1570_v0 = vld [vmem:[%s4609_s1 + $0x28] sm:$0xff] }
0x1da4   :  { %3584 = vmatpush3.bf16.msra.mxu0 %v2901_v48 }
0x1da5   :  { %3585 = vmatprep.subr.bf16.mxu0 %v3820_v17 }
0x1da8   :  { %3586 = vmatpush3.bf16.msra.mxu0 %v2900_v52 }
0x1da9   :  { %3587 = vmatprep.subr.bf16.mxu0 %v3820_v17 }
0x1dac   :  { %3588 = vmatpush3.bf16.msra.mxu0 %v2899_v57 }
0x1dad   :  { %3589 = vmatprep.subr.bf16.mxu0 %v3820_v17 }
0x1db0   :  { %3590 = vmatpush3.bf16.msra.mxu0 %v2898_v60 }
0x1db1   :  { %3591 = vmatprep.subr.bf16.mxu0 %v3820_v17 }
0x1e5f   :  { %v2764_v6 = vpop.f32.mrf.mxu0 }
0x1e60   :  { %v2771_v8 = vadd.f32 %v2764_v6, %v4484_v46  ;;  %v1567_v6 = vld [vmem:[%s4609_s1 + $0x10] sm:$0xff] }
0x1e61   :  { %v3571_v1 = vpop.f32.mrf.mxu0 }
0x1e62   :  { %v2779_v10 = vadd.f32 %v3163_v3, %v2771_v8  ;;  %v1568_v8 = vld [vmem:[%s4609_s1 + $0x18] sm:$0xff] }
0x1e63   :  { %v2767_v11 = vpop.f32.mrf.mxu0  ;;  %v2896_v1 = vpack.c.bf16 %v1568_v8, %v1567_v6 }
0x1e64   :  { %v4516_v12 = vadd.f32 %v2779_v10, %v4285_v49  ;;  %v2772_v13 = vadd.f32 %v2767_v11, %v4488_v28  ;;  %v1560_v28 = vld [vmem:[%s4606_s30] sm:$0xff]  ;;  %v1566_v11 = vld [vmem:[%s4609_s1 + $0x8] sm:$0xff] }
0x1e65   :  { %v3572_v14 = vpop.f32.mrf.mxu0  ;;  %v2826_v42 = vpack.c.bf16 %v1561_v30, %v1560_v28  ;;  %v1565_v10 = vld [vmem:[%s4609_s1] sm:$0xff] }
0x1e66   :  { %v2780_v15 = vadd.f32 %v3163_v3, %v2772_v13  ;;  %v2783_v16 = vsel %vm172_vm0, %v4516_v12, 0.0  ;;  %v2897_v3 = vpack.c.bf16 %v1570_v0, %v1569_v62  ;;  %v2895_v13 = vpack.c.bf16 %v1566_v11, %v1565_v10  ;;  %v3166_v14 = vld [vmem:[%s4610_s22] ss:$0 sm:$0xff] }
0x1e67   :  { %2784 = vadd.xlane.f32.xlu1 %v2783_v16  ;;  %3576 = vmatpush3.bf16.msra.mxu1 %v2826_v42  ;;  %v3171_v62 = vld [vmem:[%s3973_s16] ss:$0 sm:$0xff]  ;;  %s3834_s16 = smov [#allocation5]  }
0x1e68   :  { %v4522_v18 = vadd.f32 %v2780_v15, %v4290_v24  ;;  %3601 = vmatprep.subr.bf16.mxu1 %v3820_v17  ;;  %3592 = vmatpush3.bf16.msra.mxu0 %v2897_v3  ;;  %v3172_v3 = vld [vmem:[%s3978_s23] ss:$0 sm:$0xff]  ;;  %s3067_s23 = sshll.u32 %s3834_s16, 4  ;;  %s3068_s23 = int_to_ptr.vmem [resolvable:$true] %s3067_s23 }
0x1e69   :  { %3593 = vmatprep.subr.bf16.mxu0 %v3820_v17  ;;  %s3766_s5 = scalar_lea.vmem %s3068_s23, 32  ;;  %p3771_p6 = scmp.lt.s32.totalorder %s3068_s23, %s3068_s23 }
0x1e6a   :  { %v2786_v19 = vsel %vm172_vm0, %v4522_v18, 0.0  ;;  %p3767_p5 = scmp.ne.s32.totalorder %s3068_s23, %s3766_s5  ;;  %p3772_p7 = scmp.lt.s32.totalorder %s3766_s5, %s3766_s5 }
0x1e6b   :  { %2787 = vadd.xlane.f32.xlu0 %v2786_v19 }
0x1e6c   :  { %3594 = vmatpush3.bf16.msra.mxu0 %v2896_v1  ;;  %p3773_p8 = por %p3772_p7, %p3771_p6 }
0x1e6d   :  { %3595 = vmatprep.subr.bf16.mxu0 %v3820_v17 }
0x1e6e   :  { %p3774_p9 = pnand %p3773_p8, %p3767_p5 }
0x1e70   :  { %3596 = vmatpush3.bf16.msra.mxu0 %v2895_v13 }
0x1ef0   :  { %v2785_v49 = vpop.xlane.xlu1 %2784 }
0x1ef1   :  { %v2789_v20 = vmul.f32 0.03125, %v2785_v49 }
0x1ef3   :  { %v2791_v45 = vsub.f32 %v4516_v12, %v2789_v20 }
0x1ef4   :  { %v2788_v4 = vpop.xlane.xlu0 %2787 }
0x1ef5   :  { %v2790_v22 = vmul.f32 0.03125, %v2788_v4  ;;  %v2793_v23 = vmul.f32 %v2791_v45, %v2791_v45 }
0x1ef7   :  { %v2792_v25 = vsub.f32 %v4522_v18, %v2790_v22  ;;  %v2795_v46 = vsel %vm172_vm0, %v2793_v23, 0.0 }
0x1ef8   :  { %2796 = vadd.xlane.f32.xlu0 %v2795_v46 }
0x1ef9   :  { %v2794_v24 = vmul.f32 %v2792_v25, %v2792_v25 }
0x1efb   :  { %v2798_v55 = vsel %vm172_vm0, %v2794_v24, 0.0 }
0x1efc   :  { %2799 = vadd.xlane.f32.xlu1 %v2798_v55 }
0x1f81   :  { %v2797_v61 = vpop.xlane.xlu0 %2796 }
0x1f82   :  { %v2801_v31 = vmul.f32 0.03125, %v2797_v61  ;;  %v3170_v61 = vld [vmem:[%s4611_s26] ss:$0 sm:$0xff] }
0x1f84   :  { %v2803_v32 = vadd.f32 1e-05, %v2801_v31 }
0x1f85   :  { %v2800_v33 = vpop.xlane.xlu1 %2799 }
0x1f86   :  { %3738 = vrsqrt.f32 %v2803_v32  ;;  %v2802_v63 = vmul.f32 0.03125, %v2800_v33 }
0x1f88   :  { %v2804_v2 = vadd.f32 1e-05, %v2802_v63 }
0x1f8a   :  { %3740 = vrsqrt.f32 %v2804_v2 }
0x1f93   :  { %v3739_v34 = vpop.eup %3738 }
0x1f94   :  { %v2807_v7 = vmul.f32 %v3739_v34, %v2791_v45 }
0x1f96   :  { %v2815_v56 = vmul.f32 %v3164_v21, %v2807_v7 }
0x1f97   :  { %v3741_v35 = vpop.eup %3740 }
0x1f98   :  { %v2808_v36 = vmul.f32 %v3741_v35, %v2792_v25  ;;  %v2823_v38 = vadd.f32 %v3165_v37, %v2815_v56 }
0x1f9a   :  { %v2816_v9 = vmul.f32 %v3164_v21, %v2808_v36 }
0x1f9c   :  { %v2824_v39 = vadd.f32 %v3165_v37, %v2816_v9 }
0x1f9e   :  { %v2825_v40 = vpack.c.bf16 %v2824_v39, %v2823_v38 }
0x1fa0   :  { %3578 = vmatmul.mubr.msk.bf16.vlgmr.msra.gmra.mxu1 %vm172_vm0, %v2825_v40 }
0x1fa1   :  { %3605 = vmatprep.mubr.msk.bf16.mxu1 %vm3821_vm1, %v3820_v17 }
0x2060   :  { %v2871_v15 = vpop.f32.mrf.mxu1 }
0x2061   :  { %v2872_v16 = vadd.f32 %v3166_v14, %v2871_v15 }
0x2062   :  { %v3579_v19 = vpop.f32.mrf.mxu1 }
0x2063   :  { %v3168_v49 = vmul.f32 -1.702, %v2872_v16 }
0x2064   :  { %v2874_v20 = vpop.f32.mrf.mxu1 }
0x2065   :  { %v2882_v45 = vmul.f32 1.442695, %v3168_v49  ;;  %v2875_v4 = vadd.f32 %v3166_v14, %v2874_v20 }
0x2066   :  { %v3580_v22 = vpop.f32.mrf.mxu1 }
0x2067   :  { %3742 = vpow2.f32 %v2882_v45  ;;  %v3169_v23 = vmul.f32 -1.702, %v2875_v4 }
0x2069   :  { %v2884_v25 = vmul.f32 1.442695, %v3169_v23 }
0x206b   :  { %3744 = vpow2.f32 %v2884_v25 }
0x2074   :  { %v3743_v46 = vpop.eup %3742 }
0x2075   :  { %v2886_v24 = vadd.f32 1.0, %v3743_v46 }
0x2077   :  { %3746 = vrcp.f32 %v2886_v24 }
0x2078   :  { %v3745_v55 = vpop.eup %3744 }
0x2079   :  { %v2887_v26 = vadd.f32 1.0, %v3745_v55 }
0x207b   :  { %3748 = vrcp.f32 %v2887_v26 }
0x2084   :  { %v3747_v27 = vpop.eup %3746 }
0x2085   :  { %v2892_v29 = vmul.f32 %v3747_v27, %v2872_v16 }
0x2088   :  { %v3749_v28 = vpop.eup %3748 }
0x2089   :  { %v2893_v30 = vmul.f32 %v3749_v28, %v2875_v4 }
0x208b   :  { %v2894_v42 = vpack.c.bf16 %v2893_v30, %v2892_v29 }
0x208d   :  { %3598 = vmatmul.mubr.bf16.vlgmr.msra.gmra.mxu0 %v2894_v42 }
0x214d   :  { %v2943_v31 = vpop.f32.mrf.mxu0 }
0x214e   :  { %v2944_v32 = vadd.f32 %v3170_v61, %v2943_v31 }
0x214f   :  { %v3599_v33 = vpop.f32.mrf.mxu0 }
0x2150   :  { %v2950_v63 = vadd.f32 %v2944_v32, %v4516_v12 }
0x2151   :  { %v2946_v2 = vpop.f32.mrf.mxu0 }
0x2152   :  { %v2947_v34 = vadd.f32 %v3170_v61, %v2946_v2  ;;  %v2958_v7 = vsel %vm172_vm0, %v2950_v63, 0.0 }
0x2153   :  { %2959 = vadd.xlane.f32.xlu0 %v2958_v7  ;;  %v3600_v21 = vpop.f32.mrf.mxu0 }
0x2154   :  { %v2951_v35 = vadd.f32 %v2947_v34, %v4522_v18  ;;  %v2956_v18 = vld [vmem:[%s3984_s28 + $0x10] sm:$0xff]  ;;  %s3173_s28 = sld [smem:[#allocation4 + $0x1]] }
0x2155   :  { %v3016_v48 = vpack.c.bf16 %v2957_v44, %v2956_v18 }
0x2156   :  { %v2961_v36 = vsel %vm172_vm0, %v2951_v35, 0.0 }
0x2157   :  { %2962 = vadd.xlane.f32.xlu1 %v2961_v36  ;;  %3602 = vmatpush3.bf16.msra.mxu1 %v3016_v48 }
0x2158   :  { %3603 = vmatprep.subr.bf16.mxu1 %v3820_v17 }
0x215a   :  { %s3076_s2 = scalar_lea.vmem [#allocation2], %s3173_s28 }
0x215b   :  { %3604 = vmatpush3.bf16.msra.mxu1 %v3015_v51 }
0x21dc   :  { %v2960_v56 = vpop.xlane.xlu0 %2959 }
0x21dd   :  { %v2964_v37 = vmul.f32 0.03125, %v2960_v56 }
0x21df   :  { %v2966_v9 = vsub.f32 %v2950_v63, %v2964_v37 }
0x21e0   :  { %v2963_v38 = vpop.xlane.xlu1 %2962 }
0x21e1   :  { %v2965_v12 = vmul.f32 0.03125, %v2963_v38  ;;  %v2968_v39 = vmul.f32 %v2966_v9, %v2966_v9 }
0x21e3   :  { %v2967_v40 = vsub.f32 %v2951_v35, %v2965_v12  ;;  %v2970_v41 = vsel %vm172_vm0, %v2968_v39, 0.0 }
0x21e4   :  { %2971 = vadd.xlane.f32.xlu0 %v2970_v41 }
0x21e5   :  { %v2969_v43 = vmul.f32 %v2967_v40, %v2967_v40 }
0x21e7   :  { %v2973_v5 = vsel %vm172_vm0, %v2969_v43, 0.0 }
0x21e8   :  { %2974 = vadd.xlane.f32.xlu1 %v2973_v5 }
0x226d   :  { %v2972_v52 = vpop.xlane.xlu0 %2971 }
0x226e   :  { %v2976_v53 = vmul.f32 0.03125, %v2972_v52 }
0x2270   :  { %v2978_v54 = vadd.f32 1e-05, %v2976_v53 }
0x2271   :  { %v2975_v57 = vpop.xlane.xlu1 %2974 }
0x2272   :  { %3750 = vrsqrt.f32 %v2978_v54  ;;  %v2977_v58 = vmul.f32 0.03125, %v2975_v57 }
0x2274   :  { %v2979_v59 = vadd.f32 1e-05, %v2977_v58 }
0x2276   :  { %3752 = vrsqrt.f32 %v2979_v59 }
0x227f   :  { %v3751_v60 = vpop.eup %3750 }
0x2280   :  { %v2982_v0 = vmul.f32 %v3751_v60, %v2966_v9 }
0x2282   :  { %v2990_v6 = vmul.f32 %v3171_v62, %v2982_v0 }
0x2283   :  { %v3753_v8 = vpop.eup %3752 }
0x2284   :  { %v2998_v1 = vadd.f32 %v3172_v3, %v2990_v6  ;;  %v2983_v10 = vmul.f32 %v3753_v8, %v2967_v40 }
0x2286   :  { %3000 = vst.msk [vmem:[#allocation2] sm:$0xff] %vm172_vm0, %v2998_v1  ;;  %v2991_v17 = vmul.f32 %v3171_v62, %v2983_v10 }
0x2288   :  { %v2999_v11 = vadd.f32 %v3172_v3, %v2991_v17 }
0x228a   :  { %3001 = vst.msk [vmem:[#allocation2 + $0x8] sm:$0xff] %vm172_vm0, %v2999_v11 }
0x2291   :  { %v3174_v13 = vld [vmem:[%s3076_s2 + $0x8] sm:$0x1]  ;;  %v3004_v15 = vld [vmem:[%s3003_s7] sm:$0x1] }
0x2292   :  { %v3010_v14 = vrot.slane %v3174_v13, 7 }
0x2294   :  { %v3013_v16 = vsel %vm3012_vm5, %v3004_v15, %v3010_v14 }
0x2295   :  { %v3014_v19 = vpack.c.bf16 %v3013_v16, %v3013_v16 }
0x2297   :  { %3606 = vmatmul.mubr.msk.bf16.vlgmr.msra.gmra.mxu1 %vm172_vm0, %v3014_v19 }
0x2357   :  { %v3054_v49 = vpop.f32.mrf.mxu1 }
0x2358   :  { %3060 = vst [vmem:[#allocation5] sm:$0x3] %v3054_v49 }
0x2359   :  { %v3607_v20 = vpop.f32.mrf.mxu1 }
0x235a   :  { %3777 = shalt.err (!%p3774_p9)
}
0x235b   :  { %3070 = dma.vmem_to_hbm [thread:$0]  %s3068_s23, 32, %s3989_s12, [#allocation6]   ;;  %v3057_v45 = vpop.f32.mrf.mxu1 }
0x235d   :  { %v3608_v4 = vpop.f32.mrf.mxu1 }
0x235e   :  { %3788 = dma.done.wait [#allocation6], 32  }
0x235f   :  { %3789 = vsyncadd [#allocation6], 4294967264 }
0x2360   :  { %3074 = vsyncpa [#allocation6], 1 }

</bundles_post_ra>
